<compile_context>
chip_gen: v5e
topology: v5e:2x2
jax: 0.10.0
libtpu: 0.0.40
codegen_flags: <defaults>
</compile_context>

<pallas_src>
import functools

import numpy as np
import jax
import jax.numpy as jnp
from jax.experimental import pallas as pl
from jax.experimental.pallas import tpu as pltpu

K = 5                               # every conv / deconv in Maya is 5x5
VMEM_LIMIT = 32 * 1024 * 1024       # safe on v5e/v6e (128 MiB) and v7x (64 MiB)

# Per-layer packed geometry.
#   cp/cq : lane-interleaved channel pads (input / output)
#   winp  : padded input row width  (winp*cp  is the contraction K, mult of 128)
#   wop   : padded output row width (wop*cq   is the matmul N,      mult of 128)
#   hin   : padded input rows  (>= hop + 4, mult of 8)
#   hop   : padded output rows (mult of 8); ho/wo/cout are the real extents.
GEOM = {
    "conv1":   dict(cin=3,  cp=4,  hin=40, winp=32, cout=6,  cq=8,  ho=28, hop=32, wo=28, wop=32),
    "conv2":   dict(cin=6,  cp=8,  hin=24, winp=16, cout=16, cq=16, ho=10, hop=16, wo=10, wop=16),
    "deconv2": dict(cin=16, cp=16, hin=24, winp=24, cout=6,  cq=8,  ho=14, hop=16, wo=14, wop=16),
    "deconv1": dict(cin=6,  cp=8,  hin=40, winp=48, cout=3,  cq=4,  ho=32, hop=32, wo=32, wop=32),
}


# ----------------------------------------------------------------------------
# Pallas kernel: conv (valid, stride 1) as 5 row-tap matmuls on the
# (w,c)-interleaved layout.  Dense-K contraction, bf16 operands, f32 accum.
#   x_ref : (BB, Hin, Win*Cp)   bf16
#   w_ref : (5, Win*Cp, Wout*Cq) bf16   block-Toeplitz packed weights (resident)
#   b_ref : (1, Wout*Cq)        f32
#   o_ref : (BB, Hop, Wout*Cq)  bf16
# ----------------------------------------------------------------------------
def _rowconv_kernel(x_ref, w_ref, b_ref, o_ref, *, act):
    bb, hop, nout = o_ref.shape
    bias = b_ref[...]                                   # (1, Nout) f32
    for b in range(bb):                                 # static unroll: batch block
        acc = jnp.zeros((hop, nout), jnp.float32)       # <= (32,256) f32 = 8 vregs
        for ki in range(K):                             # 5 dense-K MXU matmuls
            acc = acc + jnp.dot(x_ref[b, ki:ki + hop, :], w_ref[ki],
                                preferred_element_type=jnp.float32)
        acc = acc + bias
        if act == "relu":
            acc = jnp.maximum(acc, 0.0)
        elif act == "tanh":
            acc = jnp.tanh(acc)                         # f32 operand -> EUP slot
        o_ref[b] = acc.astype(o_ref.dtype)


def rowconv(x_rows, w_packed, b_packed, act, g, bb):
    """x_rows: (B, Hin, Win*Cp) bf16 -> (B, Hop, Wout*Cq) bf16."""
    B, hin, kin = x_rows.shape
    hop, nout = g["hop"], g["wop"] * g["cq"]
    return pl.pallas_call(
        functools.partial(_rowconv_kernel, act=act),
        out_shape=jax.ShapeDtypeStruct((B, hop, nout), jnp.bfloat16),
        grid=(B // bb,),
        in_specs=[
            pl.BlockSpec((bb, hin, kin), lambda i: (i, 0, 0)),       # batch block
            pl.BlockSpec((K, kin, nout), lambda i: (0, 0, 0)),       # weights resident
            pl.BlockSpec((1, nout), lambda i: (0, 0)),
        ],
        out_specs=pl.BlockSpec((bb, hop, nout), lambda i: (i, 0, 0)),
        compiler_params=pltpu.CompilerParams(
            dimension_semantics=("parallel",),     # pipeline + megacore over batch
            vmem_limit_bytes=VMEM_LIMIT,
        ),
    )(x_rows, w_packed, b_packed)


def _batch_block(B):
    # Largest block <= 8 that divides B while keeping >= 2 grid steps (so the
    # parallel batch axis still splits across the two TensorCores on v7x).
    for bb in (8, 4, 2, 1):
        if B % bb == 0 and B // bb >= 2:
            return bb
    return B


# ----------------------------------------------------------------------------
# Layout glue (XLA): channel-minor NHWC <-> (B, H, W*Cp) interleaved rows.
# ----------------------------------------------------------------------------
def to_rows(x_bhwc, g):
    B, H, W, C = x_bhwc.shape
    x = jnp.pad(x_bhwc, ((0, 0), (0, g["hin"] - H),
                         (0, g["winp"] - W), (0, g["cp"] - C)))
    return x.reshape(B, g["hin"], g["winp"] * g["cp"]).astype(jnp.bfloat16)


def from_rows(y_rows, g):
    B = y_rows.shape[0]
    y = y_rows.reshape(B, g["hop"], g["wop"], g["cq"])
    return y[:, :g["ho"], :g["wo"], :g["cout"]]


# ----------------------------------------------------------------------------
# Pallas kernel: fused FC head (fc1 -> relu -> fc2 -> relu -> fc3).
# Weights resident in VMEM; intermediates never touch HBM.
# ----------------------------------------------------------------------------
def _fc_head_kernel(x_ref, w1_ref, b1_ref, w2_ref, b2_ref, w3_ref, b3_ref, y_ref):
    h = jnp.dot(x_ref[...], w1_ref[...],
                preferred_element_type=jnp.float32) + b1_ref[...]
    h = jnp.maximum(h, 0.0).astype(jnp.bfloat16)
    h = jnp.dot(h, w2_ref[...],
                preferred_element_type=jnp.float32) + b2_ref[...]
    h = jnp.maximum(h, 0.0).astype(jnp.bfloat16)
    y_ref[...] = jnp.dot(h, w3_ref[...],
                         preferred_element_type=jnp.float32) + b3_ref[...]


def fc_head(flat, q):
    B, kin = flat.shape                               # kin = 400 (real channels only)
    B_pad = ((B + 7) // 8) * 8
    TB = min(B_pad, 256)
    B_pad = ((B_pad + TB - 1) // TB) * TB             # no partial blocks
    x = jnp.pad(flat.astype(jnp.bfloat16), ((0, B_pad - B), (0, 512 - kin)))
    out = pl.pallas_call(
        _fc_head_kernel,
        out_shape=jax.ShapeDtypeStruct((B_pad, 128), jnp.float32),
        grid=(B_pad // TB,),
        in_specs=[
            pl.BlockSpec((TB, 512), lambda i: (i, 0)),
            pl.BlockSpec((512, 128), lambda i: (0, 0)),
            pl.BlockSpec((1, 128), lambda i: (0, 0)),
            pl.BlockSpec((128, 128), lambda i: (0, 0)),
            pl.BlockSpec((1, 128), lambda i: (0, 0)),
            pl.BlockSpec((128, 128), lambda i: (0, 0)),
            pl.BlockSpec((1, 128), lambda i: (0, 0)),
        ],
        out_specs=pl.BlockSpec((TB, 128), lambda i: (i, 0)),
        compiler_params=pltpu.CompilerParams(
            dimension_semantics=("parallel",),
            vmem_limit_bytes=VMEM_LIMIT,
        ),
    )(x, q["fc1_w"], q["fc1_b"], q["fc2_w"], q["fc2_b"], q["fc3_w"], q["fc3_b"])
    return out[:B]


# ----------------------------------------------------------------------------
# MaxPool2d(2,2,return_indices=True) / MaxUnpool2d(2,2) semantics (JAX glue).
# TODO(synk): fuse into the adjacent conv/deconv kernel epilogues/prologues.
# ----------------------------------------------------------------------------
def maxpool2x2_with_argmax(x):
    B, H, W, C = x.shape
    xr = x.reshape(B, H // 2, 2, W // 2, 2, C)
    xr = jnp.transpose(xr, (0, 1, 3, 5, 2, 4)).reshape(B, H // 2, W // 2, C, 4)
    pooled = jnp.max(xr, axis=-1)
    arg = jnp.argmax(xr, axis=-1)          # per-window winner slot (di*2 + dj)
    return pooled, arg


def maxunpool2x2(vals, arg):
    B, Hp, Wp, C = vals.shape
    onehot = jax.nn.one_hot(arg, 4, dtype=vals.dtype)        # (B,Hp,Wp,C,4)
    scat = vals[..., None] * onehot
    scat = scat.reshape(B, Hp, Wp, C, 2, 2)
    scat = jnp.transpose(scat, (0, 1, 4, 2, 5, 3)).reshape(B, Hp * 2, Wp * 2, C)
    return scat


# ----------------------------------------------------------------------------
# Maya forward
# ----------------------------------------------------------------------------
def maya_forward(x_nchw, q):
    B = x_nchw.shape[0]
    bb = _batch_block(B)
    x = jnp.transpose(x_nchw, (0, 2, 3, 1))                   # NCHW -> NHWC

    # encoder / classifier
    g = GEOM["conv1"]
    x1 = from_rows(rowconv(to_rows(x, g), q["conv1_w"], q["conv1_b"],
                           "relu", g, bb), g)                 # (B,28,28,6)
    x1_p, idx1 = maxpool2x2_with_argmax(x1)                   # (B,14,14,6)

    g = GEOM["conv2"]
    x2 = from_rows(rowconv(to_rows(x1_p, g), q["conv2_w"], q["conv2_b"],
                           "relu", g, bb), g)                 # (B,10,10,16)
    x2_p, idx2 = maxpool2x2_with_argmax(x2)                   # (B,5,5,16)

    flat = x2_p.reshape(B, 5 * 5 * 16)      # (h,w,c) order; fc1_w rows pre-permuted
    y = fc_head(flat, q)[:, :10].astype(jnp.float32)

    # decoder
    g = GEOM["deconv2"]
    d2 = maxunpool2x2(x2_p, idx2)                             # (B,10,10,16)
    d2 = jnp.pad(d2, ((0, 0), (4, 4), (4, 4), (0, 0)))        # transpose-conv halo
    d2 = from_rows(rowconv(to_rows(d2, g), q["deconv2_w"], q["deconv2_b"],
                           "relu", g, bb), g)                 # (B,14,14,6)

    g = GEOM["deconv1"]
    d1 = maxunpool2x2(d2, idx1)                               # (B,28,28,6)
    d1 = jnp.maximum(d1, 0)                                   # F.relu(d1)
    d1 = jnp.pad(d1, ((0, 0), (4, 4), (4, 4), (0, 0)))        # (B,36,36,6)
    xr = from_rows(rowconv(to_rows(d1, g), q["deconv1_w"], q["deconv1_b"],
                           "tanh", g, bb), g)                 # (B,32,32,3)

    x_recon = jnp.transpose(xr, (0, 3, 1, 2)).astype(jnp.float32)
    return y, x_recon


# ----------------------------------------------------------------------------
# Parameter init (PyTorch-like shapes) + one-time packing to the kernel layout
# ----------------------------------------------------------------------------
def init_params(key):
    keys = jax.random.split(key, 14)

    def u(k, shape, fan_in):
        lim = 1.0 / jnp.sqrt(float(fan_in))
        return jax.random.uniform(k, shape, jnp.float32, -lim, lim)

    p = {}
    p["conv1_w"] = u(keys[0], (5, 5, 3, 6), 3 * 25)        # conv: (k,k,Cin,Cout)
    p["conv1_b"] = u(keys[1], (6,), 3 * 25)
    p["conv2_w"] = u(keys[2], (5, 5, 6, 16), 6 * 25)
    p["conv2_b"] = u(keys[3], (16,), 6 * 25)
    p["deconv2_w"] = u(keys[4], (16, 6, 5, 5), 16 * 25)    # deconv: PyTorch (Cin,Cout,k,k)
    p["deconv2_b"] = u(keys[5], (6,), 16 * 25)
    p["deconv1_w"] = u(keys[6], (6, 3, 5, 5), 6 * 25)
    p["deconv1_b"] = u(keys[7], (3,), 6 * 25)
    p["fc1_w"] = u(keys[8], (400, 120), 400)               # linear: (in,out)
    p["fc1_b"] = u(keys[9], (120,), 400)
    p["fc2_w"] = u(keys[10], (120, 84), 120)
    p["fc2_b"] = u(keys[11], (84,), 120)
    p["fc3_w"] = u(keys[12], (84, 10), 84)
    p["fc3_b"] = u(keys[13], (10,), 84)
    return p


def _pack_rowconv(w_kkio, bias, g):
    """Pack a (5,5,Cin,Cout) conv weight into 5 block-Toeplitz (Kin,Nout)
    matrices so the kj taps and the real channels share the 128-lane
    contraction (dense-K), plus a lane-packed bias."""
    kin, nout = g["winp"] * g["cp"], g["wop"] * g["cq"]
    w_np = np.asarray(w_kkio, np.float32)
    w_full = np.zeros((K, g["winp"], g["cp"], g["wop"], g["cq"]), np.float32)
    for kj in range(K):
        for wo in range(g["wo"]):
            w_full[:, wo + kj, :g["cin"], wo, :g["cout"]] = w_np[:, kj]
    b_full = np.zeros((g["wop"], g["cq"]), np.float32)
    b_full[:g["wo"], :g["cout"]] = np.asarray(bias, np.float32)[None, :]
    return (jnp.asarray(w_full.reshape(K, kin, nout), jnp.bfloat16),
            jnp.asarray(b_full.reshape(1, nout), jnp.float32))


def prepare_params(p):
    """One-time pack: block-Toeplitz conv weights, permuted/padded FC weights."""
    q = {}
    q["conv1_w"], q["conv1_b"] = _pack_rowconv(p["conv1_w"], p["conv1_b"],
                                               GEOM["conv1"])
    q["conv2_w"], q["conv2_b"] = _pack_rowconv(p["conv2_w"], p["conv2_b"],
                                               GEOM["conv2"])

    def deconv_as_conv(w_t):
        # ConvTranspose2d(stride 1, pad 0) == conv of the halo-padded input with
        # the spatially flipped, channel-swapped kernel.
        w_eq = np.flip(np.asarray(w_t, np.float32), axis=(-2, -1))
        return np.transpose(w_eq, (2, 3, 0, 1))               # -> (k,k,Cin,Cout)

    q["deconv2_w"], q["deconv2_b"] = _pack_rowconv(deconv_as_conv(p["deconv2_w"]),
                                                   p["deconv2_b"], GEOM["deconv2"])
    q["deconv1_w"], q["deconv1_b"] = _pack_rowconv(deconv_as_conv(p["deconv1_w"]),
                                                   p["deconv1_b"], GEOM["deconv1"])

    # fc1: reorder rows from PyTorch (c,h,w) flatten to our (h,w,c) flatten and
    # pad the *real* 400 rows to 512 (compact flatten — no 128-channel padding).
    w1 = np.asarray(p["fc1_w"], np.float32).reshape(16, 5, 5, 120)
    w1 = np.transpose(w1, (1, 2, 0, 3)).reshape(400, 120)
    q["fc1_w"] = jnp.asarray(np.pad(w1, ((0, 112), (0, 8))), jnp.bfloat16)
    q["fc1_b"] = jnp.asarray(np.pad(np.asarray(p["fc1_b"], np.float32),
                                    (0, 8)).reshape(1, 128), jnp.float32)
    q["fc2_w"] = jnp.asarray(np.pad(np.asarray(p["fc2_w"], np.float32),
                                    ((0, 8), (0, 44))), jnp.bfloat16)
    q["fc2_b"] = jnp.asarray(np.pad(np.asarray(p["fc2_b"], np.float32),
                                    (0, 44)).reshape(1, 128), jnp.float32)
    q["fc3_w"] = jnp.asarray(np.pad(np.asarray(p["fc3_w"], np.float32),
                                    ((0, 44), (0, 118))), jnp.bfloat16)
    q["fc3_b"] = jnp.asarray(np.pad(np.asarray(p["fc3_b"], np.float32),
                                    (0, 118)).reshape(1, 128), jnp.float32)
    return q


if __name__ == "__main__":
    key = jax.random.PRNGKey(0)
    pkey, xkey = jax.random.split(key)
    params = prepare_params(init_params(pkey))
    # fc1 = Linear(16*5*5, 120) forces 32x32 spatial input (LeNet convention).
    x = jax.random.normal(xkey, (2, 3, 32, 32), jnp.float32)

    y, x_recon = jax.jit(maya_forward)(x, params)
    jax.block_until_ready((y, x_recon))

    assert y.shape == (2, 10), y.shape
    assert x_recon.shape == (2, 3, 32, 32), x_recon.shape
    assert bool(jnp.all(jnp.isfinite(y))) and bool(jnp.all(jnp.isfinite(x_recon)))
    print("KERNEL_OK")
</pallas_src>

<mosaic_0001>
module attributes {stable_mosaic.version = 11 : i64} {
  func.func @_rowconv_kernel(%arg0: i32, %arg1: memref<1x40x128xbf16, #tpu.memory_space<vmem>>, %arg2: memref<5x128x256xbf16, #tpu.memory_space<vmem>>, %arg3: memref<1x256xf32, #tpu.memory_space<vmem>>, %arg4: memref<1x32x256xbf16, #tpu.memory_space<vmem>>) attributes {dimension_semantics = [#tpu.dimension_semantics<parallel>], iteration_bounds = array<i64: 2>, scalar_prefetch = 0 : i64, scratch_operands = 0 : i64, tpu.core_type = #tpu.core_type<tc>, window_params = [{transform_indices = @transform_0, window_bounds = array<i64: 1, 40, 128>}, {pipeline_mode = #tpu.pipeline_mode<synchronous>, transform_indices = @transform_1, window_bounds = array<i64: 5, 128, 256>}, {pipeline_mode = #tpu.pipeline_mode<synchronous>, transform_indices = @transform_2, window_bounds = array<i64: 1, 256>}, {transform_indices = @transform_3, window_bounds = array<i64: 1, 32, 256>}]} {
    %c0 = arith.constant 0 : index
    %c0_0 = arith.constant 0 : index
    %0 = vector.load %arg3[%c0, %c0_0] : memref<1x256xf32, #tpu.memory_space<vmem>>, vector<1x256xf32>
    %cst = arith.constant 0.000000e+00 : f32
    %1 = vector.broadcast %cst : f32 to vector<32x256xf32>
    %c0_1 = arith.constant 0 : index
    %c0_2 = arith.constant 0 : index
    %c0_3 = arith.constant 0 : index
    %2 = vector.load %arg1[%c0_1, %c0_2, %c0_3] : memref<1x40x128xbf16, #tpu.memory_space<vmem>>, vector<1x32x128xbf16>
    %3 = vector.shape_cast %2 : vector<1x32x128xbf16> to vector<32x128xbf16>
    %c0_4 = arith.constant 0 : index
    %c0_5 = arith.constant 0 : index
    %c0_6 = arith.constant 0 : index
    %4 = vector.load %arg2[%c0_4, %c0_5, %c0_6] : memref<5x128x256xbf16, #tpu.memory_space<vmem>>, vector<1x128x256xbf16>
    %5 = vector.shape_cast %4 : vector<1x128x256xbf16> to vector<128x256xbf16>
    %cst_7 = arith.constant dense<0.000000e+00> : vector<32x256xf32>
    %6 = tpu.matmul %3, %5, %cst_7 {dimension_numbers = #tpu.dot_dimension_numbers<[1], [0], [0], [1], [0, 0, 1, 1], [], []>} : vector<32x128xbf16>, vector<128x256xbf16>, vector<32x256xf32> -> vector<32x256xf32>
    %7 = arith.addf %1, %6 : vector<32x256xf32>
    %c0_8 = arith.constant 0 : index
    %c1 = arith.constant 1 : index
    %c0_9 = arith.constant 0 : index
    %8 = vector.load %arg1[%c0_8, %c1, %c0_9] : memref<1x40x128xbf16, #tpu.memory_space<vmem>>, vector<1x32x128xbf16>
    %9 = vector.shape_cast %8 : vector<1x32x128xbf16> to vector<32x128xbf16>
    %c1_10 = arith.constant 1 : index
    %c0_11 = arith.constant 0 : index
    %c0_12 = arith.constant 0 : index
    %10 = vector.load %arg2[%c1_10, %c0_11, %c0_12] : memref<5x128x256xbf16, #tpu.memory_space<vmem>>, vector<1x128x256xbf16>
    %11 = vector.shape_cast %10 : vector<1x128x256xbf16> to vector<128x256xbf16>
    %cst_13 = arith.constant dense<0.000000e+00> : vector<32x256xf32>
    %12 = tpu.matmul %9, %11, %cst_13 {dimension_numbers = #tpu.dot_dimension_numbers<[1], [0], [0], [1], [0, 0, 1, 1], [], []>} : vector<32x128xbf16>, vector<128x256xbf16>, vector<32x256xf32> -> vector<32x256xf32>
    %13 = arith.addf %7, %12 : vector<32x256xf32>
    %c0_14 = arith.constant 0 : index
    %c2 = arith.constant 2 : index
    %c0_15 = arith.constant 0 : index
    %14 = vector.load %arg1[%c0_14, %c2, %c0_15] : memref<1x40x128xbf16, #tpu.memory_space<vmem>>, vector<1x32x128xbf16>
    %15 = vector.shape_cast %14 : vector<1x32x128xbf16> to vector<32x128xbf16>
    %c2_16 = arith.constant 2 : index
    %c0_17 = arith.constant 0 : index
    %c0_18 = arith.constant 0 : index
    %16 = vector.load %arg2[%c2_16, %c0_17, %c0_18] : memref<5x128x256xbf16, #tpu.memory_space<vmem>>, vector<1x128x256xbf16>
    %17 = vector.shape_cast %16 : vector<1x128x256xbf16> to vector<128x256xbf16>
    %cst_19 = arith.constant dense<0.000000e+00> : vector<32x256xf32>
    %18 = tpu.matmul %15, %17, %cst_19 {dimension_numbers = #tpu.dot_dimension_numbers<[1], [0], [0], [1], [0, 0, 1, 1], [], []>} : vector<32x128xbf16>, vector<128x256xbf16>, vector<32x256xf32> -> vector<32x256xf32>
    %19 = arith.addf %13, %18 : vector<32x256xf32>
    %c0_20 = arith.constant 0 : index
    %c3 = arith.constant 3 : index
    %c0_21 = arith.constant 0 : index
    %20 = vector.load %arg1[%c0_20, %c3, %c0_21] : memref<1x40x128xbf16, #tpu.memory_space<vmem>>, vector<1x32x128xbf16>
    %21 = vector.shape_cast %20 : vector<1x32x128xbf16> to vector<32x128xbf16>
    %c3_22 = arith.constant 3 : index
    %c0_23 = arith.constant 0 : index
    %c0_24 = arith.constant 0 : index
    %22 = vector.load %arg2[%c3_22, %c0_23, %c0_24] : memref<5x128x256xbf16, #tpu.memory_space<vmem>>, vector<1x128x256xbf16>
    %23 = vector.shape_cast %22 : vector<1x128x256xbf16> to vector<128x256xbf16>
    %cst_25 = arith.constant dense<0.000000e+00> : vector<32x256xf32>
    %24 = tpu.matmul %21, %23, %cst_25 {dimension_numbers = #tpu.dot_dimension_numbers<[1], [0], [0], [1], [0, 0, 1, 1], [], []>} : vector<32x128xbf16>, vector<128x256xbf16>, vector<32x256xf32> -> vector<32x256xf32>
    %25 = arith.addf %19, %24 : vector<32x256xf32>
    %c0_26 = arith.constant 0 : index
    %c4 = arith.constant 4 : index
    %c0_27 = arith.constant 0 : index
    %26 = vector.load %arg1[%c0_26, %c4, %c0_27] : memref<1x40x128xbf16, #tpu.memory_space<vmem>>, vector<1x32x128xbf16>
    %27 = vector.shape_cast %26 : vector<1x32x128xbf16> to vector<32x128xbf16>
    %c4_28 = arith.constant 4 : index
    %c0_29 = arith.constant 0 : index
    %c0_30 = arith.constant 0 : index
    %28 = vector.load %arg2[%c4_28, %c0_29, %c0_30] : memref<5x128x256xbf16, #tpu.memory_space<vmem>>, vector<1x128x256xbf16>
    %29 = vector.shape_cast %28 : vector<1x128x256xbf16> to vector<128x256xbf16>
    %cst_31 = arith.constant dense<0.000000e+00> : vector<32x256xf32>
    %30 = tpu.matmul %27, %29, %cst_31 {dimension_numbers = #tpu.dot_dimension_numbers<[1], [0], [0], [1], [0, 0, 1, 1], [], []>} : vector<32x128xbf16>, vector<128x256xbf16>, vector<32x256xf32> -> vector<32x256xf32>
    %31 = arith.addf %25, %30 : vector<32x256xf32>
    %32 = vector.broadcast %0 : vector<1x256xf32> to vector<32x256xf32>
    %33 = arith.addf %31, %32 : vector<32x256xf32>
    %cst_32 = arith.constant 0.000000e+00 : f32
    %34 = vector.broadcast %cst_32 : f32 to vector<32x256xf32>
    %35 = arith.maximumf %33, %34 : vector<32x256xf32>
    %36 = arith.truncf %35 : vector<32x256xf32> to vector<32x256xbf16>
    %c0_33 = arith.constant 0 : index
    %c0_34 = arith.constant 0 : index
    %c0_35 = arith.constant 0 : index
    %37 = vector.load %arg4[%c0_33, %c0_34, %c0_35] : memref<1x32x256xbf16, #tpu.memory_space<vmem>>, vector<1x32x256xbf16>
    %38 = vector.shape_cast %37 : vector<1x32x256xbf16> to vector<32x256xbf16>
    %39 = vector.shape_cast %36 : vector<32x256xbf16> to vector<1x32x256xbf16>
    tpu.vector_store %arg4[%c0_33, %c0_34, %c0_35], %39 {strides = array<i32>} : memref<1x32x256xbf16, #tpu.memory_space<vmem>>, vector<1x32x256xbf16>,
    return
  }
  func.func @transform_0(%arg0: i32) -> (i32, i32, i32) {
    %c0_i32 = arith.constant 0 : i32
    %c0_i32_0 = arith.constant 0 : i32
    %c0_i32_1 = arith.constant 0 : i32
    return %arg0, %c0_i32, %c0_i32_0 : i32, i32, i32
  }
  func.func @transform_1(%arg0: i32) -> (i32, i32, i32) {
    %c0_i32 = arith.constant 0 : i32
    %c0_i32_0 = arith.constant 0 : i32
    %c0_i32_1 = arith.constant 0 : i32
    %c0_i32_2 = arith.constant 0 : i32
    return %c0_i32, %c0_i32_0, %c0_i32_1 : i32, i32, i32
  }
  func.func @transform_2(%arg0: i32) -> (i32, i32) {
    %c0_i32 = arith.constant 0 : i32
    %c0_i32_0 = arith.constant 0 : i32
    %c0_i32_1 = arith.constant 0 : i32
    return %c0_i32, %c0_i32_0 : i32, i32
  }
  func.func @transform_3(%arg0: i32) -> (i32, i32, i32) {
    %c0_i32 = arith.constant 0 : i32
    %c0_i32_0 = arith.constant 0 : i32
    %c0_i32_1 = arith.constant 0 : i32
    return %arg0, %c0_i32, %c0_i32_0 : i32, i32, i32
  }
}

module attributes {stable_mosaic.version = 11 : i64} {
  func.func @_rowconv_kernel(%arg0: i32, %arg1: memref<1x24x128xbf16, #tpu.memory_space<vmem>>, %arg2: memref<5x128x256xbf16, #tpu.memory_space<vmem>>, %arg3: memref<1x256xf32, #tpu.memory_space<vmem>>, %arg4: memref<1x16x256xbf16, #tpu.memory_space<vmem>>) attributes {dimension_semantics = [#tpu.dimension_semantics<parallel>], iteration_bounds = array<i64: 2>, scalar_prefetch = 0 : i64, scratch_operands = 0 : i64, tpu.core_type = #tpu.core_type<tc>, window_params = [{transform_indices = @transform_0, window_bounds = array<i64: 1, 24, 128>}, {pipeline_mode = #tpu.pipeline_mode<synchronous>, transform_indices = @transform_1, window_bounds = array<i64: 5, 128, 256>}, {pipeline_mode = #tpu.pipeline_mode<synchronous>, transform_indices = @transform_2, window_bounds = array<i64: 1, 256>}, {transform_indices = @transform_3, window_bounds = array<i64: 1, 16, 256>}]} {
    %c0 = arith.constant 0 : index
    %c0_0 = arith.constant 0 : index
    %0 = vector.load %arg3[%c0, %c0_0] : memref<1x256xf32, #tpu.memory_space<vmem>>, vector<1x256xf32>
    %cst = arith.constant 0.000000e+00 : f32
    %1 = vector.broadcast %cst : f32 to vector<16x256xf32>
    %c0_1 = arith.constant 0 : index
    %c0_2 = arith.constant 0 : index
    %c0_3 = arith.constant 0 : index
    %2 = vector.load %arg1[%c0_1, %c0_2, %c0_3] : memref<1x24x128xbf16, #tpu.memory_space<vmem>>, vector<1x16x128xbf16>
    %3 = vector.shape_cast %2 : vector<1x16x128xbf16> to vector<16x128xbf16>
    %c0_4 = arith.constant 0 : index
    %c0_5 = arith.constant 0 : index
    %c0_6 = arith.constant 0 : index
    %4 = vector.load %arg2[%c0_4, %c0_5, %c0_6] : memref<5x128x256xbf16, #tpu.memory_space<vmem>>, vector<1x128x256xbf16>
    %5 = vector.shape_cast %4 : vector<1x128x256xbf16> to vector<128x256xbf16>
    %cst_7 = arith.constant dense<0.000000e+00> : vector<16x256xf32>
    %6 = tpu.matmul %3, %5, %cst_7 {dimension_numbers = #tpu.dot_dimension_numbers<[1], [0], [0], [1], [0, 0, 1, 1], [], []>} : vector<16x128xbf16>, vector<128x256xbf16>, vector<16x256xf32> -> vector<16x256xf32>
    %7 = arith.addf %1, %6 : vector<16x256xf32>
    %c0_8 = arith.constant 0 : index
    %c1 = arith.constant 1 : index
    %c0_9 = arith.constant 0 : index
    %8 = vector.load %arg1[%c0_8, %c1, %c0_9] : memref<1x24x128xbf16, #tpu.memory_space<vmem>>, vector<1x16x128xbf16>
    %9 = vector.shape_cast %8 : vector<1x16x128xbf16> to vector<16x128xbf16>
    %c1_10 = arith.constant 1 : index
    %c0_11 = arith.constant 0 : index
    %c0_12 = arith.constant 0 : index
    %10 = vector.load %arg2[%c1_10, %c0_11, %c0_12] : memref<5x128x256xbf16, #tpu.memory_space<vmem>>, vector<1x128x256xbf16>
    %11 = vector.shape_cast %10 : vector<1x128x256xbf16> to vector<128x256xbf16>
    %cst_13 = arith.constant dense<0.000000e+00> : vector<16x256xf32>
    %12 = tpu.matmul %9, %11, %cst_13 {dimension_numbers = #tpu.dot_dimension_numbers<[1], [0], [0], [1], [0, 0, 1, 1], [], []>} : vector<16x128xbf16>, vector<128x256xbf16>, vector<16x256xf32> -> vector<16x256xf32>
    %13 = arith.addf %7, %12 : vector<16x256xf32>
    %c0_14 = arith.constant 0 : index
    %c2 = arith.constant 2 : index
    %c0_15 = arith.constant 0 : index
    %14 = vector.load %arg1[%c0_14, %c2, %c0_15] : memref<1x24x128xbf16, #tpu.memory_space<vmem>>, vector<1x16x128xbf16>
    %15 = vector.shape_cast %14 : vector<1x16x128xbf16> to vector<16x128xbf16>
    %c2_16 = arith.constant 2 : index
    %c0_17 = arith.constant 0 : index
    %c0_18 = arith.constant 0 : index
    %16 = vector.load %arg2[%c2_16, %c0_17, %c0_18] : memref<5x128x256xbf16, #tpu.memory_space<vmem>>, vector<1x128x256xbf16>
    %17 = vector.shape_cast %16 : vector<1x128x256xbf16> to vector<128x256xbf16>
    %cst_19 = arith.constant dense<0.000000e+00> : vector<16x256xf32>
    %18 = tpu.matmul %15, %17, %cst_19 {dimension_numbers = #tpu.dot_dimension_numbers<[1], [0], [0], [1], [0, 0, 1, 1], [], []>} : vector<16x128xbf16>, vector<128x256xbf16>, vector<16x256xf32> -> vector<16x256xf32>
    %19 = arith.addf %13, %18 : vector<16x256xf32>
    %c0_20 = arith.constant 0 : index
    %c3 = arith.constant 3 : index
    %c0_21 = arith.constant 0 : index
    %20 = vector.load %arg1[%c0_20, %c3, %c0_21] : memref<1x24x128xbf16, #tpu.memory_space<vmem>>, vector<1x16x128xbf16>
    %21 = vector.shape_cast %20 : vector<1x16x128xbf16> to vector<16x128xbf16>
    %c3_22 = arith.constant 3 : index
    %c0_23 = arith.constant 0 : index
    %c0_24 = arith.constant 0 : index
    %22 = vector.load %arg2[%c3_22, %c0_23, %c0_24] : memref<5x128x256xbf16, #tpu.memory_space<vmem>>, vector<1x128x256xbf16>
    %23 = vector.shape_cast %22 : vector<1x128x256xbf16> to vector<128x256xbf16>
    %cst_25 = arith.constant dense<0.000000e+00> : vector<16x256xf32>
    %24 = tpu.matmul %21, %23, %cst_25 {dimension_numbers = #tpu.dot_dimension_numbers<[1], [0], [0], [1], [0, 0, 1, 1], [], []>} : vector<16x128xbf16>, vector<128x256xbf16>, vector<16x256xf32> -> vector<16x256xf32>
    %25 = arith.addf %19, %24 : vector<16x256xf32>
    %c0_26 = arith.constant 0 : index
    %c4 = arith.constant 4 : index
    %c0_27 = arith.constant 0 : index
    %26 = vector.load %arg1[%c0_26, %c4, %c0_27] : memref<1x24x128xbf16, #tpu.memory_space<vmem>>, vector<1x16x128xbf16>
    %27 = vector.shape_cast %26 : vector<1x16x128xbf16> to vector<16x128xbf16>
    %c4_28 = arith.constant 4 : index
    %c0_29 = arith.constant 0 : index
    %c0_30 = arith.constant 0 : index
    %28 = vector.load %arg2[%c4_28, %c0_29, %c0_30] : memref<5x128x256xbf16, #tpu.memory_space<vmem>>, vector<1x128x256xbf16>
    %29 = vector.shape_cast %28 : vector<1x128x256xbf16> to vector<128x256xbf16>
    %cst_31 = arith.constant dense<0.000000e+00> : vector<16x256xf32>
    %30 = tpu.matmul %27, %29, %cst_31 {dimension_numbers = #tpu.dot_dimension_numbers<[1], [0], [0], [1], [0, 0, 1, 1], [], []>} : vector<16x128xbf16>, vector<128x256xbf16>, vector<16x256xf32> -> vector<16x256xf32>
    %31 = arith.addf %25, %30 : vector<16x256xf32>
    %32 = vector.broadcast %0 : vector<1x256xf32> to vector<16x256xf32>
    %33 = arith.addf %31, %32 : vector<16x256xf32>
    %cst_32 = arith.constant 0.000000e+00 : f32
    %34 = vector.broadcast %cst_32 : f32 to vector<16x256xf32>
    %35 = arith.maximumf %33, %34 : vector<16x256xf32>
    %36 = arith.truncf %35 : vector<16x256xf32> to vector<16x256xbf16>
    %c0_33 = arith.constant 0 : index
    %c0_34 = arith.constant 0 : index
    %c0_35 = arith.constant 0 : index
    %37 = vector.load %arg4[%c0_33, %c0_34, %c0_35] : memref<1x16x256xbf16, #tpu.memory_space<vmem>>, vector<1x16x256xbf16>
    %38 = vector.shape_cast %37 : vector<1x16x256xbf16> to vector<16x256xbf16>
    %39 = vector.shape_cast %36 : vector<16x256xbf16> to vector<1x16x256xbf16>
    tpu.vector_store %arg4[%c0_33, %c0_34, %c0_35], %39 {strides = array<i32>} : memref<1x16x256xbf16, #tpu.memory_space<vmem>>, vector<1x16x256xbf16>,
    return
  }
  func.func @transform_0(%arg0: i32) -> (i32, i32, i32) {
    %c0_i32 = arith.constant 0 : i32
    %c0_i32_0 = arith.constant 0 : i32
    %c0_i32_1 = arith.constant 0 : i32
    return %arg0, %c0_i32, %c0_i32_0 : i32, i32, i32
  }
  func.func @transform_1(%arg0: i32) -> (i32, i32, i32) {
    %c0_i32 = arith.constant 0 : i32
    %c0_i32_0 = arith.constant 0 : i32
    %c0_i32_1 = arith.constant 0 : i32
    %c0_i32_2 = arith.constant 0 : i32
    return %c0_i32, %c0_i32_0, %c0_i32_1 : i32, i32, i32
  }
  func.func @transform_2(%arg0: i32) -> (i32, i32) {
    %c0_i32 = arith.constant 0 : i32
    %c0_i32_0 = arith.constant 0 : i32
    %c0_i32_1 = arith.constant 0 : i32
    return %c0_i32, %c0_i32_0 : i32, i32
  }
  func.func @transform_3(%arg0: i32) -> (i32, i32, i32) {
    %c0_i32 = arith.constant 0 : i32
    %c0_i32_0 = arith.constant 0 : i32
    %c0_i32_1 = arith.constant 0 : i32
    return %arg0, %c0_i32, %c0_i32_0 : i32, i32, i32
  }
}

module attributes {stable_mosaic.version = 11 : i64} {
  func.func @_fc_head_kernel(%arg0: i32, %arg1: memref<8x512xbf16, #tpu.memory_space<vmem>>, %arg2: memref<512x128xbf16, #tpu.memory_space<vmem>>, %arg3: memref<1x128xf32, #tpu.memory_space<vmem>>, %arg4: memref<128x128xbf16, #tpu.memory_space<vmem>>, %arg5: memref<1x128xf32, #tpu.memory_space<vmem>>, %arg6: memref<128x128xbf16, #tpu.memory_space<vmem>>, %arg7: memref<1x128xf32, #tpu.memory_space<vmem>>, %arg8: memref<8x128xf32, #tpu.memory_space<vmem>>) attributes {dimension_semantics = [#tpu.dimension_semantics<parallel>], iteration_bounds = array<i64: 1>, scalar_prefetch = 0 : i64, scratch_operands = 0 : i64, tpu.core_type = #tpu.core_type<tc>, window_params = [{transform_indices = @transform_0, window_bounds = array<i64: 8, 512>}, {pipeline_mode = #tpu.pipeline_mode<synchronous>, transform_indices = @transform_1, window_bounds = array<i64: 512, 128>}, {pipeline_mode = #tpu.pipeline_mode<synchronous>, transform_indices = @transform_2, window_bounds = array<i64: 1, 128>}, {pipeline_mode = #tpu.pipeline_mode<synchronous>, transform_indices = @transform_3, window_bounds = array<i64: 128, 128>}, {pipeline_mode = #tpu.pipeline_mode<synchronous>, transform_indices = @transform_4, window_bounds = array<i64: 1, 128>}, {pipeline_mode = #tpu.pipeline_mode<synchronous>, transform_indices = @transform_5, window_bounds = array<i64: 128, 128>}, {pipeline_mode = #tpu.pipeline_mode<synchronous>, transform_indices = @transform_6, window_bounds = array<i64: 1, 128>}, {transform_indices = @transform_7, window_bounds = array<i64: 8, 128>}]} {
    %c0 = arith.constant 0 : index
    %c0_0 = arith.constant 0 : index
    %0 = vector.load %arg1[%c0, %c0_0] : memref<8x512xbf16, #tpu.memory_space<vmem>>, vector<8x512xbf16>
    %c0_1 = arith.constant 0 : index
    %c0_2 = arith.constant 0 : index
    %1 = vector.load %arg2[%c0_1, %c0_2] : memref<512x128xbf16, #tpu.memory_space<vmem>>, vector<512x128xbf16>
    %cst = arith.constant dense<0.000000e+00> : vector<8x128xf32>
    %2 = tpu.matmul %0, %1, %cst {dimension_numbers = #tpu.dot_dimension_numbers<[1], [0], [0], [1], [0, 0, 1, 1], [], []>} : vector<8x512xbf16>, vector<512x128xbf16>, vector<8x128xf32> -> vector<8x128xf32>
    %c0_3 = arith.constant 0 : index
    %c0_4 = arith.constant 0 : index
    %3 = vector.load %arg3[%c0_3, %c0_4] : memref<1x128xf32, #tpu.memory_space<vmem>>, vector<1x128xf32>
    %4 = vector.broadcast %3 : vector<1x128xf32> to vector<8x128xf32>
    %5 = arith.addf %2, %4 : vector<8x128xf32>
    %cst_5 = arith.constant 0.000000e+00 : f32
    %6 = vector.broadcast %cst_5 : f32 to vector<8x128xf32>
    %7 = arith.maximumf %5, %6 : vector<8x128xf32>
    %8 = arith.truncf %7 : vector<8x128xf32> to vector<8x128xbf16>
    %c0_6 = arith.constant 0 : index
    %c0_7 = arith.constant 0 : index
    %9 = vector.load %arg4[%c0_6, %c0_7] : memref<128x128xbf16, #tpu.memory_space<vmem>>, vector<128x128xbf16>
    %cst_8 = arith.constant dense<0.000000e+00> : vector<8x128xf32>
    %10 = tpu.matmul %8, %9, %cst_8 {dimension_numbers = #tpu.dot_dimension_numbers<[1], [0], [0], [1], [0, 0, 1, 1], [], []>} : vector<8x128xbf16>, vector<128x128xbf16>, vector<8x128xf32> -> vector<8x128xf32>
    %c0_9 = arith.constant 0 : index
    %c0_10 = arith.constant 0 : index
    %11 = vector.load %arg5[%c0_9, %c0_10] : memref<1x128xf32, #tpu.memory_space<vmem>>, vector<1x128xf32>
    %12 = vector.broadcast %11 : vector<1x128xf32> to vector<8x128xf32>
    %13 = arith.addf %10, %12 : vector<8x128xf32>
    %cst_11 = arith.constant 0.000000e+00 : f32
    %14 = vector.broadcast %cst_11 : f32 to vector<8x128xf32>
    %15 = arith.maximumf %13, %14 : vector<8x128xf32>
    %16 = arith.truncf %15 : vector<8x128xf32> to vector<8x128xbf16>
    %c0_12 = arith.constant 0 : index
    %c0_13 = arith.constant 0 : index
    %17 = vector.load %arg6[%c0_12, %c0_13] : memref<128x128xbf16, #tpu.memory_space<vmem>>, vector<128x128xbf16>
    %cst_14 = arith.constant dense<0.000000e+00> : vector<8x128xf32>
    %18 = tpu.matmul %16, %17, %cst_14 {dimension_numbers = #tpu.dot_dimension_numbers<[1], [0], [0], [1], [0, 0, 1, 1], [], []>} : vector<8x128xbf16>, vector<128x128xbf16>, vector<8x128xf32> -> vector<8x128xf32>
    %c0_15 = arith.constant 0 : index
    %c0_16 = arith.constant 0 : index
    %19 = vector.load %arg7[%c0_15, %c0_16] : memref<1x128xf32, #tpu.memory_space<vmem>>, vector<1x128xf32>
    %20 = vector.broadcast %19 : vector<1x128xf32> to vector<8x128xf32>
    %21 = arith.addf %18, %20 : vector<8x128xf32>
    %c0_17 = arith.constant 0 : index
    %c0_18 = arith.constant 0 : index
    %22 = vector.load %arg8[%c0_17, %c0_18] : memref<8x128xf32, #tpu.memory_space<vmem>>, vector<8x128xf32>
    tpu.vector_store %arg8[%c0_17, %c0_18], %21 {strides = array<i32>} : memref<8x128xf32, #tpu.memory_space<vmem>>, vector<8x128xf32>,
    return
  }
  func.func @transform_0(%arg0: i32) -> (i32, i32) {
    %c0_i32 = arith.constant 0 : i32
    %c0_i32_0 = arith.constant 0 : i32
    return %arg0, %c0_i32 : i32, i32
  }
  func.func @transform_1(%arg0: i32) -> (i32, i32) {
    %c0_i32 = arith.constant 0 : i32
    %c0_i32_0 = arith.constant 0 : i32
    %c0_i32_1 = arith.constant 0 : i32
    return %c0_i32, %c0_i32_0 : i32, i32
  }
  func.func @transform_2(%arg0: i32) -> (i32, i32) {
    %c0_i32 = arith.constant 0 : i32
    %c0_i32_0 = arith.constant 0 : i32
    %c0_i32_1 = arith.constant 0 : i32
    return %c0_i32, %c0_i32_0 : i32, i32
  }
  func.func @transform_3(%arg0: i32) -> (i32, i32) {
    %c0_i32 = arith.constant 0 : i32
    %c0_i32_0 = arith.constant 0 : i32
    %c0_i32_1 = arith.constant 0 : i32
    return %c0_i32, %c0_i32_0 : i32, i32
  }
  func.func @transform_4(%arg0: i32) -> (i32, i32) {
    %c0_i32 = arith.constant 0 : i32
    %c0_i32_0 = arith.constant 0 : i32
    %c0_i32_1 = arith.constant 0 : i32
    return %c0_i32, %c0_i32_0 : i32, i32
  }
  func.func @transform_5(%arg0: i32) -> (i32, i32) {
    %c0_i32 = arith.constant 0 : i32
    %c0_i32_0 = arith.constant 0 : i32
    %c0_i32_1 = arith.constant 0 : i32
    return %c0_i32, %c0_i32_0 : i32, i32
  }
  func.func @transform_6(%arg0: i32) -> (i32, i32) {
    %c0_i32 = arith.constant 0 : i32
    %c0_i32_0 = arith.constant 0 : i32
    %c0_i32_1 = arith.constant 0 : i32
    return %c0_i32, %c0_i32_0 : i32, i32
  }
  func.func @transform_7(%arg0: i32) -> (i32, i32) {
    %c0_i32 = arith.constant 0 : i32
    %c0_i32_0 = arith.constant 0 : i32
    return %arg0, %c0_i32 : i32, i32
  }
}

module attributes {stable_mosaic.version = 11 : i64} {
  func.func @_rowconv_kernel(%arg0: i32, %arg1: memref<1x24x384xbf16, #tpu.memory_space<vmem>>, %arg2: memref<5x384x128xbf16, #tpu.memory_space<vmem>>, %arg3: memref<1x128xf32, #tpu.memory_space<vmem>>, %arg4: memref<1x16x128xbf16, #tpu.memory_space<vmem>>) attributes {dimension_semantics = [#tpu.dimension_semantics<parallel>], iteration_bounds = array<i64: 2>, scalar_prefetch = 0 : i64, scratch_operands = 0 : i64, tpu.core_type = #tpu.core_type<tc>, window_params = [{transform_indices = @transform_0, window_bounds = array<i64: 1, 24, 384>}, {pipeline_mode = #tpu.pipeline_mode<synchronous>, transform_indices = @transform_1, window_bounds = array<i64: 5, 384, 128>}, {pipeline_mode = #tpu.pipeline_mode<synchronous>, transform_indices = @transform_2, window_bounds = array<i64: 1, 128>}, {transform_indices = @transform_3, window_bounds = array<i64: 1, 16, 128>}]} {
    %c0 = arith.constant 0 : index
    %c0_0 = arith.constant 0 : index
    %0 = vector.load %arg3[%c0, %c0_0] : memref<1x128xf32, #tpu.memory_space<vmem>>, vector<1x128xf32>
    %cst = arith.constant 0.000000e+00 : f32
    %1 = vector.broadcast %cst : f32 to vector<16x128xf32>
    %c0_1 = arith.constant 0 : index
    %c0_2 = arith.constant 0 : index
    %c0_3 = arith.constant 0 : index
    %2 = vector.load %arg1[%c0_1, %c0_2, %c0_3] : memref<1x24x384xbf16, #tpu.memory_space<vmem>>, vector<1x16x384xbf16>
    %3 = vector.shape_cast %2 : vector<1x16x384xbf16> to vector<16x384xbf16>
    %c0_4 = arith.constant 0 : index
    %c0_5 = arith.constant 0 : index
    %c0_6 = arith.constant 0 : index
    %4 = vector.load %arg2[%c0_4, %c0_5, %c0_6] : memref<5x384x128xbf16, #tpu.memory_space<vmem>>, vector<1x384x128xbf16>
    %5 = vector.shape_cast %4 : vector<1x384x128xbf16> to vector<384x128xbf16>
    %cst_7 = arith.constant dense<0.000000e+00> : vector<16x128xf32>
    %6 = tpu.matmul %3, %5, %cst_7 {dimension_numbers = #tpu.dot_dimension_numbers<[1], [0], [0], [1], [0, 0, 1, 1], [], []>} : vector<16x384xbf16>, vector<384x128xbf16>, vector<16x128xf32> -> vector<16x128xf32>
    %7 = arith.addf %1, %6 : vector<16x128xf32>
    %c0_8 = arith.constant 0 : index
    %c1 = arith.constant 1 : index
    %c0_9 = arith.constant 0 : index
    %8 = vector.load %arg1[%c0_8, %c1, %c0_9] : memref<1x24x384xbf16, #tpu.memory_space<vmem>>, vector<1x16x384xbf16>
    %9 = vector.shape_cast %8 : vector<1x16x384xbf16> to vector<16x384xbf16>
    %c1_10 = arith.constant 1 : index
    %c0_11 = arith.constant 0 : index
    %c0_12 = arith.constant 0 : index
    %10 = vector.load %arg2[%c1_10, %c0_11, %c0_12] : memref<5x384x128xbf16, #tpu.memory_space<vmem>>, vector<1x384x128xbf16>
    %11 = vector.shape_cast %10 : vector<1x384x128xbf16> to vector<384x128xbf16>
    %cst_13 = arith.constant dense<0.000000e+00> : vector<16x128xf32>
    %12 = tpu.matmul %9, %11, %cst_13 {dimension_numbers = #tpu.dot_dimension_numbers<[1], [0], [0], [1], [0, 0, 1, 1], [], []>} : vector<16x384xbf16>, vector<384x128xbf16>, vector<16x128xf32> -> vector<16x128xf32>
    %13 = arith.addf %7, %12 : vector<16x128xf32>
    %c0_14 = arith.constant 0 : index
    %c2 = arith.constant 2 : index
    %c0_15 = arith.constant 0 : index
    %14 = vector.load %arg1[%c0_14, %c2, %c0_15] : memref<1x24x384xbf16, #tpu.memory_space<vmem>>, vector<1x16x384xbf16>
    %15 = vector.shape_cast %14 : vector<1x16x384xbf16> to vector<16x384xbf16>
    %c2_16 = arith.constant 2 : index
    %c0_17 = arith.constant 0 : index
    %c0_18 = arith.constant 0 : index
    %16 = vector.load %arg2[%c2_16, %c0_17, %c0_18] : memref<5x384x128xbf16, #tpu.memory_space<vmem>>, vector<1x384x128xbf16>
    %17 = vector.shape_cast %16 : vector<1x384x128xbf16> to vector<384x128xbf16>
    %cst_19 = arith.constant dense<0.000000e+00> : vector<16x128xf32>
    %18 = tpu.matmul %15, %17, %cst_19 {dimension_numbers = #tpu.dot_dimension_numbers<[1], [0], [0], [1], [0, 0, 1, 1], [], []>} : vector<16x384xbf16>, vector<384x128xbf16>, vector<16x128xf32> -> vector<16x128xf32>
    %19 = arith.addf %13, %18 : vector<16x128xf32>
    %c0_20 = arith.constant 0 : index
    %c3 = arith.constant 3 : index
    %c0_21 = arith.constant 0 : index
    %20 = vector.load %arg1[%c0_20, %c3, %c0_21] : memref<1x24x384xbf16, #tpu.memory_space<vmem>>, vector<1x16x384xbf16>
    %21 = vector.shape_cast %20 : vector<1x16x384xbf16> to vector<16x384xbf16>
    %c3_22 = arith.constant 3 : index
    %c0_23 = arith.constant 0 : index
    %c0_24 = arith.constant 0 : index
    %22 = vector.load %arg2[%c3_22, %c0_23, %c0_24] : memref<5x384x128xbf16, #tpu.memory_space<vmem>>, vector<1x384x128xbf16>
    %23 = vector.shape_cast %22 : vector<1x384x128xbf16> to vector<384x128xbf16>
    %cst_25 = arith.constant dense<0.000000e+00> : vector<16x128xf32>
    %24 = tpu.matmul %21, %23, %cst_25 {dimension_numbers = #tpu.dot_dimension_numbers<[1], [0], [0], [1], [0, 0, 1, 1], [], []>} : vector<16x384xbf16>, vector<384x128xbf16>, vector<16x128xf32> -> vector<16x128xf32>
    %25 = arith.addf %19, %24 : vector<16x128xf32>
    %c0_26 = arith.constant 0 : index
    %c4 = arith.constant 4 : index
    %c0_27 = arith.constant 0 : index
    %26 = vector.load %arg1[%c0_26, %c4, %c0_27] : memref<1x24x384xbf16, #tpu.memory_space<vmem>>, vector<1x16x384xbf16>
    %27 = vector.shape_cast %26 : vector<1x16x384xbf16> to vector<16x384xbf16>
    %c4_28 = arith.constant 4 : index
    %c0_29 = arith.constant 0 : index
    %c0_30 = arith.constant 0 : index
    %28 = vector.load %arg2[%c4_28, %c0_29, %c0_30] : memref<5x384x128xbf16, #tpu.memory_space<vmem>>, vector<1x384x128xbf16>
    %29 = vector.shape_cast %28 : vector<1x384x128xbf16> to vector<384x128xbf16>
    %cst_31 = arith.constant dense<0.000000e+00> : vector<16x128xf32>
    %30 = tpu.matmul %27, %29, %cst_31 {dimension_numbers = #tpu.dot_dimension_numbers<[1], [0], [0], [1], [0, 0, 1, 1], [], []>} : vector<16x384xbf16>, vector<384x128xbf16>, vector<16x128xf32> -> vector<16x128xf32>
    %31 = arith.addf %25, %30 : vector<16x128xf32>
    %32 = vector.broadcast %0 : vector<1x128xf32> to vector<16x128xf32>
    %33 = arith.addf %31, %32 : vector<16x128xf32>
    %cst_32 = arith.constant 0.000000e+00 : f32
    %34 = vector.broadcast %cst_32 : f32 to vector<16x128xf32>
    %35 = arith.maximumf %33, %34 : vector<16x128xf32>
    %36 = arith.truncf %35 : vector<16x128xf32> to vector<16x128xbf16>
    %c0_33 = arith.constant 0 : index
    %c0_34 = arith.constant 0 : index
    %c0_35 = arith.constant 0 : index
    %37 = vector.load %arg4[%c0_33, %c0_34, %c0_35] : memref<1x16x128xbf16, #tpu.memory_space<vmem>>, vector<1x16x128xbf16>
    %38 = vector.shape_cast %37 : vector<1x16x128xbf16> to vector<16x128xbf16>
    %39 = vector.shape_cast %36 : vector<16x128xbf16> to vector<1x16x128xbf16>
    tpu.vector_store %arg4[%c0_33, %c0_34, %c0_35], %39 {strides = array<i32>} : memref<1x16x128xbf16, #tpu.memory_space<vmem>>, vector<1x16x128xbf16>,
    return
  }
  func.func @transform_0(%arg0: i32) -> (i32, i32, i32) {
    %c0_i32 = arith.constant 0 : i32
    %c0_i32_0 = arith.constant 0 : i32
    %c0_i32_1 = arith.constant 0 : i32
    return %arg0, %c0_i32, %c0_i32_0 : i32, i32, i32
  }
  func.func @transform_1(%arg0: i32) -> (i32, i32, i32) {
    %c0_i32 = arith.constant 0 : i32
    %c0_i32_0 = arith.constant 0 : i32
    %c0_i32_1 = arith.constant 0 : i32
    %c0_i32_2 = arith.constant 0 : i32
    return %c0_i32, %c0_i32_0, %c0_i32_1 : i32, i32, i32
  }
  func.func @transform_2(%arg0: i32) -> (i32, i32) {
    %c0_i32 = arith.constant 0 : i32
    %c0_i32_0 = arith.constant 0 : i32
    %c0_i32_1 = arith.constant 0 : i32
    return %c0_i32, %c0_i32_0 : i32, i32
  }
  func.func @transform_3(%arg0: i32) -> (i32, i32, i32) {
    %c0_i32 = arith.constant 0 : i32
    %c0_i32_0 = arith.constant 0 : i32
    %c0_i32_1 = arith.constant 0 : i32
    return %arg0, %c0_i32, %c0_i32_0 : i32, i32, i32
  }
}

module attributes {stable_mosaic.version = 11 : i64} {
  func.func @_rowconv_kernel(%arg0: i32, %arg1: memref<1x40x384xbf16, #tpu.memory_space<vmem>>, %arg2: memref<5x384x128xbf16, #tpu.memory_space<vmem>>, %arg3: memref<1x128xf32, #tpu.memory_space<vmem>>, %arg4: memref<1x32x128xbf16, #tpu.memory_space<vmem>>) attributes {dimension_semantics = [#tpu.dimension_semantics<parallel>], iteration_bounds = array<i64: 2>, scalar_prefetch = 0 : i64, scratch_operands = 0 : i64, tpu.core_type = #tpu.core_type<tc>, window_params = [{transform_indices = @transform_0, window_bounds = array<i64: 1, 40, 384>}, {pipeline_mode = #tpu.pipeline_mode<synchronous>, transform_indices = @transform_1, window_bounds = array<i64: 5, 384, 128>}, {pipeline_mode = #tpu.pipeline_mode<synchronous>, transform_indices = @transform_2, window_bounds = array<i64: 1, 128>}, {transform_indices = @transform_3, window_bounds = array<i64: 1, 32, 128>}]} {
    %c0 = arith.constant 0 : index
    %c0_0 = arith.constant 0 : index
    %0 = vector.load %arg3[%c0, %c0_0] : memref<1x128xf32, #tpu.memory_space<vmem>>, vector<1x128xf32>
    %cst = arith.constant 0.000000e+00 : f32
    %1 = vector.broadcast %cst : f32 to vector<32x128xf32>
    %c0_1 = arith.constant 0 : index
    %c0_2 = arith.constant 0 : index
    %c0_3 = arith.constant 0 : index
    %2 = vector.load %arg1[%c0_1, %c0_2, %c0_3] : memref<1x40x384xbf16, #tpu.memory_space<vmem>>, vector<1x32x384xbf16>
    %3 = vector.shape_cast %2 : vector<1x32x384xbf16> to vector<32x384xbf16>
    %c0_4 = arith.constant 0 : index
    %c0_5 = arith.constant 0 : index
    %c0_6 = arith.constant 0 : index
    %4 = vector.load %arg2[%c0_4, %c0_5, %c0_6] : memref<5x384x128xbf16, #tpu.memory_space<vmem>>, vector<1x384x128xbf16>
    %5 = vector.shape_cast %4 : vector<1x384x128xbf16> to vector<384x128xbf16>
    %cst_7 = arith.constant dense<0.000000e+00> : vector<32x128xf32>
    %6 = tpu.matmul %3, %5, %cst_7 {dimension_numbers = #tpu.dot_dimension_numbers<[1], [0], [0], [1], [0, 0, 1, 1], [], []>} : vector<32x384xbf16>, vector<384x128xbf16>, vector<32x128xf32> -> vector<32x128xf32>
    %7 = arith.addf %1, %6 : vector<32x128xf32>
    %c0_8 = arith.constant 0 : index
    %c1 = arith.constant 1 : index
    %c0_9 = arith.constant 0 : index
    %8 = vector.load %arg1[%c0_8, %c1, %c0_9] : memref<1x40x384xbf16, #tpu.memory_space<vmem>>, vector<1x32x384xbf16>
    %9 = vector.shape_cast %8 : vector<1x32x384xbf16> to vector<32x384xbf16>
    %c1_10 = arith.constant 1 : index
    %c0_11 = arith.constant 0 : index
    %c0_12 = arith.constant 0 : index
    %10 = vector.load %arg2[%c1_10, %c0_11, %c0_12] : memref<5x384x128xbf16, #tpu.memory_space<vmem>>, vector<1x384x128xbf16>
    %11 = vector.shape_cast %10 : vector<1x384x128xbf16> to vector<384x128xbf16>
    %cst_13 = arith.constant dense<0.000000e+00> : vector<32x128xf32>
    %12 = tpu.matmul %9, %11, %cst_13 {dimension_numbers = #tpu.dot_dimension_numbers<[1], [0], [0], [1], [0, 0, 1, 1], [], []>} : vector<32x384xbf16>, vector<384x128xbf16>, vector<32x128xf32> -> vector<32x128xf32>
    %13 = arith.addf %7, %12 : vector<32x128xf32>
    %c0_14 = arith.constant 0 : index
    %c2 = arith.constant 2 : index
    %c0_15 = arith.constant 0 : index
    %14 = vector.load %arg1[%c0_14, %c2, %c0_15] : memref<1x40x384xbf16, #tpu.memory_space<vmem>>, vector<1x32x384xbf16>
    %15 = vector.shape_cast %14 : vector<1x32x384xbf16> to vector<32x384xbf16>
    %c2_16 = arith.constant 2 : index
    %c0_17 = arith.constant 0 : index
    %c0_18 = arith.constant 0 : index
    %16 = vector.load %arg2[%c2_16, %c0_17, %c0_18] : memref<5x384x128xbf16, #tpu.memory_space<vmem>>, vector<1x384x128xbf16>
    %17 = vector.shape_cast %16 : vector<1x384x128xbf16> to vector<384x128xbf16>
    %cst_19 = arith.constant dense<0.000000e+00> : vector<32x128xf32>
    %18 = tpu.matmul %15, %17, %cst_19 {dimension_numbers = #tpu.dot_dimension_numbers<[1], [0], [0], [1], [0, 0, 1, 1], [], []>} : vector<32x384xbf16>, vector<384x128xbf16>, vector<32x128xf32> -> vector<32x128xf32>
    %19 = arith.addf %13, %18 : vector<32x128xf32>
    %c0_20 = arith.constant 0 : index
    %c3 = arith.constant 3 : index
    %c0_21 = arith.constant 0 : index
    %20 = vector.load %arg1[%c0_20, %c3, %c0_21] : memref<1x40x384xbf16, #tpu.memory_space<vmem>>, vector<1x32x384xbf16>
    %21 = vector.shape_cast %20 : vector<1x32x384xbf16> to vector<32x384xbf16>
    %c3_22 = arith.constant 3 : index
    %c0_23 = arith.constant 0 : index
    %c0_24 = arith.constant 0 : index
    %22 = vector.load %arg2[%c3_22, %c0_23, %c0_24] : memref<5x384x128xbf16, #tpu.memory_space<vmem>>, vector<1x384x128xbf16>
    %23 = vector.shape_cast %22 : vector<1x384x128xbf16> to vector<384x128xbf16>
    %cst_25 = arith.constant dense<0.000000e+00> : vector<32x128xf32>
    %24 = tpu.matmul %21, %23, %cst_25 {dimension_numbers = #tpu.dot_dimension_numbers<[1], [0], [0], [1], [0, 0, 1, 1], [], []>} : vector<32x384xbf16>, vector<384x128xbf16>, vector<32x128xf32> -> vector<32x128xf32>
    %25 = arith.addf %19, %24 : vector<32x128xf32>
    %c0_26 = arith.constant 0 : index
    %c4 = arith.constant 4 : index
    %c0_27 = arith.constant 0 : index
    %26 = vector.load %arg1[%c0_26, %c4, %c0_27] : memref<1x40x384xbf16, #tpu.memory_space<vmem>>, vector<1x32x384xbf16>
    %27 = vector.shape_cast %26 : vector<1x32x384xbf16> to vector<32x384xbf16>
    %c4_28 = arith.constant 4 : index
    %c0_29 = arith.constant 0 : index
    %c0_30 = arith.constant 0 : index
    %28 = vector.load %arg2[%c4_28, %c0_29, %c0_30] : memref<5x384x128xbf16, #tpu.memory_space<vmem>>, vector<1x384x128xbf16>
    %29 = vector.shape_cast %28 : vector<1x384x128xbf16> to vector<384x128xbf16>
    %cst_31 = arith.constant dense<0.000000e+00> : vector<32x128xf32>
    %30 = tpu.matmul %27, %29, %cst_31 {dimension_numbers = #tpu.dot_dimension_numbers<[1], [0], [0], [1], [0, 0, 1, 1], [], []>} : vector<32x384xbf16>, vector<384x128xbf16>, vector<32x128xf32> -> vector<32x128xf32>
    %31 = arith.addf %25, %30 : vector<32x128xf32>
    %32 = vector.broadcast %0 : vector<1x128xf32> to vector<32x128xf32>
    %33 = arith.addf %31, %32 : vector<32x128xf32>
    %34 = math.tanh %33 : vector<32x128xf32>
    %35 = arith.truncf %34 : vector<32x128xf32> to vector<32x128xbf16>
    %c0_32 = arith.constant 0 : index
    %c0_33 = arith.constant 0 : index
    %c0_34 = arith.constant 0 : index
    %36 = vector.load %arg4[%c0_32, %c0_33, %c0_34] : memref<1x32x128xbf16, #tpu.memory_space<vmem>>, vector<1x32x128xbf16>
    %37 = vector.shape_cast %36 : vector<1x32x128xbf16> to vector<32x128xbf16>
    %38 = vector.shape_cast %35 : vector<32x128xbf16> to vector<1x32x128xbf16>
    tpu.vector_store %arg4[%c0_32, %c0_33, %c0_34], %38 {strides = array<i32>} : memref<1x32x128xbf16, #tpu.memory_space<vmem>>, vector<1x32x128xbf16>,
    return
  }
  func.func @transform_0(%arg0: i32) -> (i32, i32, i32) {
    %c0_i32 = arith.constant 0 : i32
    %c0_i32_0 = arith.constant 0 : i32
    %c0_i32_1 = arith.constant 0 : i32
    return %arg0, %c0_i32, %c0_i32_0 : i32, i32, i32
  }
  func.func @transform_1(%arg0: i32) -> (i32, i32, i32) {
    %c0_i32 = arith.constant 0 : i32
    %c0_i32_0 = arith.constant 0 : i32
    %c0_i32_1 = arith.constant 0 : i32
    %c0_i32_2 = arith.constant 0 : i32
    return %c0_i32, %c0_i32_0, %c0_i32_1 : i32, i32, i32
  }
  func.func @transform_2(%arg0: i32) -> (i32, i32) {
    %c0_i32 = arith.constant 0 : i32
    %c0_i32_0 = arith.constant 0 : i32
    %c0_i32_1 = arith.constant 0 : i32
    return %c0_i32, %c0_i32_0 : i32, i32
  }
  func.func @transform_3(%arg0: i32) -> (i32, i32, i32) {
    %c0_i32 = arith.constant 0 : i32
    %c0_i32_0 = arith.constant 0 : i32
    %c0_i32_1 = arith.constant 0 : i32
    return %arg0, %c0_i32, %c0_i32_0 : i32, i32, i32
  }
}

</mosaic_0001>

<bundles_post_ra>
// kernel: maya_forward.5
= control target key start
LH: loop header
LB: loop body
LE: loop exit
PB: predicated region body
PF: predicated region fallthrough
CT: control target
= control target key end

     0   :  { %s1610_s12 = smov 0   ;;  %s2199_s0 = inlined_call_operand.vmem [shape: bf16[2,40,128], index: 0, kind: input, shape index: {}]   ;;  %s2200_s1 = inlined_call_operand.vmem [shape: bf16[5,128,256], index: 1, kind: input, shape index: {}]   ;;  %s2201_s2 = inlined_call_operand.vmem [shape: f32[1,256], index: 2, kind: input, shape index: {}]   ;;  %s2202_s3 = inlined_call_operand.vmem [shape: bf16[2,32,256], index: 3, kind: output, shape index: {}]  }
   0x1 LB: > { %s1063_s13 = sadd.s32 4294967295, %s1588_s12   ;;  %p1067_p0 = scmp.ge.s32.totalorder %s1588_s12, 1  ;;  %s1588_s12 = sphi %s1610_s12, %s13_s12  }
   0x2   : > { %p137_p1 = scmp.lt.s32.totalorder %s1588_s12, 3 }
   0x4   : > { %p138_p2 = pnand %p1067_p0, %p137_p1 }
   0x5   : > { %p161_p3 = scmp.lt.s32.totalorder (!%p138_p2), %s1063_s13, 1 }
   0x6   : > { %141 = sbr.rel (%p138_p2) target bundleno = 262 (0x106), region = 32 }
   0xb   : > { %v1149_v0 = vld [vmem:[%s2200_s1 + $0xf0] sm:$0xf]  ;;  %v1504_v1 = vld [vmem:[%s2200_s1 + $0xf4] sm:$0xf0]  ;;  %v1503_v2 = vld [vmem:[%s2200_s1 + $0xf4] sm:$0xf] }
   0xc   : > { %v1150_v3 = vor.u32 %v1504_v1, %v1149_v0  ;;  %v1151_v4 = vld [vmem:[%s2200_s1 + $0xf8] sm:$0xf0]  ;;  %v1221_v5 = vld [vmem:[%s2200_s1 + $0x70] sm:$0xf]  ;;  %v1487_v6 = vld [vmem:[%s2200_s1 + $0x74] sm:$0xf0] }
   0xd   : > { %v1154_v7 = vor.u32 %v1503_v2, %v1151_v4  ;;  %v1222_v8 = vor.u32 %v1487_v6, %v1221_v5  ;;  %v1486_v9 = vld [vmem:[%s2200_s1 + $0x74] sm:$0xf]  ;;  %v1223_v10 = vld [vmem:[%s2200_s1 + $0x78] sm:$0xf0]  ;;  %v1141_v11 = vld [vmem:[%s2200_s1 + $0xe0] sm:$0xf] }
   0xe   : > { %330 = vmatpush.bf16.msra.mxu0 %v1150_v3  ;;  %v1226_v12 = vor.u32 %v1486_v9, %v1223_v10  ;;  %v1502_v13 = vld [vmem:[%s2200_s1 + $0xe4] sm:$0xf0]  ;;  %v1501_v14 = vld [vmem:[%s2200_s1 + $0xe4] sm:$0xf]  ;;  %v1143_v15 = vld [vmem:[%s2200_s1 + $0xe8] sm:$0xf0] }
   0xf   : > { %349 = vmatpush.bf16.msra.mxu1 %v1154_v7  ;;  %460 = vmatpush.bf16.msra.mxu2 %v1222_v8  ;;  %v1142_v16 = vor.u32 %v1502_v13, %v1141_v11  ;;  %v1146_v17 = vor.u32 %v1501_v14, %v1143_v15  ;;  %v1213_v18 = vld [vmem:[%s2200_s1 + $0x60] sm:$0xf]  ;;  %v1485_v19 = vld [vmem:[%s2200_s1 + $0x64] sm:$0xf0]  ;;  %v1484_v20 = vld [vmem:[%s2200_s1 + $0x64] sm:$0xf] }
  0x10   : > { %479 = vmatpush.bf16.msra.mxu3 %v1226_v12  ;;  %v1214_v21 = vor.u32 %v1485_v19, %v1213_v18  ;;  %v1215_v22 = vld [vmem:[%s2200_s1 + $0x68] sm:$0xf0]  ;;  %v1133_v23 = vld [vmem:[%s2200_s1 + $0xd0] sm:$0xf]  ;;  %v1500_v24 = vld [vmem:[%s2200_s1 + $0xd4] sm:$0xf0] }
  0x11   : > { %v1218_v25 = vor.u32 %v1484_v20, %v1215_v22  ;;  %v1499_v26 = vld [vmem:[%s2200_s1 + $0xd4] sm:$0xf]  ;;  %v1135_v27 = vld [vmem:[%s2200_s1 + $0xd8] sm:$0xf0]  ;;  %v1205_v28 = vld [vmem:[%s2200_s1 + $0x50] sm:$0xf]  ;;  %v1134_v29 = vor.u32 %v1500_v24, %v1133_v23 }
  0x12   : > { %331 = vmatpush.bf16.msra.mxu0 %v1142_v16  ;;  %v1483_v30 = vld [vmem:[%s2200_s1 + $0x54] sm:$0xf0]  ;;  %v1482_v31 = vld [vmem:[%s2200_s1 + $0x54] sm:$0xf]  ;;  %v1207_v32 = vld [vmem:[%s2200_s1 + $0x58] sm:$0xf0]  ;;  %v1138_v33 = vor.u32 %v1499_v26, %v1135_v27 }
  0x13   : > { %350 = vmatpush.bf16.msra.mxu1 %v1146_v17  ;;  %461 = vmatpush.bf16.msra.mxu2 %v1214_v21  ;;  %v1206_v34 = vor.u32 %v1483_v30, %v1205_v28  ;;  %v1125_v35 = vld [vmem:[%s2200_s1 + $0xc0] sm:$0xf]  ;;  %v1498_v36 = vld [vmem:[%s2200_s1 + $0xc4] sm:$0xf0]  ;;  %v1497_v37 = vld [vmem:[%s2200_s1 + $0xc4] sm:$0xf]  ;;  %v1210_v38 = vor.u32 %v1482_v31, %v1207_v32 }
  0x14   : > { %480 = vmatpush.bf16.msra.mxu3 %v1218_v25  ;;  %v1127_v39 = vld [vmem:[%s2200_s1 + $0xc8] sm:$0xf0]  ;;  %v1197_v40 = vld [vmem:[%s2200_s1 + $0x40] sm:$0xf]  ;;  %v1481_v41 = vld [vmem:[%s2200_s1 + $0x44] sm:$0xf0]  ;;  %v1126_v44 = vor.u32 %v1498_v36, %v1125_v35 }
  0x15   : > { %v1480_v42 = vld [vmem:[%s2200_s1 + $0x44] sm:$0xf]  ;;  %v1199_v43 = vld [vmem:[%s2200_s1 + $0x48] sm:$0xf0]  ;;  %v1130_v45 = vor.u32 %v1497_v37, %v1127_v39  ;;  %v1198_v46 = vor.u32 %v1481_v41, %v1197_v40  ;;  %v1117_v47 = vld [vmem:[%s2200_s1 + $0xb0] sm:$0xf] }
  0x16   : > { %332 = vmatpush.bf16.msra.mxu0 %v1134_v29  ;;  %v1496_v48 = vld [vmem:[%s2200_s1 + $0xb4] sm:$0xf0]  ;;  %v1495_v49 = vld [vmem:[%s2200_s1 + $0xb4] sm:$0xf]  ;;  %v1202_v50 = vor.u32 %v1480_v42, %v1199_v43  ;;  %v1119_v51 = vld [vmem:[%s2200_s1 + $0xb8] sm:$0xf0] }
  0x17   : > { %351 = vmatpush.bf16.msra.mxu1 %v1138_v33  ;;  %462 = vmatpush.bf16.msra.mxu2 %v1206_v34  ;;  %v1189_v52 = vld [vmem:[%s2200_s1 + $0x30] sm:$0xf]  ;;  %v1479_v53 = vld [vmem:[%s2200_s1 + $0x34] sm:$0xf0]  ;;  %v1478_v54 = vld [vmem:[%s2200_s1 + $0x34] sm:$0xf]  ;;  %v1118_v56 = vor.u32 %v1496_v48, %v1117_v47  ;;  %v1122_v57 = vor.u32 %v1495_v49, %v1119_v51 }
  0x18   : > { %481 = vmatpush.bf16.msra.mxu3 %v1210_v38  ;;  %v1191_v55 = vld [vmem:[%s2200_s1 + $0x38] sm:$0xf0]  ;;  %v1190_v58 = vor.u32 %v1479_v53, %v1189_v52  ;;  %v1109_v59 = vld [vmem:[%s2200_s1 + $0xa0] sm:$0xf]  ;;  %v1494_v60 = vld [vmem:[%s2200_s1 + $0xa4] sm:$0xf0] }
  0x19   : > { %v1493_v61 = vld [vmem:[%s2200_s1 + $0xa4] sm:$0xf]  ;;  %v1194_v62 = vor.u32 %v1478_v54, %v1191_v55  ;;  %v1111_v63 = vld [vmem:[%s2200_s1 + $0xa8] sm:$0xf0]  ;;  %v1181_v0 = vld [vmem:[%s2200_s1 + $0x20] sm:$0xf]  ;;  %v1110_v4 = vor.u32 %v1494_v60, %v1109_v59 }
  0x1a   : > { %333 = vmatpush.bf16.msra.mxu0 %v1126_v44  ;;  %v1477_v1 = vld [vmem:[%s2200_s1 + $0x24] sm:$0xf0]  ;;  %v1476_v2 = vld [vmem:[%s2200_s1 + $0x24] sm:$0xf]  ;;  %v1183_v3 = vld [vmem:[%s2200_s1 + $0x28] sm:$0xf0]  ;;  %v1114_v7 = vor.u32 %v1493_v61, %v1111_v63 }
  0x1b   : > { %352 = vmatpush.bf16.msra.mxu1 %v1130_v45  ;;  %463 = vmatpush.bf16.msra.mxu2 %v1198_v46  ;;  %v1101_v5 = vld [vmem:[%s2200_s1 + $0x90] sm:$0xf]  ;;  %v1492_v6 = vld [vmem:[%s2200_s1 + $0x94] sm:$0xf0]  ;;  %v1182_v8 = vor.u32 %v1477_v1, %v1181_v0  ;;  %v1491_v9 = vld [vmem:[%s2200_s1 + $0x94] sm:$0xf]  ;;  %v1186_v12 = vor.u32 %v1476_v2, %v1183_v3 }
  0x1c   : > { %482 = vmatpush.bf16.msra.mxu3 %v1202_v50  ;;  %v1103_v10 = vld [vmem:[%s2200_s1 + $0x98] sm:$0xf0]  ;;  %v1173_v11 = vld [vmem:[%s2200_s1 + $0x10] sm:$0xf]  ;;  %v1475_v13 = vld [vmem:[%s2200_s1 + $0x14] sm:$0xf0]  ;;  %v1102_v18 = vor.u32 %v1492_v6, %v1101_v5 }
  0x1d   : > { %v1474_v14 = vld [vmem:[%s2200_s1 + $0x14] sm:$0xf]  ;;  %v1175_v15 = vld [vmem:[%s2200_s1 + $0x18] sm:$0xf0]  ;;  %v1093_v16 = vld [vmem:[%s2200_s1 + $0x80] sm:$0xf]  ;;  %v1106_v21 = vor.u32 %v1491_v9, %v1103_v10  ;;  %v1174_v22 = vor.u32 %v1475_v13, %v1173_v11 }
  0x1e   : > { %334 = vmatpush.bf16.msra.mxu0 %v1118_v56  ;;  %v1490_v17 = vld [vmem:[%s2200_s1 + $0x84] sm:$0xf0]  ;;  %v1489_v19 = vld [vmem:[%s2200_s1 + $0x84] sm:$0xf]  ;;  %v1095_v20 = vld [vmem:[%s2200_s1 + $0x88] sm:$0xf0]  ;;  %v1178_v26 = vor.u32 %v1474_v14, %v1175_v15 }
  0x1f   : > { %353 = vmatpush.bf16.msra.mxu1 %v1122_v57  ;;  %464 = vmatpush.bf16.msra.mxu2 %v1190_v58  ;;  %s2204_s13 = smov (!%p161_p3, %s1063_s13), 1  ;;  %v1165_v23 = vld [vmem:[%s2200_s1] sm:$0xf]  ;;  %v1473_v24 = vld [vmem:[%s2200_s1 + $0x4] sm:$0xf0]  ;;  %v1094_v32 = vor.u32 %v1490_v17, %v1093_v16  ;;  %v1098_v36 = vor.u32 %v1489_v19, %v1095_v20  ;;  %vm519_vm1 = vcmask 1046528  }
  0x20   : > { %483 = vmatpush.bf16.msra.mxu3 %v1194_v62  ;;  %v1472_v25 = vld [vmem:[%s2200_s1 + $0x4] sm:$0xf]  ;;  %v1167_v27 = vld [vmem:[%s2200_s1 + $0x8] sm:$0xf0]  ;;  %s1573_s17 = smul.u32 20, %s2204_s13  ;;  %v1166_v37 = vor.u32 %v1473_v24, %v1165_v23  ;;  %vm845_vm3 = vcmask 1045504  }
  0x21   : > { %v1381_v28 = vld [vmem:[%s2200_s1 + $0x1f0] sm:$0xf]  ;;  %v1536_v29 = vld [vmem:[%s2200_s1 + $0x1f4] sm:$0xf0]  ;;  %v1535_v30 = vld [vmem:[%s2200_s1 + $0x1f4] sm:$0xf]  ;;  %v1170_v41 = vor.u32 %v1472_v25, %v1167_v27 }
  0x22   : > { %335 = vmatpush.bf16.msra.mxu0 %v1110_v4  ;;  %v1383_v31 = vld [vmem:[%s2200_s1 + $0x1f8] sm:$0xf0]  ;;  %s1832_s28 = scalar_lea.vmem %s2199_s0, %s1573_s17  ;;  %v1301_v33 = vld [vmem:[%s2200_s1 + $0x170] sm:$0xf]  ;;  %v1520_v34 = vld [vmem:[%s2200_s1 + $0x174] sm:$0xf0]  ;;  %v1382_v44 = vor.u32 %v1536_v29, %v1381_v28 }
  0x23   : > { %354 = vmatpush.bf16.msra.mxu1 %v1114_v7  ;;  %465 = vmatpush.bf16.msra.mxu2 %v1182_v8  ;;  %v1519_v35 = vld [vmem:[%s2200_s1 + $0x174] sm:$0xf]  ;;  %v1844_v38 = vld [vmem:[%s1832_s28] sm:$0xff]   ;;  %v1847_v39 = vld [vmem:[%s1832_s28 + $0x8] sm:$0xff]  ;;  %vm227_vm0 = vsmask.f32 7424  ;;  %v1386_v48 = vor.u32 %v1535_v30, %v1383_v31  ;;  %v1302_v49 = vor.u32 %v1520_v34, %v1301_v33 }
  0x24   : > { %484 = vmatpush.bf16.msra.mxu3 %v1186_v12  ;;  %v1303_v40 = vld [vmem:[%s2200_s1 + $0x178] sm:$0xf0]  ;;  %v229_v42 = vshrl.u32 %v1844_v38, 16  ;;  %v231_v43 = vshll.u32 %v1844_v38, 16  ;;  %v1373_v45 = vld [vmem:[%s2200_s1 + $0x1e0] sm:$0xf] }
  0x25   : > { %v1534_v46 = vld [vmem:[%s2200_s1 + $0x1e4] sm:$0xf0]  ;;  %v236_v47 = vshll.u32 %v1847_v39, 16  ;;  %v1533_v50 = vld [vmem:[%s2200_s1 + $0x1e4] sm:$0xf]  ;;  %v1306_v54 = vor.u32 %v1519_v35, %v1303_v40 }
  0x26   : > { %336 = vmatpush.bf16.msra.mxu0 %v1102_v18  ;;  %v1375_v51 = vld [vmem:[%s2200_s1 + $0x1e8] sm:$0xf0]  ;;  %v233_v52 = vrot.slane %v231_v43, 1  ;;  %v1470_v53 = vld [vmem:[%s1832_s28] sm:$0xff]  ;;  %v1518_v56 = vld [vmem:[%s2200_s1 + $0x164] sm:$0xf0]  ;;  %v1374_v61 = vor.u32 %v1534_v46, %v1373_v45  ;;  %v1556_v46 = vunpack.c.h.b16 %v1844_v38 }
  0x27   : > { %355 = vmatpush.bf16.msra.mxu1 %v1106_v21  ;;  %466 = vmatpush.bf16.msra.mxu2 %v1174_v22  ;;  %v1293_v55 = vld [vmem:[%s2200_s1 + $0x160] sm:$0xf]  ;;  %v1876_v57 = vrot.slane %v236_v47, 1  ;;  %v1517_v58 = vld [vmem:[%s2200_s1 + $0x164] sm:$0xf]  ;;  %v1378_v63 = vor.u32 %v1533_v50, %v1375_v51  ;;  %v1471_v43 = vld [vmem:[%s1832_s28 + $0x8] sm:$0xff] }
  0x28   : > { %485 = vmatpush.bf16.msra.mxu3 %v1178_v26  ;;  %v1295_v59 = vld [vmem:[%s2200_s1 + $0x168] sm:$0xf0]  ;;  %v234_v60 = vor.u32 %v233_v52, %v229_v42  ;;  %v1365_v62 = vld [vmem:[%s2200_s1 + $0x1d0] sm:$0xf]  ;;  %v1294_v0 = vor.u32 %v1518_v56, %v1293_v55  ;;  %v1532_v1 = vld [vmem:[%s2200_s1 + $0x1d4] sm:$0xf0] }
  0x29   : > { %v1531_v2 = vld [vmem:[%s2200_s1 + $0x1d4] sm:$0xf]  ;;  %v1367_v3 = vld [vmem:[%s2200_s1 + $0x1d8] sm:$0xf0]  ;;  %v1298_v5 = vor.u32 %v1517_v58, %v1295_v59  ;;  %v1285_v6 = vld [vmem:[%s2200_s1 + $0x150] sm:$0xf]  ;;  %v1366_v12 = vor.u32 %v1532_v1, %v1365_v62 }
  0x2a   : > { %337 = vmatpush.bf16.msra.mxu0 %v1094_v32  ;;  %v239_v4 = vsel %vm227_vm0, %v234_v60, %v1876_v57  ;;  %v1516_v7 = vld [vmem:[%s2200_s1 + $0x154] sm:$0xf0]  ;;  %v196_v8 = vld [vmem:[%s1832_s28 + $0x10] sm:$0x1]  ;;  %v1515_v9 = vld [vmem:[%s2200_s1 + $0x154] sm:$0xf]  ;;  %v1370_v13 = vor.u32 %v1531_v2, %v1367_v3 }
  0x2b   : > { %356 = vmatpush.bf16.msra.mxu1 %v1098_v36  ;;  %467 = vmatpush.bf16.msra.mxu2 %v1166_v37  ;;  %v1287_v10 = vld [vmem:[%s2200_s1 + $0x158] sm:$0xf0]  ;;  %v223_v11 = vunpack.c.l.b16 %v196_v8  ;;  %v1286_v14 = vor.u32 %v1516_v7, %v1285_v6  ;;  %v1357_v15 = vld [vmem:[%s2200_s1 + $0x1c0] sm:$0xf]  ;;  %v1530_v16 = vld [vmem:[%s2200_s1 + $0x1c4] sm:$0xf0] }
  0x2c   : > { %486 = vmatpush.bf16.msra.mxu3 %v1170_v41  ;;  %v1529_v17 = vld [vmem:[%s2200_s1 + $0x1c4] sm:$0xf]  ;;  %v1290_v19 = vor.u32 %v1515_v9, %v1287_v10  ;;  %v1359_v20 = vld [vmem:[%s2200_s1 + $0x1c8] sm:$0xf0]  ;;  %v1277_v21 = vld [vmem:[%s2200_s1 + $0x140] sm:$0xf]  ;;  %v1358_v25 = vor.u32 %v1530_v16, %v1357_v15 }
  0x2d   : > { %338 = vmatmul.bf16.vlgmr.msra.gmra.mxu0 %v239_v4  ;;  %v1920_v18 = vpack.c.b16 %v223_v11, %v223_v11  ;;  %v1514_v22 = vld [vmem:[%s2200_s1 + $0x144] sm:$0xf0]  ;;  %v1513_v23 = vld [vmem:[%s2200_s1 + $0x144] sm:$0xf]  ;;  %v1279_v24 = vld [vmem:[%s2200_s1 + $0x148] sm:$0xf0]  ;;  %v1362_v28 = vor.u32 %v1529_v17, %v1359_v20 }
  0x2e   : > { %607 = vmatpush.bf16.msrb.mxu0 %v1302_v49  ;;  %468 = vmatmul.bf16.vlgmr.msra.gmra.mxu2 %v1470_v53  ;;  %v240_v26 = vshrl.u32 %v1847_v39, 16  ;;  %v1278_v29 = vor.u32 %v1514_v22, %v1277_v21  ;;  %v1349_v30 = vld [vmem:[%s2200_s1 + $0x1b0] sm:$0xf]  ;;  %v1528_v31 = vld [vmem:[%s2200_s1 + $0x1b4] sm:$0xf0]  ;;  %v1282_v33 = vor.u32 %v1513_v23, %v1279_v24 }
  0x2f   : > { %778 = vmatpush.bf16.msrb.mxu2 %v1382_v44  ;;  %626 = vmatpush.bf16.msrb.mxu1 %v1306_v54  ;;  %v244_v27 = vshll.u32 %v1920_v18, 16  ;;  %v1527_v32 = vld [vmem:[%s2200_s1 + $0x1b4] sm:$0xf]  ;;  %v1351_v34 = vld [vmem:[%s2200_s1 + $0x1b8] sm:$0xf0]  ;;  %v1350_v44 = vor.u32 %v1528_v31, %v1349_v30 }
  0x30   : > { %797 = vmatpush.bf16.msrb.mxu3 %v1386_v48  ;;  %357 = vmatmul.bf16.vlgmr.msra.gmra.mxu1 %v239_v4  ;;  %v1269_v35 = vld [vmem:[%s2200_s1 + $0x130] sm:$0xf]  ;;  %v1512_v36 = vld [vmem:[%s2200_s1 + $0x134] sm:$0xf0]  ;;  %v1511_v37 = vld [vmem:[%s2200_s1 + $0x134] sm:$0xf]  ;;  %v242_v41 = vor.u32 %v240_v26, %v1876_v57  ;;  %v1354_v48 = vor.u32 %v1527_v32, %v1351_v34 }
  0x31   : > { %487 = vmatmul.bf16.vlgmr.msra.gmra.mxu3 %v1470_v53  ;;  %v1271_v40 = vld [vmem:[%s2200_s1 + $0x138] sm:$0xf0]  ;;  %v246_v42 = vrot.slane %v244_v27, 1  ;;  %v1341_v45 = vld [vmem:[%s2200_s1 + $0x1a0] sm:$0xf]  ;;  %v1270_v49 = vor.u32 %v1512_v36, %v1269_v35  ;;  %v684_v27 = vrot.slane %v236_v47, 2 }
  0x32   : > { %608 = vmatpush.bf16.msrb.mxu0 %v1294_v0  ;;  %v1526_v50 = vld [vmem:[%s2200_s1 + $0x1a4] sm:$0xf0]  ;;  %v1525_v51 = vld [vmem:[%s2200_s1 + $0x1a4] sm:$0xf]  ;;  %v1343_v52 = vld [vmem:[%s2200_s1 + $0x1a8] sm:$0xf0]  ;;  %v1274_v53 = vor.u32 %v1511_v37, %v1271_v40 }
  0x33   : > { %779 = vmatpush.bf16.msrb.mxu2 %v1374_v61  ;;  %627 = vmatpush.bf16.msrb.mxu1 %v1298_v5  ;;  %v1261_v54 = vld [vmem:[%s2200_s1 + $0x120] sm:$0xf]  ;;  %v1510_v55 = vld [vmem:[%s2200_s1 + $0x124] sm:$0xf0]  ;;  %v1509_v57 = vld [vmem:[%s2200_s1 + $0x124] sm:$0xf]  ;;  %v247_v60 = vsel %vm227_vm0, %v242_v41, %v246_v42  ;;  %v1342_v61 = vor.u32 %v1526_v50, %v1341_v45  ;;  %v1346_v62 = vor.u32 %v1525_v51, %v1343_v52 }
  0x34   : > { %798 = vmatpush.bf16.msrb.mxu3 %v1378_v63  ;;  %v498_v56 = vld [vmem:[%s1832_s28] sm:$0xe]  ;;  %v1263_v58 = vld [vmem:[%s2200_s1 + $0x128] sm:$0xf0]  ;;  %v1262_v63 = vor.u32 %v1510_v55, %v1261_v54  ;;  %v1333_v0 = vld [vmem:[%s2200_s1 + $0x190] sm:$0xf] }
  0x35   : > { %v517_v59 = vunpack.c.l.b16 %v498_v56  ;;  %v1524_v1 = vld [vmem:[%s2200_s1 + $0x194] sm:$0xf0]  ;;  %v1523_v2 = vld [vmem:[%s2200_s1 + $0x194] sm:$0xf]  ;;  %v1266_v4 = vor.u32 %v1509_v57, %v1263_v58  ;;  %v1335_v5 = vld [vmem:[%s2200_s1 + $0x198] sm:$0xf0] }
  0x36   : > { %609 = vmatpush.bf16.msrb.mxu0 %v1286_v14  ;;  %v1253_v6 = vld [vmem:[%s2200_s1 + $0x110] sm:$0xf]  ;;  %v1508_v7 = vld [vmem:[%s2200_s1 + $0x114] sm:$0xf0]  ;;  %v1507_v8 = vld [vmem:[%s2200_s1 + $0x114] sm:$0xf]  ;;  %v1338_v16 = vor.u32 %v1523_v2, %v1335_v5 }
  0x37   : > { %780 = vmatpush.bf16.msrb.mxu2 %v1366_v12  ;;  %628 = vmatpush.bf16.msrb.mxu1 %v1290_v19  ;;  %v2005_v3 = vpack.c.b16 %v1556_v46, %v517_v59  ;;  %v1255_v9 = vld [vmem:[%s2200_s1 + $0x118] sm:$0xf0]  ;;  %v1334_v12 = vor.u32 %v1524_v1, %v1333_v0  ;;  %v1522_v14 = vld [vmem:[%s2200_s1 + $0x184] sm:$0xf0]  ;;  %v1521_v15 = vld [vmem:[%s2200_s1 + $0x184] sm:$0xf]  ;;  %v1254_v17 = vor.u32 %v1508_v7, %v1253_v6 }
  0x38   : > { %799 = vmatpush.bf16.msrb.mxu3 %v1370_v13  ;;  %v1325_v13 = vld [vmem:[%s2200_s1 + $0x180] sm:$0xf]  ;;  %v1327_v19 = vld [vmem:[%s2200_s1 + $0x188] sm:$0xf0]  ;;  %v1506_v21 = vld [vmem:[%s2200_s1 + $0x104] sm:$0xf0]  ;;  %v1258_v22 = vor.u32 %v1507_v8, %v1255_v9 }
  0x39   : > { %v676_v10 = vshrl.u32 %v2005_v3, 16  ;;  %v679_v11 = vshll.u32 %v2005_v3, 16  ;;  %v1245_v20 = vld [vmem:[%s2200_s1 + $0x100] sm:$0xf]  ;;  %v1505_v23 = vld [vmem:[%s2200_s1 + $0x104] sm:$0xf]  ;;  %v1326_v32 = vor.u32 %v1522_v14, %v1325_v13  ;;  %v1330_v34 = vor.u32 %v1521_v15, %v1327_v19 }
  0x3a   : > { %610 = vmatpush.bf16.msrb.mxu0 %v1278_v29  ;;  %v1247_v24 = vld [vmem:[%s2200_s1 + $0x108] sm:$0xf0]  ;;  %v1461_v30 = vld [vmem:[%s2200_s1 + $0x270] sm:$0xf]  ;;  %v1552_v31 = vld [vmem:[%s2200_s1 + $0x274] sm:$0xf0]  ;;  %v1246_v35 = vor.u32 %v1506_v21, %v1245_v20 }
  0x3b   : > { %781 = vmatpush.bf16.msrb.mxu2 %v1358_v25  ;;  %629 = vmatpush.bf16.msrb.mxu1 %v1282_v33  ;;  %v683_v25 = vrot.slane %v240_v26, 1  ;;  %v681_v29 = vrot.slane %v679_v11, 2  ;;  %v1551_v33 = vld [vmem:[%s2200_s1 + $0x274] sm:$0xf]  ;;  %v1463_v47 = vld [vmem:[%s2200_s1 + $0x278] sm:$0xf0]  ;;  %v1250_v36 = vor.u32 %v1505_v23, %v1247_v24  ;;  %v1462_v37 = vor.u32 %v1552_v31, %v1461_v30 }
  0x3c   : > { %800 = vmatpush.bf16.msrb.mxu3 %v1362_v28  ;;  %v678_v28 = vrot.slane %v676_v10, 1  ;;  %v653_v26 = vld [vmem:[%s1832_s28 + $0x10] sm:$0x3]  ;;  %v1466_v42 = vor.u32 %v1551_v33, %v1463_v47  ;;  %v521_v45 = vrot.slane %v1847_v39, 1  ;;  %vm674_vm2 = vsmask.f32 6400 }
  0x3d   : > { %343 = vmatmul.bf16.gmra.mxu0 %v247_v60  ;;  %v2065_v41 = vor.u32 %v684_v27, %v683_v25  ;;  %v824_v50 = vld [vmem:[%s1832_s28] sm:$0xc]  ;;  %v1549_v51 = vld [vmem:[%s2200_s1 + $0x264] sm:$0xf]  ;;  %v1455_v52 = vld [vmem:[%s2200_s1 + $0x268] sm:$0xf0] }
  0x3e   : > { %611 = vmatpush.bf16.msrb.mxu0 %v1270_v49  ;;  %473 = vmatmul.bf16.gmra.mxu2 %v1471_v43  ;;  %v682_v40 = vor.u32 %v681_v29, %v678_v28  ;;  %v1550_v49 = vld [vmem:[%s2200_s1 + $0x264] sm:$0xf0]  ;;  %v847_v59 = vrot.slane %v1847_v39, 2  ;;  %v1447_v38 = vld [vmem:[%s2200_s1 + $0x258] sm:$0xf0]  ;;  %v523_v19 = vrot.slane %v1920_v18, 1 }
  0x3f   : > { %782 = vmatpush.bf16.msrb.mxu2 %v1350_v44  ;;  %630 = vmatpush.bf16.msrb.mxu1 %v1274_v53  ;;  %v520_v44 = vrot.slane %v2005_v3, 1  ;;  %v843_v53 = vunpack.c.l.b16 %v824_v50  ;;  %v1437_v5 = vld [vmem:[%s2200_s1 + $0x240] sm:$0xf]  ;;  %v1546_v6 = vld [vmem:[%s2200_s1 + $0x244] sm:$0xf0]  ;;  %s1469_s28 = sshll.u32 %s2204_s13, 5 }
  0x40   : > { %801 = vmatpush.bf16.msrb.mxu3 %v1354_v48  ;;  %362 = vmatmul.bf16.gmra.mxu1 %v247_v60  ;;  %v1453_v48 = vld [vmem:[%s2200_s1 + $0x260] sm:$0xf]  ;;  %v686_v54 = vsel %vm674_vm2, %v682_v40, %v2065_v41  ;;  %v1458_v60 = vor.u32 %v1549_v51, %v1455_v52  ;;  %v1545_v7 = vld [vmem:[%s2200_s1 + $0x244] sm:$0xf]  ;;  %v1439_v8 = vld [vmem:[%s2200_s1 + $0x248] sm:$0xf0]  ;;  %v1438_v11 = vor.u32 %v1546_v6, %v1437_v5  ;;  %s2190_s22 = scalar_lea.vmem %s2202_s3, %s1469_s28 }
  0x41   : > { %492 = vmatmul.bf16.gmra.mxu3 %v1471_v43  ;;  %v672_v43 = vunpack.c.l.b16 %v653_v26  ;;  %v522_v56 = vsel %vm519_vm1, %v520_v44, %v521_v45  ;;  %v1454_v57 = vor.u32 %v1550_v49, %v1453_v48  ;;  %v844_v58 = vpack.c.b16 %v1556_v46, %v843_v53  ;;  %v1429_v13 = vld [vmem:[%s2200_s1 + $0x230] sm:$0xf]  ;;  %v1544_v14 = vld [vmem:[%s2200_s1 + $0x234] sm:$0xf0]  ;;  %v1543_v15 = vld [vmem:[%s2200_s1 + $0x234] sm:$0xf] }
  0x42   : > { %612 = vmatpush.bf16.msrb.mxu0 %v1262_v63  ;;  %v1547_v63 = vld [vmem:[%s2200_s1 + $0x254] sm:$0xf]  ;;  %v1430_v20 = vor.u32 %v1544_v14, %v1429_v13  ;;  %v1542_v23 = vld [vmem:[%s2200_s1 + $0x224] sm:$0xf0]  ;;  %v1541_v24 = vld [vmem:[%s2200_s1 + $0x224] sm:$0xf]  ;;  %v524_v27 = vsel %vm519_vm1, %v521_v45, %v523_v19 }
  0x43   : > { %783 = vmatpush.bf16.msrb.mxu2 %v1342_v61  ;;  %631 = vmatpush.bf16.msrb.mxu1 %v1266_v4  ;;  %v2084_v55 = vpack.c.b16 %v672_v43, %v672_v43  ;;  %v1445_v61 = vld [vmem:[%s2200_s1 + $0x250] sm:$0xf]  ;;  %v846_v46 = vrot.slane %v844_v58, 2  ;;  %v1450_v4 = vor.u32 %v1547_v63, %v1447_v38  ;;  %v1423_v18 = vld [vmem:[%s2200_s1 + $0x228] sm:$0xf0] }
  0x44   : > { %802 = vmatpush.bf16.msrb.mxu3 %v1346_v62  ;;  %v1548_v62 = vld [vmem:[%s2200_s1 + $0x254] sm:$0xf0]  ;;  %v1426_v29 = vor.u32 %v1541_v24, %v1423_v18  ;;  %v1413_v30 = vld [vmem:[%s2200_s1 + $0x210] sm:$0xf]  ;;  %v1415_v33 = vld [vmem:[%s2200_s1 + $0x218] sm:$0xf0] }
  0x45   : > { %v688_v0 = vshrl.u32 %v2084_v55, 16  ;;  %v691_v1 = vshll.u32 %v2084_v55, 16  ;;  %v1446_v2 = vor.u32 %v1548_v62, %v1445_v61  ;;  %v2109_v3 = vsel %vm845_vm3, %v846_v46, %v847_v59  ;;  %v1540_v31 = vld [vmem:[%s2200_s1 + $0x214] sm:$0xf0] }
  0x46   : > { %613 = vmatpush.bf16.msrb.mxu0 %v1254_v17  ;;  %v1414_v47 = vor.u32 %v1540_v31, %v1413_v30 }
  0x47   : > { %784 = vmatpush.bf16.msrb.mxu2 %v1334_v12  ;;  %632 = vmatpush.bf16.msrb.mxu1 %v1258_v22  ;;  %v690_v9 = vrot.slane %v688_v0, 1  ;;  %v693_v10 = vrot.slane %v691_v1, 2  ;;  %v1442_v12 = vor.u32 %v1545_v7, %v1439_v8  ;;  %v1421_v22 = vld [vmem:[%s2200_s1 + $0x220] sm:$0xf] }
  0x48   : > { %803 = vmatpush.bf16.msrb.mxu3 %v1338_v16  ;;  %v1431_v16 = vld [vmem:[%s2200_s1 + $0x238] sm:$0xf0]  ;;  %v1422_v28 = vor.u32 %v1542_v23, %v1421_v22 }
  0x49   : > { %v694_v17 = vor.u32 %v693_v10, %v690_v9  ;;  %v1434_v21 = vor.u32 %v1543_v15, %v1431_v16 }
  0x4a   : > { %614 = vmatpush.bf16.msrb.mxu0 %v1246_v35  ;;  %v1538_v35 = vld [vmem:[%s2200_s1 + $0x204] sm:$0xf0] }
  0x4b   : > { %785 = vmatpush.bf16.msrb.mxu2 %v1326_v32  ;;  %633 = vmatpush.bf16.msrb.mxu1 %v1250_v36  ;;  %v695_v25 = vsel %vm674_vm2, %v2065_v41, %v694_v17  ;;  %v1539_v32 = vld [vmem:[%s2200_s1 + $0x214] sm:$0xf]  ;;  %v1537_v36 = vld [vmem:[%s2200_s1 + $0x204] sm:$0xf] }
  0x4c   : > { %804 = vmatpush.bf16.msrb.mxu3 %v1330_v34  ;;  %v1418_v26 = vor.u32 %v1539_v32, %v1415_v33  ;;  %v1405_v34 = vld [vmem:[%s2200_s1 + $0x200] sm:$0xf] }
  0x4d   : > { %615 = vmatmul.bf16.vlgmr.msrb.gmra.mxu0 %v522_v56  ;;  %v1406_v40 = vor.u32 %v1538_v35, %v1405_v34 }
  0x4e   : > { %933 = vmatpush.bf16.msra.mxu0 %v1462_v37  ;;  %786 = vmatmul.bf16.vlgmr.msrb.gmra.mxu2 %v686_v54 }
  0x4f   : > { %1557 = vmatpush.bf16.msra.mxu2 %v1462_v37  ;;  %952 = vmatpush.bf16.msra.mxu1 %v1466_v42  ;;  %v1407_v37 = vld [vmem:[%s2200_s1 + $0x208] sm:$0xf0] }
  0x50   : > { %1565 = vmatpush.bf16.msra.mxu3 %v1466_v42  ;;  %634 = vmatmul.bf16.vlgmr.msrb.gmra.mxu1 %v522_v56  ;;  %v1410_v41 = vor.u32 %v1537_v36, %v1407_v37  ;;  %v849_v42 = vrot.slane %v2084_v55, 2 }
  0x51   : > { %805 = vmatmul.bf16.vlgmr.msrb.gmra.mxu3 %v686_v54 }
  0x52   : > { %934 = vmatpush.bf16.msra.mxu0 %v1454_v57  ;;  %v850_v43 = vsel %vm845_vm3, %v847_v59, %v849_v42 }
  0x53   : > { %1558 = vmatpush.bf16.msra.mxu2 %v1454_v57  ;;  %953 = vmatpush.bf16.msra.mxu1 %v1458_v60 }
  0x54   : > { %1566 = vmatpush.bf16.msra.mxu3 %v1458_v60 }
  0x56   : > { %935 = vmatpush.bf16.msra.mxu0 %v1446_v2 }
  0x57   : > { %1559 = vmatpush.bf16.msra.mxu2 %v1446_v2  ;;  %954 = vmatpush.bf16.msra.mxu1 %v1450_v4 }
  0x58   : > { %1567 = vmatpush.bf16.msra.mxu3 %v1450_v4 }
  0x5a   : > { %936 = vmatpush.bf16.msra.mxu0 %v1438_v11 }
  0x5b   : > { %1560 = vmatpush.bf16.msra.mxu2 %v1438_v11  ;;  %955 = vmatpush.bf16.msra.mxu1 %v1442_v12  ;;  %v171_v11 = vld [vmem:[%s2201_s2] sm:$0x3] }
  0x5c   : > { %1568 = vmatpush.bf16.msra.mxu3 %v1442_v12  ;;  %v980_v19 = vperm.slane %v171_v11, 0 }
  0x5d   : > { %620 = vmatmul.bf16.gmra.mxu0 %v524_v27 }
  0x5e   : > { %937 = vmatpush.bf16.msra.mxu0 %v1430_v20  ;;  %791 = vmatmul.bf16.gmra.mxu2 %v695_v25 }
  0x5f   : > { %1561 = vmatpush.bf16.msra.mxu2 %v1430_v20  ;;  %956 = vmatpush.bf16.msra.mxu1 %v1434_v21  ;;  %v981_v20 = vperm.slane %v171_v11, 1 }
  0x60   : > { %1569 = vmatpush.bf16.msra.mxu3 %v1434_v21  ;;  %639 = vmatmul.bf16.gmra.mxu1 %v524_v27 }
  0x61   : > { %810 = vmatmul.bf16.gmra.mxu3 %v695_v25 }
  0x62   : > { %938 = vmatpush.bf16.msra.mxu0 %v1422_v28 }
  0x63   : > { %1562 = vmatpush.bf16.msra.mxu2 %v1422_v28  ;;  %957 = vmatpush.bf16.msra.mxu1 %v1426_v29 }
  0x64   : > { %1570 = vmatpush.bf16.msra.mxu3 %v1426_v29 }
  0x66   : > { %939 = vmatpush.bf16.msra.mxu0 %v1414_v47 }
  0x67   : > { %1563 = vmatpush.bf16.msra.mxu2 %v1414_v47  ;;  %958 = vmatpush.bf16.msra.mxu1 %v1418_v26 }
  0x68   : > { %1571 = vmatpush.bf16.msra.mxu3 %v1418_v26 }
  0x6a   : > { %940 = vmatpush.bf16.msra.mxu0 %v1406_v40 }
  0x6b   : > { %1564 = vmatpush.bf16.msra.mxu2 %v1406_v40  ;;  %959 = vmatpush.bf16.msra.mxu1 %v1410_v41 }
  0x6c   : > { %1572 = vmatpush.bf16.msra.mxu3 %v1410_v41 }
  0x6d   : > { %941 = vmatmul.bf16.vlgmr.msra.gmra.mxu0 %v2109_v3 }
  0x6e   : > { %946 = vmatmul.bf16.vlgmr.msra.gmra.mxu2 %v850_v43 }
  0x70   : > { %960 = vmatmul.bf16.vlgmr.msra.gmra.mxu1 %v2109_v3 }
  0x71   : > { %965 = vmatmul.bf16.vlgmr.msra.gmra.mxu3 %v850_v43 }
  0xaa   : > { %v339_v44 = vpop.f32.mrf.mxu0 }
  0xad   : > { %v358_v45 = vpop.f32.mrf.mxu1 }
  0xb1   : > { %v469_v48 = vpop.f32.mrf.mxu2 }
  0xb2   : > { %v341_v50 = vpop.f32.mrf.mxu0  ;;  %v470_v9 = vadd.f32 %v469_v48, %v339_v44 }
  0xb4   : > { %v488_v49 = vpop.f32.mrf.mxu3 }
  0xb5   : > { %v360_v51 = vpop.f32.mrf.mxu1  ;;  %v489_v10 = vadd.f32 %v488_v49, %v358_v45 }
  0xb9   : > { %v471_v52 = vpop.f32.mrf.mxu2 }
  0xba   : > { %v344_v54 = vpop.f32.mrf.mxu0  ;;  %v472_v28 = vadd.f32 %v471_v52, %v341_v50 }
  0xbc   : > { %v490_v53 = vpop.f32.mrf.mxu3 }
  0xbd   : > { %v363_v55 = vpop.f32.mrf.mxu1  ;;  %v491_v29 = vadd.f32 %v490_v53, %v360_v51 }
  0xc1   : > { %v474_v56 = vpop.f32.mrf.mxu2 }
  0xc2   : > { %v346_v57 = vpop.f32.mrf.mxu0  ;;  %v475_v21 = vadd.f32 %v474_v56, %v344_v54 }
  0xc4   : > { %v493_v39 = vpop.f32.mrf.mxu3 }
  0xc5   : > { %v365_v58 = vpop.f32.mrf.mxu1  ;;  %v494_v25 = vadd.f32 %v493_v39, %v363_v55 }
  0xc9   : > { %v476_v59 = vpop.f32.mrf.mxu2 }
  0xca   : > { %v616_v61 = vpop.f32.mrf.mxu0  ;;  %v477_v45 = vadd.f32 %v476_v59, %v346_v57 }
  0xcb   : > { %v645_v12 = vadd.f32 %v616_v61, %v470_v9 }
  0xcc   : > { %v495_v60 = vpop.f32.mrf.mxu3 }
  0xcd   : > { %v635_v62 = vpop.f32.mrf.mxu1  ;;  %v496_v54 = vadd.f32 %v495_v60, %v365_v58 }
  0xce   : > { %v646_v13 = vadd.f32 %v635_v62, %v489_v10 }
  0xd1   : > { %v787_v63 = vpop.f32.mrf.mxu2 }
  0xd2   : > { %v618_v46 = vpop.f32.mrf.mxu0  ;;  %v816_v15 = vadd.f32 %v787_v63, %v645_v12 }
  0xd3   : > { %v647_v47 = vadd.f32 %v618_v46, %v472_v28 }
  0xd4   : > { %v806_v38 = vpop.f32.mrf.mxu3 }
  0xd5   : > { %v637_v0 = vpop.f32.mrf.mxu1  ;;  %v817_v16 = vadd.f32 %v806_v38, %v646_v13 }
  0xd6   : > { %v648_v26 = vadd.f32 %v637_v0, %v491_v29 }
  0xd9   : > { %v789_v1 = vpop.f32.mrf.mxu2 }
  0xda   : > { %v621_v3 = vpop.f32.mrf.mxu0  ;;  %v818_v41 = vadd.f32 %v789_v1, %v647_v47 }
  0xdb   : > { %v649_v27 = vadd.f32 %v621_v3, %v475_v21 }
  0xdc   : > { %v808_v2 = vpop.f32.mrf.mxu3 }
  0xdd   : > { %v640_v4 = vpop.f32.mrf.mxu1  ;;  %v819_v42 = vadd.f32 %v808_v2, %v648_v26 }
  0xde   : > { %v650_v32 = vadd.f32 %v640_v4, %v494_v25 }
  0xe1   : > { %v792_v5 = vpop.f32.mrf.mxu2 }
  0xe2   : > { %v623_v7 = vpop.f32.mrf.mxu0  ;;  %v820_v33 = vadd.f32 %v792_v5, %v649_v27 }
  0xe3   : > { %v651_v55 = vadd.f32 %v623_v7, %v477_v45 }
  0xe4   : > { %v811_v6 = vpop.f32.mrf.mxu3 }
  0xe5   : > { %v642_v8 = vpop.f32.mrf.mxu1  ;;  %v821_v37 = vadd.f32 %v811_v6, %v650_v32 }
  0xe6   : > { %v652_v63 = vadd.f32 %v642_v8, %v496_v54 }
  0xe9   : > { %v794_v14 = vpop.f32.mrf.mxu2 }
  0xea   : > { %v942_v22 = vpop.f32.mrf.mxu0  ;;  %v822_v38 = vadd.f32 %v794_v14, %v651_v55 }
  0xeb   : > { %v971_v24 = vadd.f32 %v942_v22, %v816_v15 }
  0xec   : > { %v813_v17 = vpop.f32.mrf.mxu3 }
  0xed   : > { %v961_v23 = vpop.f32.mrf.mxu1  ;;  %v984_v30 = vadd.f32 %v980_v19, %v971_v24  ;;  %v823_v1 = vadd.f32 %v813_v17, %v652_v63 }
  0xee   : > { %v972_v18 = vadd.f32 %v961_v23, %v817_v16 }
  0xef   : > { %v992_v34 = vmax.f32 %v984_v30, 0.0 }
  0xf0   : > { %v985_v31 = vadd.f32 %v981_v20, %v972_v18 }
  0xf1   : > { %v947_v36 = vpop.f32.mrf.mxu2 }
  0xf2   : > { %v993_v35 = vmax.f32 %v985_v31, 0.0  ;;  %v975_v40 = vadd.f32 %v947_v36, %v820_v33  ;;  %v944_v50 = vpop.f32.mrf.mxu0 }
  0xf3   : > { %v973_v52 = vadd.f32 %v944_v50, %v818_v41 }
  0xf4   : > { %v1000_v43 = vpack.c.bf16 %v993_v35, %v992_v34  ;;  %v966_v44 = vpop.f32.mrf.mxu3  ;;  %v988_v48 = vadd.f32 %v980_v19, %v975_v40 }
  0xf5   : > { %v976_v49 = vadd.f32 %v966_v44, %v821_v37  ;;  %v963_v51 = vpop.f32.mrf.mxu1  ;;  %v986_v61 = vadd.f32 %v980_v19, %v973_v52 }
  0xf6   : > { %1004 = vst [vmem:[%s2190_s22] sm:$0xff] %v1000_v43  ;;  %v974_v53 = vadd.f32 %v963_v51, %v819_v42  ;;  %v996_v56 = vmax.f32 %v988_v48, 0.0 }
  0xf7   : > { %v989_v39 = vadd.f32 %v981_v20, %v976_v49  ;;  %v994_v0 = vmax.f32 %v986_v61, 0.0 }
  0xf8   : > { %v987_v62 = vadd.f32 %v981_v20, %v974_v53 }
  0xf9   : > { %v997_v46 = vmax.f32 %v989_v39, 0.0  ;;  %v949_v59 = vpop.f32.mrf.mxu2 }
  0xfa   : > { %v995_v57 = vmax.f32 %v987_v62, 0.0  ;;  %v977_v3 = vadd.f32 %v949_v59, %v822_v38 }
  0xfb   : > { %v1002_v2 = vpack.c.bf16 %v997_v46, %v996_v56 }
  0xfc   : > { %v1001_v4 = vpack.c.bf16 %v995_v57, %v994_v0  ;;  %v968_v5 = vpop.f32.mrf.mxu3  ;;  %v990_v58 = vadd.f32 %v980_v19, %v977_v3 }
  0xfd   : > { %1006 = vst [vmem:[%s2190_s22 + $0x10] sm:$0xff] %v1002_v2  ;;  %v978_v60 = vadd.f32 %v968_v5, %v823_v1 }
  0xfe   : > { %1005 = vst [vmem:[%s2190_s22 + $0x8] sm:$0xff] %v1001_v4  ;;  %v998_v6 = vmax.f32 %v990_v58, 0.0 }
  0xff   : > { %v991_v7 = vadd.f32 %v981_v20, %v978_v60 }
 0x101   : > { %v999_v9 = vmax.f32 %v991_v7, 0.0 }
 0x103   : > { %v1003_v10 = vpack.c.bf16 %v999_v9, %v998_v6 }
 0x105   : > { %1007 = vst [vmem:[%s2190_s22 + $0x18] sm:$0xff] %v1003_v10 }
 0x106 PF: > { %s13_s12 = sadd.s32 1, %s1588_s12  }
 0x107   : > { %p10_p4 = scmp.ge.s32.totalorder %s13_s12, 4  }
 0x109   :  { %12 = sbr.rel (!%p10_p4) target bundleno = 1 (0x1), region = 66 }

// kernel: maya_forward.6
= control target key start
LH: loop header
LB: loop body
LE: loop exit
PB: predicated region body
PF: predicated region fallthrough
CT: control target
= control target key end

     0   :  { %s1475_s12 = smov 0   ;;  %s2010_s0 = inlined_call_operand.vmem [shape: bf16[2,24,128], index: 0, kind: input, shape index: {}]   ;;  %s2011_s1 = inlined_call_operand.vmem [shape: bf16[5,128,256], index: 1, kind: input, shape index: {}]   ;;  %s2012_s2 = inlined_call_operand.vmem [shape: f32[1,256], index: 2, kind: input, shape index: {}]   ;;  %s2013_s3 = inlined_call_operand.vmem [shape: bf16[2,16,256], index: 3, kind: output, shape index: {}]  }
   0x1 LB: > { %s954_s13 = sadd.s32 4294967295, %s1453_s12   ;;  %p958_p0 = scmp.ge.s32.totalorder %s1453_s12, 1  ;;  %s1453_s12 = sphi %s1475_s12, %s13_s12  }
   0x2   : > { %p137_p1 = scmp.lt.s32.totalorder %s1453_s12, 3 }
   0x4   : > { %p138_p2 = pnand %p958_p0, %p137_p1 }
   0x5   : > { %p161_p3 = scmp.lt.s32.totalorder (!%p138_p2), %s954_s13, 1 }
   0x6   : > { %141 = sbr.rel (%p138_p2) target bundleno = 253 (0xfd), region = 32 }
   0xb   : > { %v1036_v0 = vld [vmem:[%s2011_s1 + $0xf0] sm:$0xf]  ;;  %v1385_v1 = vld [vmem:[%s2011_s1 + $0xf4] sm:$0xf0]  ;;  %v1384_v2 = vld [vmem:[%s2011_s1 + $0xf4] sm:$0xf] }
   0xc   : > { %v1037_v3 = vor.u32 %v1385_v1, %v1036_v0  ;;  %v1038_v4 = vld [vmem:[%s2011_s1 + $0xf8] sm:$0xf0]  ;;  %v1104_v5 = vld [vmem:[%s2011_s1 + $0x70] sm:$0xf]  ;;  %v1369_v6 = vld [vmem:[%s2011_s1 + $0x74] sm:$0xf0] }
   0xd   : > { %v1041_v7 = vor.u32 %v1384_v2, %v1038_v4  ;;  %v1105_v8 = vor.u32 %v1369_v6, %v1104_v5  ;;  %v1368_v9 = vld [vmem:[%s2011_s1 + $0x74] sm:$0xf]  ;;  %v1106_v10 = vld [vmem:[%s2011_s1 + $0x78] sm:$0xf0]  ;;  %v1028_v11 = vld [vmem:[%s2011_s1 + $0xe0] sm:$0xf] }
   0xe   : > { %312 = vmatpush.bf16.msra.mxu0 %v1037_v3  ;;  %v1109_v12 = vor.u32 %v1368_v9, %v1106_v10  ;;  %v1383_v13 = vld [vmem:[%s2011_s1 + $0xe4] sm:$0xf0]  ;;  %v1382_v14 = vld [vmem:[%s2011_s1 + $0xe4] sm:$0xf]  ;;  %v1030_v15 = vld [vmem:[%s2011_s1 + $0xe8] sm:$0xf0] }
   0xf   : > { %326 = vmatpush.bf16.msra.mxu1 %v1041_v7  ;;  %426 = vmatpush.bf16.msra.mxu2 %v1105_v8  ;;  %v1029_v16 = vor.u32 %v1383_v13, %v1028_v11  ;;  %v1033_v17 = vor.u32 %v1382_v14, %v1030_v15  ;;  %v1096_v18 = vld [vmem:[%s2011_s1 + $0x60] sm:$0xf]  ;;  %v1367_v19 = vld [vmem:[%s2011_s1 + $0x64] sm:$0xf0]  ;;  %v1366_v20 = vld [vmem:[%s2011_s1 + $0x64] sm:$0xf] }
  0x10   : > { %440 = vmatpush.bf16.msra.mxu3 %v1109_v12  ;;  %v1097_v21 = vor.u32 %v1367_v19, %v1096_v18  ;;  %v1098_v22 = vld [vmem:[%s2011_s1 + $0x68] sm:$0xf0]  ;;  %v1020_v23 = vld [vmem:[%s2011_s1 + $0xd0] sm:$0xf]  ;;  %v1381_v24 = vld [vmem:[%s2011_s1 + $0xd4] sm:$0xf0] }
  0x11   : > { %v1101_v25 = vor.u32 %v1366_v20, %v1098_v22  ;;  %v1380_v26 = vld [vmem:[%s2011_s1 + $0xd4] sm:$0xf]  ;;  %v1022_v27 = vld [vmem:[%s2011_s1 + $0xd8] sm:$0xf0]  ;;  %v1088_v28 = vld [vmem:[%s2011_s1 + $0x50] sm:$0xf]  ;;  %v1021_v29 = vor.u32 %v1381_v24, %v1020_v23 }
  0x12   : > { %313 = vmatpush.bf16.msra.mxu0 %v1029_v16  ;;  %v1365_v30 = vld [vmem:[%s2011_s1 + $0x54] sm:$0xf0]  ;;  %v1364_v31 = vld [vmem:[%s2011_s1 + $0x54] sm:$0xf]  ;;  %v1090_v32 = vld [vmem:[%s2011_s1 + $0x58] sm:$0xf0]  ;;  %v1025_v33 = vor.u32 %v1380_v26, %v1022_v27 }
  0x13   : > { %327 = vmatpush.bf16.msra.mxu1 %v1033_v17  ;;  %427 = vmatpush.bf16.msra.mxu2 %v1097_v21  ;;  %v1089_v34 = vor.u32 %v1365_v30, %v1088_v28  ;;  %v1012_v35 = vld [vmem:[%s2011_s1 + $0xc0] sm:$0xf]  ;;  %v1379_v36 = vld [vmem:[%s2011_s1 + $0xc4] sm:$0xf0]  ;;  %v1378_v37 = vld [vmem:[%s2011_s1 + $0xc4] sm:$0xf]  ;;  %v1093_v38 = vor.u32 %v1364_v31, %v1090_v32 }
  0x14   : > { %441 = vmatpush.bf16.msra.mxu3 %v1101_v25  ;;  %v1014_v39 = vld [vmem:[%s2011_s1 + $0xc8] sm:$0xf0]  ;;  %v1080_v40 = vld [vmem:[%s2011_s1 + $0x40] sm:$0xf]  ;;  %v1363_v41 = vld [vmem:[%s2011_s1 + $0x44] sm:$0xf0]  ;;  %v1013_v44 = vor.u32 %v1379_v36, %v1012_v35 }
  0x15   : > { %v1362_v42 = vld [vmem:[%s2011_s1 + $0x44] sm:$0xf]  ;;  %v1082_v43 = vld [vmem:[%s2011_s1 + $0x48] sm:$0xf0]  ;;  %v1017_v45 = vor.u32 %v1378_v37, %v1014_v39  ;;  %v1081_v46 = vor.u32 %v1363_v41, %v1080_v40  ;;  %v1004_v47 = vld [vmem:[%s2011_s1 + $0xb0] sm:$0xf] }
  0x16   : > { %314 = vmatpush.bf16.msra.mxu0 %v1021_v29  ;;  %v1377_v48 = vld [vmem:[%s2011_s1 + $0xb4] sm:$0xf0]  ;;  %v1376_v49 = vld [vmem:[%s2011_s1 + $0xb4] sm:$0xf]  ;;  %v1085_v50 = vor.u32 %v1362_v42, %v1082_v43  ;;  %v1006_v51 = vld [vmem:[%s2011_s1 + $0xb8] sm:$0xf0] }
  0x17   : > { %328 = vmatpush.bf16.msra.mxu1 %v1025_v33  ;;  %428 = vmatpush.bf16.msra.mxu2 %v1089_v34  ;;  %v1072_v52 = vld [vmem:[%s2011_s1 + $0x30] sm:$0xf]  ;;  %v1361_v53 = vld [vmem:[%s2011_s1 + $0x34] sm:$0xf0]  ;;  %v1360_v54 = vld [vmem:[%s2011_s1 + $0x34] sm:$0xf]  ;;  %v1005_v56 = vor.u32 %v1377_v48, %v1004_v47  ;;  %v1009_v57 = vor.u32 %v1376_v49, %v1006_v51 }
  0x18   : > { %442 = vmatpush.bf16.msra.mxu3 %v1093_v38  ;;  %v1074_v55 = vld [vmem:[%s2011_s1 + $0x38] sm:$0xf0]  ;;  %v1073_v58 = vor.u32 %v1361_v53, %v1072_v52  ;;  %v996_v59 = vld [vmem:[%s2011_s1 + $0xa0] sm:$0xf]  ;;  %v1375_v60 = vld [vmem:[%s2011_s1 + $0xa4] sm:$0xf0] }
  0x19   : > { %v1374_v61 = vld [vmem:[%s2011_s1 + $0xa4] sm:$0xf]  ;;  %v1077_v62 = vor.u32 %v1360_v54, %v1074_v55  ;;  %v998_v63 = vld [vmem:[%s2011_s1 + $0xa8] sm:$0xf0]  ;;  %v1064_v0 = vld [vmem:[%s2011_s1 + $0x20] sm:$0xf]  ;;  %v997_v4 = vor.u32 %v1375_v60, %v996_v59 }
  0x1a   : > { %315 = vmatpush.bf16.msra.mxu0 %v1013_v44  ;;  %v1359_v1 = vld [vmem:[%s2011_s1 + $0x24] sm:$0xf0]  ;;  %v1358_v2 = vld [vmem:[%s2011_s1 + $0x24] sm:$0xf]  ;;  %v1066_v3 = vld [vmem:[%s2011_s1 + $0x28] sm:$0xf0]  ;;  %v1001_v5 = vor.u32 %v1374_v61, %v998_v63 }
  0x1b   : > { %329 = vmatpush.bf16.msra.mxu1 %v1017_v45  ;;  %429 = vmatpush.bf16.msra.mxu2 %v1081_v46  ;;  %v1065_v6 = vor.u32 %v1359_v1, %v1064_v0  ;;  %v988_v7 = vld [vmem:[%s2011_s1 + $0x90] sm:$0xf]  ;;  %v1373_v8 = vld [vmem:[%s2011_s1 + $0x94] sm:$0xf0]  ;;  %v1372_v9 = vld [vmem:[%s2011_s1 + $0x94] sm:$0xf]  ;;  %v1069_v10 = vor.u32 %v1358_v2, %v1066_v3 }
  0x1c   : > { %443 = vmatpush.bf16.msra.mxu3 %v1085_v50  ;;  %v990_v11 = vld [vmem:[%s2011_s1 + $0x98] sm:$0xf0]  ;;  %v1056_v12 = vld [vmem:[%s2011_s1 + $0x10] sm:$0xf]  ;;  %v1357_v13 = vld [vmem:[%s2011_s1 + $0x14] sm:$0xf0]  ;;  %v989_v16 = vor.u32 %v1373_v8, %v988_v7 }
  0x1d   : > { %v1356_v14 = vld [vmem:[%s2011_s1 + $0x14] sm:$0xf]  ;;  %v1058_v15 = vld [vmem:[%s2011_s1 + $0x18] sm:$0xf0]  ;;  %v980_v17 = vld [vmem:[%s2011_s1 + $0x80] sm:$0xf]  ;;  %v993_v19 = vor.u32 %v1372_v9, %v990_v11  ;;  %v1057_v20 = vor.u32 %v1357_v13, %v1056_v12 }
  0x1e   : > { %316 = vmatpush.bf16.msra.mxu0 %v1005_v56  ;;  %v1371_v18 = vld [vmem:[%s2011_s1 + $0x84] sm:$0xf0]  ;;  %v1370_v21 = vld [vmem:[%s2011_s1 + $0x84] sm:$0xf]  ;;  %v982_v22 = vld [vmem:[%s2011_s1 + $0x88] sm:$0xf0]  ;;  %v1061_v24 = vor.u32 %v1356_v14, %v1058_v15 }
  0x1f   : > { %330 = vmatpush.bf16.msra.mxu1 %v1009_v57  ;;  %430 = vmatpush.bf16.msra.mxu2 %v1073_v58  ;;  %v1048_v23 = vld [vmem:[%s2011_s1] sm:$0xf]  ;;  %v1355_v25 = vld [vmem:[%s2011_s1 + $0x4] sm:$0xf0]  ;;  %v1354_v26 = vld [vmem:[%s2011_s1 + $0x4] sm:$0xf]  ;;  %v981_v31 = vor.u32 %v1371_v18, %v980_v17  ;;  %v985_v35 = vor.u32 %v1370_v21, %v982_v22 }
  0x20   : > { %444 = vmatpush.bf16.msra.mxu3 %v1077_v62  ;;  %v1050_v27 = vld [vmem:[%s2011_s1 + $0x8] sm:$0xf0]  ;;  %v1184_v28 = vld [vmem:[%s2011_s1 + $0x170] sm:$0xf]  ;;  %v1401_v29 = vld [vmem:[%s2011_s1 + $0x174] sm:$0xf0]  ;;  %v1049_v36 = vor.u32 %v1355_v25, %v1048_v23 }
  0x21   : > { %v1400_v30 = vld [vmem:[%s2011_s1 + $0x174] sm:$0xf]  ;;  %v1186_v32 = vld [vmem:[%s2011_s1 + $0x178] sm:$0xf0]  ;;  %v1264_v33 = vld [vmem:[%s2011_s1 + $0x1f0] sm:$0xf]  ;;  %v1053_v39 = vor.u32 %v1354_v26, %v1050_v27  ;;  %v1185_v40 = vor.u32 %v1401_v29, %v1184_v28 }
  0x22   : > { %317 = vmatpush.bf16.msra.mxu0 %v997_v4  ;;  %v1417_v34 = vld [vmem:[%s2011_s1 + $0x1f4] sm:$0xf0]  ;;  %v1416_v37 = vld [vmem:[%s2011_s1 + $0x1f4] sm:$0xf]  ;;  %v1266_v38 = vld [vmem:[%s2011_s1 + $0x1f8] sm:$0xf0]  ;;  %v1189_v41 = vor.u32 %v1400_v30, %v1186_v32 }
  0x23   : > { %331 = vmatpush.bf16.msra.mxu1 %v1001_v5  ;;  %431 = vmatpush.bf16.msra.mxu2 %v1065_v6  ;;  %v1265_v42 = vor.u32 %v1417_v34, %v1264_v33  ;;  %v1176_v43 = vld [vmem:[%s2011_s1 + $0x160] sm:$0xf]  ;;  %v1399_v44 = vld [vmem:[%s2011_s1 + $0x164] sm:$0xf0]  ;;  %v1398_v45 = vld [vmem:[%s2011_s1 + $0x164] sm:$0xf]  ;;  %v1269_v46 = vor.u32 %v1416_v37, %v1266_v38 }
  0x24   : > { %445 = vmatpush.bf16.msra.mxu3 %v1069_v10  ;;  %v1178_v47 = vld [vmem:[%s2011_s1 + $0x168] sm:$0xf0]  ;;  %v1256_v48 = vld [vmem:[%s2011_s1 + $0x1e0] sm:$0xf]  ;;  %v1415_v49 = vld [vmem:[%s2011_s1 + $0x1e4] sm:$0xf0]  ;;  %v1177_v52 = vor.u32 %v1399_v44, %v1176_v43 }
  0x25   : > { %v1414_v50 = vld [vmem:[%s2011_s1 + $0x1e4] sm:$0xf]  ;;  %v1258_v51 = vld [vmem:[%s2011_s1 + $0x1e8] sm:$0xf0]  ;;  %v1168_v53 = vld [vmem:[%s2011_s1 + $0x150] sm:$0xf]  ;;  %v1181_v54 = vor.u32 %v1398_v45, %v1178_v47  ;;  %v1257_v55 = vor.u32 %v1415_v49, %v1256_v48 }
  0x26   : > { %318 = vmatpush.bf16.msra.mxu0 %v989_v16  ;;  %v1397_v56 = vld [vmem:[%s2011_s1 + $0x154] sm:$0xf0]  ;;  %v1396_v57 = vld [vmem:[%s2011_s1 + $0x154] sm:$0xf]  ;;  %s2015_s13 = smov (!%p161_p3, %s954_s13), 1  ;;  %v1261_v58 = vor.u32 %v1414_v50, %v1258_v51  ;;  %vm475_vm1 = vcmask 1046528  }
  0x27   : > { %332 = vmatpush.bf16.msra.mxu1 %v993_v19  ;;  %432 = vmatpush.bf16.msra.mxu2 %v1057_v20  ;;  %v1170_v59 = vld [vmem:[%s2011_s1 + $0x158] sm:$0xf0]  ;;  %v1248_v60 = vld [vmem:[%s2011_s1 + $0x1d0] sm:$0xf]  ;;  %v1413_v61 = vld [vmem:[%s2011_s1 + $0x1d4] sm:$0xf0]  ;;  %v1169_v0 = vor.u32 %v1397_v56, %v1168_v53 }
  0x28   : > { %446 = vmatpush.bf16.msra.mxu3 %v1061_v24  ;;  %v1412_v62 = vld [vmem:[%s2011_s1 + $0x1d4] sm:$0xf]  ;;  %v1250_v63 = vld [vmem:[%s2011_s1 + $0x1d8] sm:$0xf0]  ;;  %s1438_s15 = smul.u32 12, %s2015_s13  ;;  %v1173_v4 = vor.u32 %v1396_v57, %v1170_v59  ;;  %v1249_v5 = vor.u32 %v1413_v61, %v1248_v60  ;;  %vm765_vm3 = vcmask 1045504  }
  0x29   : > { %v1160_v1 = vld [vmem:[%s2011_s1 + $0x140] sm:$0xf]  ;;  %v1395_v2 = vld [vmem:[%s2011_s1 + $0x144] sm:$0xf0]  ;;  %v1394_v3 = vld [vmem:[%s2011_s1 + $0x144] sm:$0xf]  ;;  %v1253_v9 = vor.u32 %v1412_v62, %v1250_v63 }
  0x2a   : > { %319 = vmatpush.bf16.msra.mxu0 %v981_v31  ;;  %v1162_v6 = vld [vmem:[%s2011_s1 + $0x148] sm:$0xf0]  ;;  %v1240_v7 = vld [vmem:[%s2011_s1 + $0x1c0] sm:$0xf]  ;;  %v1411_v8 = vld [vmem:[%s2011_s1 + $0x1c4] sm:$0xf0]  ;;  %s1775_s30 = scalar_lea.vmem %s2010_s0, %s1438_s15  ;;  %v1161_v18 = vor.u32 %v1395_v2, %v1160_v1 }
  0x2b   : > { %333 = vmatpush.bf16.msra.mxu1 %v985_v35  ;;  %433 = vmatpush.bf16.msra.mxu2 %v1049_v36  ;;  %v1353_v10 = vld [vmem:[%s1775_s30] sm:$0xff]  ;;  %v192_v12 = vld [vmem:[%s1775_s30 + $0x8] sm:$0x1]  ;;  %v1242_v14 = vld [vmem:[%s2011_s1 + $0x1c8] sm:$0xf0]  ;;  %v1165_v20 = vor.u32 %v1394_v3, %v1162_v6  ;;  %v1241_v21 = vor.u32 %v1411_v8, %v1240_v7  ;;  %s1352_s19 = sshll.u32 %s2015_s13, 4 }
  0x2c   : > { %447 = vmatpush.bf16.msra.mxu3 %v1053_v39  ;;  %v1779_v11 = vld [vmem:[%s1775_s30] sm:$0xff]   ;;  %v215_v15 = vunpack.c.l.b16 %v192_v12  ;;  %v1152_v19 = vld [vmem:[%s2011_s1 + $0x130] sm:$0xf]  ;;  %v1393_v24 = vld [vmem:[%s2011_s1 + $0x134] sm:$0xf0]  ;;  %s170_s22 = scalar_lea.vmem %s2013_s3, %s1352_s19 }
  0x2d   : > { %v1410_v13 = vld [vmem:[%s2011_s1 + $0x1c4] sm:$0xf]  ;;  %v220_v16 = vshrl.u32 %v1779_v11, 16  ;;  %v222_v17 = vshll.u32 %v1779_v11, 16  ;;  %v1392_v25 = vld [vmem:[%s2011_s1 + $0x134] sm:$0xf]  ;;  %v1437_v36 = vunpack.c.h.b16 %v1779_v11  ;;  %v1153_v38 = vor.u32 %v1393_v24, %v1152_v19 }
  0x2e   : > { %560 = vmatpush.bf16.msrb.mxu0 %v1185_v40  ;;  %434 = vmatmul.bf16.vlgmr.msra.gmra.mxu2 %v1353_v10  ;;  %v1793_v22 = vpack.c.b16 %v215_v15, %v215_v15  ;;  %v1245_v26 = vor.u32 %v1410_v13, %v1242_v14  ;;  %v1154_v27 = vld [vmem:[%s2011_s1 + $0x138] sm:$0xf0]  ;;  %v1232_v28 = vld [vmem:[%s2011_s1 + $0x1b0] sm:$0xf]  ;;  %v1409_v29 = vld [vmem:[%s2011_s1 + $0x1b4] sm:$0xf0] }
  0x2f   : > { %574 = vmatpush.bf16.msrb.mxu1 %v1189_v41  ;;  %712 = vmatpush.bf16.msrb.mxu2 %v1265_v42  ;;  %v224_v23 = vrot.slane %v222_v17, 1  ;;  %v1408_v32 = vld [vmem:[%s2011_s1 + $0x1b4] sm:$0xf]  ;;  %v1234_v33 = vld [vmem:[%s2011_s1 + $0x1b8] sm:$0xf0]  ;;  %v1157_v39 = vor.u32 %v1392_v25, %v1154_v27  ;;  %v1233_v42 = vor.u32 %v1409_v29, %v1232_v28 }
  0x30   : > { %726 = vmatpush.bf16.msrb.mxu3 %v1269_v46  ;;  %v227_v31 = vshll.u32 %v1793_v22, 16  ;;  %vm218_vm0 = vsmask.f32 7424  ;;  %v1144_v34 = vld [vmem:[%s2011_s1 + $0x120] sm:$0xf]  ;;  %v1237_v43 = vor.u32 %v1408_v32, %v1234_v33  ;;  %v477_v33 = vrot.slane %v1793_v22, 1 }
  0x31   : > { %448 = vmatmul.bf16.vlgmr.msra.gmra.mxu3 %v1353_v10  ;;  %v225_v30 = vor.u32 %v224_v23, %v220_v16  ;;  %v1391_v35 = vld [vmem:[%s2011_s1 + $0x124] sm:$0xf0]  ;;  %v1390_v40 = vld [vmem:[%s2011_s1 + $0x124] sm:$0xf]  ;;  %v1146_v41 = vld [vmem:[%s2011_s1 + $0x128] sm:$0xf0] }
  0x32   : > { %561 = vmatpush.bf16.msrb.mxu0 %v1177_v52  ;;  %v229_v37 = vrot.slane %v227_v31, 1  ;;  %v1224_v44 = vld [vmem:[%s2011_s1 + $0x1a0] sm:$0xf]  ;;  %v1407_v45 = vld [vmem:[%s2011_s1 + $0x1a4] sm:$0xf0]  ;;  %v1149_v56 = vor.u32 %v1390_v40, %v1146_v41 }
  0x33   : > { %575 = vmatpush.bf16.msrb.mxu1 %v1181_v54  ;;  %713 = vmatpush.bf16.msrb.mxu2 %v1257_v55  ;;  %v454_v46 = vld [vmem:[%s1775_s30] sm:$0xe]  ;;  %v1406_v48 = vld [vmem:[%s2011_s1 + $0x1a4] sm:$0xf]  ;;  %v1226_v49 = vld [vmem:[%s2011_s1 + $0x1a8] sm:$0xf0]  ;;  %v1145_v55 = vor.u32 %v1391_v35, %v1144_v34  ;;  %v1225_v61 = vor.u32 %v1407_v45, %v1224_v44 }
  0x34   : > { %727 = vmatpush.bf16.msrb.mxu3 %v1261_v58  ;;  %v230_v47 = vsel %vm218_vm0, %v225_v30, %v229_v37  ;;  %v473_v50 = vunpack.c.l.b16 %v454_v46  ;;  %v592_v51 = vld [vmem:[%s1775_s30 + $0x8] sm:$0x3]  ;;  %v1136_v52 = vld [vmem:[%s2011_s1 + $0x110] sm:$0xf]  ;;  %v1389_v53 = vld [vmem:[%s2011_s1 + $0x114] sm:$0xf0]  ;;  %v1229_v62 = vor.u32 %v1406_v48, %v1226_v49 }
  0x35   : > { %320 = vmatmul.bf16.vlgmr.msra.gmra.mxu0 %v230_v47  ;;  %334 = vmatmul.bf16.vlgmr.msra.gmra.mxu1 %v230_v47  ;;  %v611_v54 = vunpack.c.l.b16 %v592_v51  ;;  %v1388_v57 = vld [vmem:[%s2011_s1 + $0x114] sm:$0xf]  ;;  %v1138_v58 = vld [vmem:[%s2011_s1 + $0x118] sm:$0xf0]  ;;  %v1216_v59 = vld [vmem:[%s2011_s1 + $0x190] sm:$0xf] }
  0x36   : > { %562 = vmatpush.bf16.msrb.mxu0 %v1169_v0  ;;  %v474_v60 = vpack.c.b16 %v1437_v36, %v473_v50  ;;  %v1405_v63 = vld [vmem:[%s2011_s1 + $0x194] sm:$0xf0]  ;;  %v1404_v0 = vld [vmem:[%s2011_s1 + $0x194] sm:$0xf]  ;;  %v1218_v1 = vld [vmem:[%s2011_s1 + $0x198] sm:$0xf0]  ;;  %v1141_v10 = vor.u32 %v1388_v57, %v1138_v58 }
  0x37   : > { %576 = vmatpush.bf16.msrb.mxu1 %v1173_v4  ;;  %714 = vmatpush.bf16.msrb.mxu2 %v1249_v5  ;;  %v1871_v2 = vpack.c.b16 %v611_v54, %v611_v54  ;;  %v1137_v5 = vor.u32 %v1389_v53, %v1136_v52  ;;  %v1128_v6 = vld [vmem:[%s2011_s1 + $0x100] sm:$0xf]  ;;  %v1387_v7 = vld [vmem:[%s2011_s1 + $0x104] sm:$0xf0]  ;;  %v1217_v12 = vor.u32 %v1405_v63, %v1216_v59  ;;  %v1386_v14 = vld [vmem:[%s2011_s1 + $0x104] sm:$0xf] }
  0x38   : > { %728 = vmatpush.bf16.msrb.mxu3 %v1253_v9  ;;  %v615_v3 = vshrl.u32 %v474_v60, 16  ;;  %v618_v4 = vshll.u32 %v474_v60, 16  ;;  %v1221_v13 = vor.u32 %v1404_v0, %v1218_v1  ;;  %v1130_v15 = vld [vmem:[%s2011_s1 + $0x108] sm:$0xf0]  ;;  %v1208_v16 = vld [vmem:[%s2011_s1 + $0x180] sm:$0xf] }
  0x39   : > { %v623_v8 = vshrl.u32 %v1871_v2, 16  ;;  %v626_v9 = vshll.u32 %v1871_v2, 16  ;;  %v1403_v17 = vld [vmem:[%s2011_s1 + $0x184] sm:$0xf0]  ;;  %v1402_v23 = vld [vmem:[%s2011_s1 + $0x184] sm:$0xf]  ;;  %v1133_v30 = vor.u32 %v1386_v14, %v1130_v15 }
  0x3a   : > { %563 = vmatpush.bf16.msrb.mxu0 %v1161_v18  ;;  %v617_v18 = vrot.slane %v615_v3, 1  ;;  %v620_v19 = vrot.slane %v618_v4, 2  ;;  %v1210_v24 = vld [vmem:[%s2011_s1 + $0x188] sm:$0xf0]  ;;  %v1344_v25 = vld [vmem:[%s2011_s1 + $0x270] sm:$0xf]  ;;  %v1209_v31 = vor.u32 %v1403_v17, %v1208_v16 }
  0x3b   : > { %577 = vmatpush.bf16.msrb.mxu1 %v1165_v20  ;;  %715 = vmatpush.bf16.msrb.mxu2 %v1241_v21  ;;  %v625_v20 = vrot.slane %v623_v8, 1  ;;  %v628_v21 = vrot.slane %v626_v9, 2  ;;  %v1433_v27 = vld [vmem:[%s2011_s1 + $0x274] sm:$0xf0]  ;;  %v1432_v28 = vld [vmem:[%s2011_s1 + $0x274] sm:$0xf]  ;;  %v1213_v34 = vor.u32 %v1402_v23, %v1210_v24 }
  0x3c   : > { %729 = vmatpush.bf16.msrb.mxu3 %v1245_v26  ;;  %v1129_v26 = vor.u32 %v1387_v7, %v1128_v6  ;;  %v1346_v29 = vld [vmem:[%s2011_s1 + $0x278] sm:$0xf0]  ;;  %v476_v32 = vrot.slane %v474_v60, 1  ;;  %v621_v35 = vor.u32 %v620_v19, %v617_v18  ;;  %vm613_vm2 = vsmask.f32 6400 }
  0x3d   : > { %v629_v37 = vor.u32 %v628_v21, %v625_v20  ;;  %v1336_v40 = vld [vmem:[%s2011_s1 + $0x260] sm:$0xf]  ;;  %v1431_v41 = vld [vmem:[%s2011_s1 + $0x264] sm:$0xf0]  ;;  %v1430_v22 = vld [vmem:[%s2011_s1 + $0x264] sm:$0xf] }
  0x3e   : > { %564 = vmatpush.bf16.msrb.mxu0 %v1153_v38  ;;  %v1345_v38 = vor.u32 %v1433_v27, %v1344_v25  ;;  %v1337_v45 = vor.u32 %v1431_v41, %v1336_v40  ;;  %v1328_v47 = vld [vmem:[%s2011_s1 + $0x250] sm:$0xf]  ;;  %v1429_v48 = vld [vmem:[%s2011_s1 + $0x254] sm:$0xf0]  ;;  %v1428_v49 = vld [vmem:[%s2011_s1 + $0x254] sm:$0xf] }
  0x3f   : > { %578 = vmatpush.bf16.msrb.mxu1 %v1157_v39  ;;  %716 = vmatpush.bf16.msrb.mxu2 %v1233_v42  ;;  %v1349_v39 = vor.u32 %v1432_v28, %v1346_v29  ;;  %v1338_v42 = vld [vmem:[%s2011_s1 + $0x268] sm:$0xf0]  ;;  %v630_v44 = vsel %vm613_vm2, %v621_v35, %v629_v37  ;;  %v1330_v50 = vld [vmem:[%s2011_s1 + $0x258] sm:$0xf0]  ;;  %v1329_v51 = vor.u32 %v1429_v48, %v1328_v47  ;;  %v1320_v53 = vld [vmem:[%s2011_s1 + $0x240] sm:$0xf] }
  0x40   : > { %730 = vmatpush.bf16.msrb.mxu3 %v1237_v43  ;;  %v478_v43 = vsel %vm475_vm1, %v476_v32, %v477_v33  ;;  %v1341_v46 = vor.u32 %v1430_v22, %v1338_v42  ;;  %v1333_v52 = vor.u32 %v1428_v49, %v1330_v50  ;;  %v1427_v54 = vld [vmem:[%s2011_s1 + $0x244] sm:$0xf0]  ;;  %v1312_v59 = vld [vmem:[%s2011_s1 + $0x230] sm:$0xf]  ;;  %v1425_v60 = vld [vmem:[%s2011_s1 + $0x234] sm:$0xf0] }
  0x41   : > { %v1321_v57 = vor.u32 %v1427_v54, %v1320_v53  ;;  %v1313_v63 = vor.u32 %v1425_v60, %v1312_v59  ;;  %v1304_v1 = vld [vmem:[%s2011_s1 + $0x220] sm:$0xf]  ;;  %v1423_v3 = vld [vmem:[%s2011_s1 + $0x224] sm:$0xf0]  ;;  %v1422_v4 = vld [vmem:[%s2011_s1 + $0x224] sm:$0xf] }
  0x42   : > { %565 = vmatpush.bf16.msrb.mxu0 %v1145_v55  ;;  %v1426_v55 = vld [vmem:[%s2011_s1 + $0x244] sm:$0xf]  ;;  %v744_v6 = vld [vmem:[%s1775_s30] sm:$0xc]  ;;  %v1305_v7 = vor.u32 %v1423_v3, %v1304_v1  ;;  %v1296_v9 = vld [vmem:[%s2011_s1 + $0x210] sm:$0xf] }
  0x43   : > { %579 = vmatpush.bf16.msrb.mxu1 %v1149_v56  ;;  %717 = vmatpush.bf16.msrb.mxu2 %v1225_v61  ;;  %v1322_v56 = vld [vmem:[%s2011_s1 + $0x248] sm:$0xf0]  ;;  %v1424_v61 = vld [vmem:[%s2011_s1 + $0x234] sm:$0xf]  ;;  %v1298_v14 = vld [vmem:[%s2011_s1 + $0x218] sm:$0xf0] }
  0x44   : > { %731 = vmatpush.bf16.msrb.mxu3 %v1229_v62  ;;  %v1325_v58 = vor.u32 %v1426_v55, %v1322_v56  ;;  %v1314_v62 = vld [vmem:[%s2011_s1 + $0x238] sm:$0xf0]  ;;  %v1288_v17 = vld [vmem:[%s2011_s1 + $0x200] sm:$0xf]  ;;  %v1419_v19 = vld [vmem:[%s2011_s1 + $0x204] sm:$0xf0] }
  0x45   : > { %v1317_v0 = vor.u32 %v1424_v61, %v1314_v62  ;;  %v1418_v20 = vld [vmem:[%s2011_s1 + $0x204] sm:$0xf]  ;;  %v1290_v21 = vld [vmem:[%s2011_s1 + $0x208] sm:$0xf0]  ;;  %v1289_v23 = vor.u32 %v1419_v19, %v1288_v17  ;;  %v767_v11 = vrot.slane %v1871_v2, 2 }
  0x46   : > { %566 = vmatpush.bf16.msrb.mxu0 %v1137_v5  ;;  %v1306_v5 = vld [vmem:[%s2011_s1 + $0x228] sm:$0xf0]  ;;  %v1293_v24 = vor.u32 %v1418_v20, %v1290_v21  ;;  %v171_v22 = vld [vmem:[%s2012_s2] sm:$0x3] }
  0x47   : > { %580 = vmatpush.bf16.msrb.mxu1 %v1141_v10  ;;  %718 = vmatpush.bf16.msrb.mxu2 %v1217_v12  ;;  %v1309_v8 = vor.u32 %v1422_v4, %v1306_v5  ;;  %v763_v10 = vunpack.c.l.b16 %v744_v6  ;;  %v1421_v12 = vld [vmem:[%s2011_s1 + $0x214] sm:$0xf0]  ;;  %v884_v47 = vperm.slane %v171_v22, 1 }
  0x48   : > { %732 = vmatpush.bf16.msrb.mxu3 %v1221_v13  ;;  %v1420_v13 = vld [vmem:[%s2011_s1 + $0x214] sm:$0xf]  ;;  %v1297_v15 = vor.u32 %v1421_v12, %v1296_v9 }
  0x49   : > { %v1301_v16 = vor.u32 %v1420_v13, %v1298_v14  ;;  %v764_v18 = vpack.c.b16 %v1437_v36, %v763_v10 }
  0x4a   : > { %567 = vmatpush.bf16.msrb.mxu0 %v1129_v26 }
  0x4b   : > { %581 = vmatpush.bf16.msrb.mxu1 %v1133_v30  ;;  %719 = vmatpush.bf16.msrb.mxu2 %v1209_v31  ;;  %v766_v25 = vrot.slane %v764_v18, 2 }
  0x4c   : > { %733 = vmatpush.bf16.msrb.mxu3 %v1213_v34 }
  0x4d   : > { %568 = vmatmul.bf16.vlgmr.msrb.gmra.mxu0 %v478_v43  ;;  %v768_v36 = vsel %vm765_vm3, %v766_v25, %v767_v11 }
  0x4e   : > { %850 = vmatpush.bf16.msra.mxu0 %v1345_v38  ;;  %582 = vmatmul.bf16.vlgmr.msrb.gmra.mxu1 %v478_v43 }
  0x4f   : > { %864 = vmatpush.bf16.msra.mxu1 %v1349_v39  ;;  %720 = vmatmul.bf16.vlgmr.msrb.gmra.mxu2 %v630_v44 }
  0x50   : > { %734 = vmatmul.bf16.vlgmr.msrb.gmra.mxu3 %v630_v44 }
  0x52   : > { %851 = vmatpush.bf16.msra.mxu0 %v1337_v45 }
  0x53   : > { %865 = vmatpush.bf16.msra.mxu1 %v1341_v46  ;;  %v883_v46 = vperm.slane %v171_v22, 0 }
  0x56   : > { %852 = vmatpush.bf16.msra.mxu0 %v1329_v51 }
  0x57   : > { %866 = vmatpush.bf16.msra.mxu1 %v1333_v52 }
  0x5a   : > { %853 = vmatpush.bf16.msra.mxu0 %v1321_v57 }
  0x5b   : > { %867 = vmatpush.bf16.msra.mxu1 %v1325_v58 }
  0x5e   : > { %854 = vmatpush.bf16.msra.mxu0 %v1313_v63 }
  0x5f   : > { %868 = vmatpush.bf16.msra.mxu1 %v1317_v0 }
  0x62   : > { %855 = vmatpush.bf16.msra.mxu0 %v1305_v7 }
  0x63   : > { %869 = vmatpush.bf16.msra.mxu1 %v1309_v8 }
  0x66   : > { %856 = vmatpush.bf16.msra.mxu0 %v1297_v15 }
  0x67   : > { %870 = vmatpush.bf16.msra.mxu1 %v1301_v16 }
  0x6a   : > { %857 = vmatpush.bf16.msra.mxu0 %v1289_v23 }
  0x6b   : > { %871 = vmatpush.bf16.msra.mxu1 %v1293_v24 }
  0x6d   : > { %858 = vmatmul.bf16.vlgmr.msra.gmra.mxu0 %v768_v36 }
  0x6e   : > { %872 = vmatmul.bf16.vlgmr.msra.gmra.mxu1 %v768_v36 }
  0xb1   : > { %v435_v30 = vpop.f32.mrf.mxu2 }
  0xb2   : > { %v321_v26 = vpop.f32.mrf.mxu0  ;;  %v335_v27 = vpop.f32.mrf.mxu1 }
  0xb3   : > { %v436_v39 = vadd.f32 %v435_v30, %v321_v26 }
  0xb4   : > { %v449_v31 = vpop.f32.mrf.mxu3 }
  0xb5   : > { %v450_v2 = vadd.f32 %v449_v31, %v335_v27 }
  0xb9   : > { %v437_v34 = vpop.f32.mrf.mxu2 }
  0xba   : > { %v323_v28 = vpop.f32.mrf.mxu0  ;;  %v337_v29 = vpop.f32.mrf.mxu1 }
  0xbb   : > { %v438_v52 = vadd.f32 %v437_v34, %v323_v28 }
  0xbc   : > { %v451_v35 = vpop.f32.mrf.mxu3 }
  0xbd   : > { %v452_v53 = vadd.f32 %v451_v35, %v337_v29 }
  0xca   : > { %v569_v32 = vpop.f32.mrf.mxu0 }
  0xcb   : > { %v583_v33 = vpop.f32.mrf.mxu1  ;;  %v588_v42 = vadd.f32 %v569_v32, %v436_v39 }
  0xcc   : > { %v589_v43 = vadd.f32 %v583_v33, %v450_v2 }
  0xd2   : > { %v571_v37 = vpop.f32.mrf.mxu0  ;;  %v721_v40 = vpop.f32.mrf.mxu2 }
  0xd3   : > { %v585_v38 = vpop.f32.mrf.mxu1  ;;  %v735_v41 = vpop.f32.mrf.mxu3  ;;  %v740_v44 = vadd.f32 %v721_v40, %v588_v42  ;;  %v590_v58 = vadd.f32 %v571_v37, %v438_v52 }
  0xd4   : > { %v741_v45 = vadd.f32 %v735_v41, %v589_v43  ;;  %v591_v59 = vadd.f32 %v585_v38, %v452_v53 }
  0xda   : > { %v723_v56 = vpop.f32.mrf.mxu2 }
  0xdb   : > { %v737_v57 = vpop.f32.mrf.mxu3  ;;  %v742_v62 = vadd.f32 %v723_v56, %v590_v58 }
  0xdc   : > { %v743_v63 = vadd.f32 %v737_v57, %v591_v59 }
  0xea   : > { %v859_v48 = vpop.f32.mrf.mxu0 }
  0xeb   : > { %v873_v49 = vpop.f32.mrf.mxu1  ;;  %v878_v50 = vadd.f32 %v859_v48, %v740_v44 }
  0xec   : > { %v879_v51 = vadd.f32 %v873_v49, %v741_v45 }
  0xed   : > { %v887_v54 = vadd.f32 %v883_v46, %v878_v50 }
  0xee   : > { %v888_v55 = vadd.f32 %v884_v47, %v879_v51 }
  0xef   : > { %v891_v60 = vmax.f32 %v887_v54, 0.0 }
  0xf0   : > { %v892_v61 = vmax.f32 %v888_v55, 0.0 }
  0xf2   : > { %v895_v0 = vpack.c.bf16 %v892_v61, %v891_v60  ;;  %v861_v1 = vpop.f32.mrf.mxu0 }
  0xf3   : > { %v875_v3 = vpop.f32.mrf.mxu1  ;;  %v880_v4 = vadd.f32 %v861_v1, %v742_v62 }
  0xf4   : > { %897 = vst [vmem:[%s170_s22] sm:$0xff] %v895_v0  ;;  %v881_v5 = vadd.f32 %v875_v3, %v743_v63 }
  0xf5   : > { %v889_v6 = vadd.f32 %v883_v46, %v880_v4 }
  0xf6   : > { %v890_v7 = vadd.f32 %v884_v47, %v881_v5 }
  0xf7   : > { %v893_v8 = vmax.f32 %v889_v6, 0.0 }
  0xf8   : > { %v894_v9 = vmax.f32 %v890_v7, 0.0 }
  0xfa   : > { %v896_v10 = vpack.c.bf16 %v894_v9, %v893_v8 }
  0xfc   : > { %898 = vst [vmem:[%s170_s22 + $0x8] sm:$0xff] %v896_v10 }
  0xfd PF: > { %s13_s12 = sadd.s32 1, %s1453_s12  }
  0xfe   : > { %p10_p4 = scmp.ge.s32.totalorder %s13_s12, 4  }
 0x100   :  { %12 = sbr.rel (!%p10_p4) target bundleno = 1 (0x1), region = 66 }

// kernel: maya_forward.7
= control target key start
LH: loop header
LB: loop body
LE: loop exit
PB: predicated region body
PF: predicated region fallthrough
CT: control target
= control target key end

     0   :  { %s970_s1 = inlined_call_operand.vmem [shape: bf16[512,128], index: 1, kind: input, shape index: {}]   ;;  %s971_s2 = inlined_call_operand.vmem [shape: f32[1,128], index: 2, kind: input, shape index: {}]   ;;  %s972_s0 = inlined_call_operand.vmem [shape: bf16[8,512], index: 0, kind: input, shape index: {}]   ;;  %s973_s3 = inlined_call_operand.vmem [shape: bf16[128,128], index: 3, kind: input, shape index: {}]   ;;  %s974_s4 = inlined_call_operand.vmem [shape: f32[1,128], index: 4, kind: input, shape index: {}]   ;;  %s975_s5 = inlined_call_operand.vmem [shape: bf16[128,128], index: 5, kind: input, shape index: {}]   ;;  %s976_s6 = inlined_call_operand.vmem [shape: f32[1,128], index: 6, kind: input, shape index: {}]   ;;  %s977_s7 = inlined_call_operand.vmem [shape: f32[8,128], index: 7, kind: output, shape index: {}]  }
   0x1   :  { %v724_v0 = vld [vmem:[%s970_s1 + $0x38] sm:$0xff]  ;;  %v723_v4 = vld [vmem:[%s970_s1 + $0x30] sm:$0xff]  ;;  %v722_v8 = vld [vmem:[%s970_s1 + $0x28] sm:$0xff] }
   0x2   :  { %v732_v1 = vld [vmem:[%s970_s1 + $0x78] sm:$0xff]  ;;  %302 = vmatpush.bf16.msra.mxu0 %v724_v0  ;;  %v731_v5 = vld [vmem:[%s970_s1 + $0x70] sm:$0xff]  ;;  %v730_v9 = vld [vmem:[%s970_s1 + $0x68] sm:$0xff] }
   0x3   :  { %v740_v2 = vld [vmem:[%s970_s1 + $0xb8] sm:$0xff]  ;;  %315 = vmatpush.bf16.msra.mxu1 %v732_v1  ;;  %v739_v6 = vld [vmem:[%s970_s1 + $0xb0] sm:$0xff]  ;;  %v738_v10 = vld [vmem:[%s970_s1 + $0xa8] sm:$0xff] }
   0x4   :  { %v748_v3 = vld [vmem:[%s970_s1 + $0xf8] sm:$0xff]  ;;  %328 = vmatpush.bf16.msra.mxu2 %v740_v2  ;;  %v747_v7 = vld [vmem:[%s970_s1 + $0xf0] sm:$0xff]  ;;  %v746_v11 = vld [vmem:[%s970_s1 + $0xe8] sm:$0xff] }
   0x5   :  { %341 = vmatpush.bf16.msra.mxu3 %v748_v3  ;;  %v721_v12 = vld [vmem:[%s970_s1 + $0x20] sm:$0xff]  ;;  %v720_v16 = vld [vmem:[%s970_s1 + $0x18] sm:$0xff]  ;;  %v719_v20 = vld [vmem:[%s970_s1 + $0x10] sm:$0xff] }
   0x6   :  { %303 = vmatpush.bf16.msra.mxu0 %v723_v4  ;;  %v729_v13 = vld [vmem:[%s970_s1 + $0x60] sm:$0xff]  ;;  %v728_v17 = vld [vmem:[%s970_s1 + $0x58] sm:$0xff]  ;;  %v727_v21 = vld [vmem:[%s970_s1 + $0x50] sm:$0xff] }
   0x7   :  { %316 = vmatpush.bf16.msra.mxu1 %v731_v5  ;;  %v737_v14 = vld [vmem:[%s970_s1 + $0xa0] sm:$0xff]  ;;  %v736_v18 = vld [vmem:[%s970_s1 + $0x98] sm:$0xff]  ;;  %v735_v22 = vld [vmem:[%s970_s1 + $0x90] sm:$0xff] }
   0x8   :  { %329 = vmatpush.bf16.msra.mxu2 %v739_v6  ;;  %v745_v15 = vld [vmem:[%s970_s1 + $0xe0] sm:$0xff]  ;;  %v744_v19 = vld [vmem:[%s970_s1 + $0xd8] sm:$0xff]  ;;  %v743_v23 = vld [vmem:[%s970_s1 + $0xd0] sm:$0xff] }
   0x9   :  { %342 = vmatpush.bf16.msra.mxu3 %v747_v7  ;;  %v718_v24 = vld [vmem:[%s970_s1 + $0x8] sm:$0xff]  ;;  %v26_v26 = vld [vmem:[%s972_s0] sm:$0xff]  ;;  %v756_v38 = vld [vmem:[%s973_s3 + $0x38] sm:$0xff] }
   0xa   :  { %304 = vmatpush.bf16.msra.mxu0 %v722_v8  ;;  %v726_v25 = vld [vmem:[%s970_s1 + $0x48] sm:$0xff]  ;;  %v98_v30 = vunpack.c.l.b16 %v26_v26  ;;  %v99_v31 = vunpack.c.h.b16 %v26_v26  ;;  %v717_v32 = vld [vmem:[%s970_s1] sm:$0xff]  ;;  %v755_v43 = vld [vmem:[%s973_s3 + $0x30] sm:$0xff] }
   0xb   :  { %317 = vmatpush.bf16.msra.mxu1 %v730_v9  ;;  %v734_v27 = vld [vmem:[%s970_s1 + $0x88] sm:$0xff]  ;;  %v725_v33 = vld [vmem:[%s970_s1 + $0x40] sm:$0xff]  ;;  %v752_v46 = vld [vmem:[%s973_s3 + $0x18] sm:$0xff] }
   0xc   :  { %330 = vmatpush.bf16.msra.mxu2 %v738_v10  ;;  %v742_v28 = vld [vmem:[%s970_s1 + $0xc8] sm:$0xff]  ;;  %v733_v36 = vld [vmem:[%s970_s1 + $0x80] sm:$0xff]  ;;  %v102_v39 = vpack.c.b16 %v98_v30, %v98_v30  ;;  %v103_v40 = vpack.c.b16 %v99_v31, %v99_v31  ;;  %v751_v47 = vld [vmem:[%s973_s3 + $0x10] sm:$0xff] }
   0xd   :  { %343 = vmatpush.bf16.msra.mxu3 %v746_v11  ;;  %v27_v29 = vld [vmem:[%s972_s0 + $0x8] sm:$0xff]  ;;  %v741_v37 = vld [vmem:[%s970_s1 + $0xc0] sm:$0xff]  ;;  %v764_v50 = vld [vmem:[%s975_s5 + $0x38] sm:$0xff] }
   0xe   :  { %305 = vmatpush.bf16.msra.mxu0 %v721_v12  ;;  %v100_v34 = vunpack.c.l.b16 %v27_v29  ;;  %v101_v35 = vunpack.c.h.b16 %v27_v29  ;;  %v754_v44 = vld [vmem:[%s973_s3 + $0x28] sm:$0xff]  ;;  %v753_v45 = vld [vmem:[%s973_s3 + $0x20] sm:$0xff]  ;;  %v763_v51 = vld [vmem:[%s975_s5 + $0x30] sm:$0xff] }
   0xf   :  { %318 = vmatpush.bf16.msra.mxu1 %v729_v13  ;;  %v750_v48 = vld [vmem:[%s973_s3 + $0x8] sm:$0xff]  ;;  %v749_v49 = vld [vmem:[%s973_s3] sm:$0xff]  ;;  %v760_v55 = vld [vmem:[%s975_s5 + $0x18] sm:$0xff] }
  0x10   :  { %331 = vmatpush.bf16.msra.mxu2 %v737_v14  ;;  %v104_v41 = vpack.c.b16 %v100_v34, %v100_v34  ;;  %v105_v42 = vpack.c.b16 %v101_v35, %v101_v35  ;;  %v762_v52 = vld [vmem:[%s975_s5 + $0x28] sm:$0xff]  ;;  %v761_v53 = vld [vmem:[%s975_s5 + $0x20] sm:$0xff]  ;;  %v759_v59 = vld [vmem:[%s975_s5 + $0x10] sm:$0xff] }
  0x11   :  { %344 = vmatpush.bf16.msra.mxu3 %v745_v15  ;;  %v765_v54 = vld [vmem:[%s971_s2] ss:$0 sm:$0xff]  ;;  %v758_v7 = vld [vmem:[%s975_s5 + $0x8] sm:$0xff] }
  0x12   :  { %306 = vmatpush.bf16.msra.mxu0 %v720_v16  ;;  %v757_v8 = vld [vmem:[%s975_s5] sm:$0xff] }
  0x13   :  { %319 = vmatpush.bf16.msra.mxu1 %v728_v17  ;;  %v766_v9 = vld [vmem:[%s974_s4] ss:$0 sm:$0xff] }
  0x14   :  { %332 = vmatpush.bf16.msra.mxu2 %v736_v18  ;;  %v767_v15 = vld [vmem:[%s976_s6] ss:$0 sm:$0xff] }
  0x15   :  { %345 = vmatpush.bf16.msra.mxu3 %v744_v19 }
  0x16   :  { %307 = vmatpush.bf16.msra.mxu0 %v719_v20 }
  0x17   :  { %320 = vmatpush.bf16.msra.mxu1 %v727_v21 }
  0x18   :  { %333 = vmatpush.bf16.msra.mxu2 %v735_v22 }
  0x19   :  { %346 = vmatpush.bf16.msra.mxu3 %v743_v23 }
  0x1a   :  { %308 = vmatpush.bf16.msra.mxu0 %v718_v24 }
  0x1b   :  { %321 = vmatpush.bf16.msra.mxu1 %v726_v25 }
  0x1c   :  { %334 = vmatpush.bf16.msra.mxu2 %v734_v27 }
  0x1d   :  { %347 = vmatpush.bf16.msra.mxu3 %v742_v28 }
  0x1e   :  { %309 = vmatpush.bf16.msra.mxu0 %v717_v32 }
  0x1f   :  { %322 = vmatpush.bf16.msra.mxu1 %v725_v33 }
  0x20   :  { %335 = vmatpush.bf16.msra.mxu2 %v733_v36 }
  0x21   :  { %348 = vmatpush.bf16.msra.mxu3 %v741_v37  ;;  %310 = vmatmul.bf16.vlgmr.msra.gmra.mxu0 %v102_v39 }
  0x22   :  { %424 = vmatpush.bf16.msrb.mxu0 %v756_v38  ;;  %323 = vmatmul.bf16.vlgmr.msra.gmra.mxu1 %v103_v40 }
  0x23   :  { %336 = vmatmul.bf16.vlgmr.msra.gmra.mxu2 %v104_v41  ;;  %507 = vmatpush.bf16.msrb.mxu1 %v764_v50 }
  0x24   :  { %349 = vmatmul.bf16.vlgmr.msra.gmra.mxu3 %v105_v42 }
  0x26   :  { %425 = vmatpush.bf16.msrb.mxu0 %v755_v43 }
  0x27   :  { %508 = vmatpush.bf16.msrb.mxu1 %v763_v51 }
  0x2a   :  { %426 = vmatpush.bf16.msrb.mxu0 %v754_v44 }
  0x2b   :  { %509 = vmatpush.bf16.msrb.mxu1 %v762_v52 }
  0x2e   :  { %427 = vmatpush.bf16.msrb.mxu0 %v753_v45 }
  0x2f   :  { %510 = vmatpush.bf16.msrb.mxu1 %v761_v53 }
  0x32   :  { %428 = vmatpush.bf16.msrb.mxu0 %v752_v46 }
  0x33   :  { %511 = vmatpush.bf16.msrb.mxu1 %v760_v55 }
  0x36   :  { %429 = vmatpush.bf16.msrb.mxu0 %v751_v47 }
  0x37   :  { %512 = vmatpush.bf16.msrb.mxu1 %v759_v59 }
  0x3a   :  { %430 = vmatpush.bf16.msrb.mxu0 %v750_v48 }
  0x3b   :  { %513 = vmatpush.bf16.msrb.mxu1 %v758_v7 }
  0x3e   :  { %431 = vmatpush.bf16.msrb.mxu0 %v749_v49 }
  0x3f   :  { %514 = vmatpush.bf16.msrb.mxu1 %v757_v8 }
  0x9e   :  { %v311_v56 = vpop.f32.mrf.mxu0 }
  0x9f   :  { %v324_v57 = vpop.f32.mrf.mxu1  ;;  %v312_v58 = vadd.f32 %v765_v54, %v311_v56 }
  0xa1   :  { %v325_v60 = vadd.f32 %v324_v57, %v312_v58 }
  0xa6   :  { %v337_v61 = vpop.f32.mrf.mxu2  ;;  %v313_v0 = vpop.f32.mrf.mxu0 }
  0xa7   :  { %v350_v62 = vpop.f32.mrf.mxu3  ;;  %v338_v63 = vadd.f32 %v337_v61, %v325_v60  ;;  %v326_v1 = vpop.f32.mrf.mxu1 }
  0xa9   :  { %v351_v2 = vadd.f32 %v350_v62, %v338_v63 }
  0xab   :  { %v354_v3 = vmax.f32 %v351_v2, 0.0 }
  0xad   :  { %v355_v4 = vpack.c.bf16 %v354_v3, %v354_v3 }
  0xae   :  { %v339_v5 = vpop.f32.mrf.mxu2 }
  0xaf   :  { %v352_v6 = vpop.f32.mrf.mxu3  ;;  %432 = vmatmul.bf16.vlgmr.msrb.gmra.mxu0 %v355_v4 }
 0x12c   :  { %v433_v10 = vpop.f32.mrf.mxu0 }
 0x12d   :  { %v434_v11 = vadd.f32 %v766_v9, %v433_v10 }
 0x12f   :  { %v437_v12 = vmax.f32 %v434_v11, 0.0 }
 0x131   :  { %v438_v13 = vpack.c.bf16 %v437_v12, %v437_v12 }
 0x133   :  { %515 = vmatmul.bf16.vlgmr.msrb.gmra.mxu1 %v438_v13 }
 0x134   :  { %v435_v14 = vpop.f32.mrf.mxu0 }
 0x1b0   :  { %v516_v16 = vpop.f32.mrf.mxu1 }
 0x1b1   :  { %v517_v17 = vadd.f32 %v767_v15, %v516_v16 }
 0x1b3   :  { %520 = vst [vmem:[%s977_s7] sm:$0xff] %v517_v17 }
 0x1b8   :  { %v518_v18 = vpop.f32.mrf.mxu1 }

// kernel: maya_forward.8
= control target key start
LH: loop header
LB: loop body
LE: loop exit
PB: predicated region body
PF: predicated region fallthrough
CT: control target
= control target key end

     0   :  { %s2477_s12 = smov 0   ;;  %s2947_s0 = inlined_call_operand.vmem [shape: bf16[2,24,384], index: 0, kind: input, shape index: {}]   ;;  %s2948_s1 = inlined_call_operand.vmem [shape: bf16[5,384,128], index: 1, kind: input, shape index: {}]   ;;  %s2949_s2 = inlined_call_operand.vmem [shape: f32[1,128], index: 2, kind: input, shape index: {}]   ;;  %s2950_s3 = inlined_call_operand.vmem [shape: bf16[2,16,128], index: 3, kind: output, shape index: {}]  }
   0x1 LB: > { %s1616_s13 = sadd.s32 4294967295, %s2455_s12   ;;  %p1620_p0 = scmp.ge.s32.totalorder %s2455_s12, 1  ;;  %s2455_s12 = sphi %s2477_s12, %s13_s12  }
   0x2   : > { %p137_p1 = scmp.lt.s32.totalorder %s2455_s12, 3 }
   0x4   : > { %p138_p2 = pnand %p1620_p0, %p137_p1 }
   0x5   : > { %p161_p3 = scmp.lt.s32.totalorder (!%p138_p2), %s1616_s13, 1 }
   0x6   : > { %141 = sbr.rel (%p138_p2) target bundleno = 292 (0x124), region = 32 }
   0xb   : > { %v2345_v0 = vld [vmem:[%s2948_s1 + $0xf8] sm:$0xff]  ;;  %v2344_v4 = vld [vmem:[%s2948_s1 + $0xf0] sm:$0xff]  ;;  %s2952_s13 = smov (!%p161_p3, %s1616_s13), 1  ;;  %v2343_v8 = vld [vmem:[%s2948_s1 + $0xe8] sm:$0xff]  ;;  %vm300_vm0 = vsmask.f32 7424 }
   0xc   : > { %v2353_v1 = vld [vmem:[%s2948_s1 + $0x138] sm:$0xff]  ;;  %484 = vmatpush.bf16.msra.mxu0 %v2345_v0  ;;  %v2352_v5 = vld [vmem:[%s2948_s1 + $0x130] sm:$0xff]  ;;  %v2351_v9 = vld [vmem:[%s2948_s1 + $0x128] sm:$0xff]  ;;  %s2439_s11 = smul.u32 36, %s2952_s13  ;;  %vm787_vm1 = vcmask 1046528   ;;  %vm1349_vm3 = vcmask 1045504  }
   0xd   : > { %v2361_v2 = vld [vmem:[%s2948_s1 + $0x178] sm:$0xff]  ;;  %498 = vmatpush.bf16.msra.mxu1 %v2353_v1  ;;  %v2360_v6 = vld [vmem:[%s2948_s1 + $0x170] sm:$0xff]  ;;  %v2359_v10 = vld [vmem:[%s2948_s1 + $0x168] sm:$0xff]  ;;  %vm1047_vm2 = vsmask.f32 6400  ;;  %s2310_s17 = sshll.u32 %s2952_s13, 3 }
   0xe   : > { %v2321_v3 = vld [vmem:[%s2948_s1 + $0x38] sm:$0xff]  ;;  %512 = vmatpush.bf16.msra.mxu2 %v2361_v2  ;;  %v2320_v7 = vld [vmem:[%s2948_s1 + $0x30] sm:$0xff]  ;;  %v2319_v11 = vld [vmem:[%s2948_s1 + $0x28] sm:$0xff]  ;;  %s2539_s24 = scalar_lea.vmem %s2947_s0, %s2439_s11  ;;  %s170_s20 = scalar_lea.vmem %s2950_s3, %s2310_s17 }
   0xf   : > { %686 = vmatpush.bf16.msra.mxu3 %v2321_v3  ;;  %v2342_v12 = vld [vmem:[%s2948_s1 + $0xe0] sm:$0xff]  ;;  %v2341_v16 = vld [vmem:[%s2948_s1 + $0xd8] sm:$0xff]  ;;  %v226_v21 = vld [vmem:[%s2539_s24 + $0xc] sm:$0xff] }
  0x10   : > { %485 = vmatpush.bf16.msra.mxu0 %v2344_v4  ;;  %v2350_v13 = vld [vmem:[%s2948_s1 + $0x120] sm:$0xff]  ;;  %v2349_v17 = vld [vmem:[%s2948_s1 + $0x118] sm:$0xff]  ;;  %v2556_v24 = vunpack.c.l.b16 %v226_v21  ;;  %v2340_v27 = vld [vmem:[%s2948_s1 + $0xd0] sm:$0xff]  ;;  %v2567_v30 = vunpack.c.h.b16 %v226_v21 }
  0x11   : > { %499 = vmatpush.bf16.msra.mxu1 %v2352_v5  ;;  %v2358_v14 = vld [vmem:[%s2948_s1 + $0x160] sm:$0xff]  ;;  %v2357_v18 = vld [vmem:[%s2948_s1 + $0x158] sm:$0xff]  ;;  %v2348_v28 = vld [vmem:[%s2948_s1 + $0x110] sm:$0xff] }
  0x12   : > { %513 = vmatpush.bf16.msra.mxu2 %v2360_v6  ;;  %v2318_v15 = vld [vmem:[%s2948_s1 + $0x20] sm:$0xff]  ;;  %v2317_v19 = vld [vmem:[%s2948_s1 + $0x18] sm:$0xff]  ;;  %v2356_v29 = vld [vmem:[%s2948_s1 + $0x150] sm:$0xff] }
  0x13   : > { %687 = vmatpush.bf16.msra.mxu3 %v2320_v7  ;;  %v224_v20 = vld [vmem:[%s2539_s24] sm:$0xff]  ;;  %v228_v22 = vld [vmem:[%s2539_s24 + $0x18] sm:$0x11]  ;;  %v2316_v32 = vld [vmem:[%s2948_s1 + $0x10] sm:$0xff] }
  0x14   : > { %486 = vmatpush.bf16.msra.mxu0 %v2343_v8  ;;  %v285_v23 = vunpack.c.l.b16 %v224_v20  ;;  %v291_v25 = vunpack.c.l.b16 %v228_v22  ;;  %v286_v26 = vunpack.c.h.b16 %v224_v20  ;;  %v292_v31 = vunpack.c.h.b16 %v228_v22  ;;  %v225_v35 = vld [vmem:[%s2539_s24 + $0x8] sm:$0xf]  ;;  %v227_v36 = vld [vmem:[%s2539_s24 + $0x14] sm:$0xf]  ;;  %v229_v39 = vld [vmem:[%s2539_s24 + $0x20] sm:$0x1] }
  0x15   : > { %500 = vmatpush.bf16.msra.mxu1 %v2351_v9  ;;  %v287_v40 = vunpack.c.l.b16 %v225_v35  ;;  %v2581_v41 = vunpack.c.l.b16 %v227_v36  ;;  %v293_v43 = vunpack.c.l.b16 %v229_v39  ;;  %v2339_v44 = vld [vmem:[%s2948_s1 + $0xc8] sm:$0xff]  ;;  %v2338_v60 = vld [vmem:[%s2948_s1 + $0xc0] sm:$0xff]  ;;  %v2329_v2 = vld [vmem:[%s2948_s1 + $0x78] sm:$0xff] }
  0x16   : > { %514 = vmatpush.bf16.msra.mxu2 %v2359_v10  ;;  %v294_v33 = vpack.c.b16 %v2556_v24, %v285_v23  ;;  %v2573_v34 = vpack.c.b16 %v291_v25, %v291_v25  ;;  %v295_v37 = vpack.c.b16 %v2567_v30, %v286_v26  ;;  %v2578_v38 = vpack.c.b16 %v292_v31, %v292_v31  ;;  %v2347_v45 = vld [vmem:[%s2948_s1 + $0x108] sm:$0xff]  ;;  %v2346_v61 = vld [vmem:[%s2948_s1 + $0x100] sm:$0xff]  ;;  %v2337_v5 = vld [vmem:[%s2948_s1 + $0xb8] sm:$0xff] }
  0x17   : > { %688 = vmatpush.bf16.msra.mxu3 %v2319_v11  ;;  %v2355_v46 = vld [vmem:[%s2948_s1 + $0x148] sm:$0xff]  ;;  %v296_v50 = vpack.c.b16 %v2581_v41, %v287_v40  ;;  %v2598_v55 = vpack.c.b16 %v293_v43, %v293_v43  ;;  %v2354_v1 = vld [vmem:[%s2948_s1 + $0x140] sm:$0xff]  ;;  %v2369_v6 = vld [vmem:[%s2948_s1 + $0x1b8] sm:$0xff] }
  0x18   : > { %487 = vmatpush.bf16.msra.mxu0 %v2342_v12  ;;  %v304_v42 = vshll.u32 %v294_v33, 16  ;;  %v302_v47 = vshrl.u32 %v294_v33, 16  ;;  %v309_v48 = vshll.u32 %v2573_v34, 16  ;;  %v316_v49 = vshll.u32 %v295_v37, 16  ;;  %v2315_v51 = vld [vmem:[%s2948_s1 + $0x8] sm:$0xff]  ;;  %v2314_v9 = vld [vmem:[%s2948_s1] sm:$0xff] }
  0x19   : > { %501 = vmatpush.bf16.msra.mxu1 %v2350_v13  ;;  %v314_v53 = vshrl.u32 %v295_v37, 16  ;;  %v321_v54 = vshll.u32 %v2578_v38, 16  ;;  %v326_v57 = vshrl.u32 %v296_v50, 16  ;;  %v328_v58 = vshll.u32 %v296_v50, 16  ;;  %v2377_v10 = vld [vmem:[%s2948_s1 + $0x1f8] sm:$0xff]  ;;  %v2376_v20 = vld [vmem:[%s2948_s1 + $0x1f0] sm:$0xff] }
  0x1a   : > { %515 = vmatpush.bf16.msra.mxu2 %v2358_v14  ;;  %v306_v52 = vrot.slane %v304_v42, 1  ;;  %v318_v56 = vrot.slane %v316_v49, 1  ;;  %v333_v59 = vshll.u32 %v2598_v55, 16  ;;  %v311_v63 = vrot.slane %v309_v48, 1  ;;  %v1770_v12 = vld [vmem:[%s2539_s24] sm:$0xf] }
  0x1b   : > { %689 = vmatpush.bf16.msra.mxu3 %v2318_v15  ;;  %v330_v0 = vrot.slane %v328_v58, 1  ;;  %v323_v4 = vrot.slane %v321_v54, 1  ;;  %v2312_v13 = vld [vmem:[%s2539_s24 + $0x8] sm:$0xf0]  ;;  %v2328_v14 = vld [vmem:[%s2948_s1 + $0x70] sm:$0xff]  ;;  %v2326_v26 = vld [vmem:[%s2948_s1 + $0x60] sm:$0xff] }
  0x1c   : > { %488 = vmatpush.bf16.msra.mxu0 %v2341_v16  ;;  %v307_v62 = vor.u32 %v306_v52, %v302_v47  ;;  %v319_v3 = vor.u32 %v318_v56, %v314_v53  ;;  %v335_v8 = vrot.slane %v333_v59, 1  ;;  %v2336_v16 = vld [vmem:[%s2948_s1 + $0xb0] sm:$0xff]  ;;  %v2327_v21 = vld [vmem:[%s2948_s1 + $0x68] sm:$0xff]  ;;  %v2325_v31 = vld [vmem:[%s2948_s1 + $0x58] sm:$0xff] }
  0x1d   : > { %502 = vmatpush.bf16.msra.mxu1 %v2349_v17  ;;  %v331_v7 = vor.u32 %v330_v0, %v326_v57  ;;  %v2368_v17 = vld [vmem:[%s2948_s1 + $0x1b0] sm:$0xff]  ;;  %v2335_v22 = vld [vmem:[%s2948_s1 + $0xa8] sm:$0xff]  ;;  %v2365_v33 = vld [vmem:[%s2948_s1 + $0x198] sm:$0xff] }
  0x1e   : > { %516 = vmatpush.bf16.msra.mxu2 %v2357_v18  ;;  %v312_v11 = vsel %vm300_vm0, %v307_v62, %v311_v63  ;;  %v324_v15 = vsel %vm300_vm0, %v319_v3, %v323_v4  ;;  %v2367_v23 = vld [vmem:[%s2948_s1 + $0x1a8] sm:$0xff]  ;;  %v2373_v35 = vld [vmem:[%s2948_s1 + $0x1d8] sm:$0xff]  ;;  %v728_v36 = vld [vmem:[%s2539_s24] sm:$0xee]  ;;  %v789_v62 = vrot.slane %v2573_v34, 1  ;;  %v792_v34 = vrot.slane %v2578_v38, 1 }
  0x1f   : > { %690 = vmatpush.bf16.msra.mxu3 %v2317_v19  ;;  %v336_v18 = vsel %vm300_vm0, %v331_v7, %v335_v8  ;;  %v1771_v19 = vor.u32 %v2312_v13, %v1770_v12  ;;  %v2375_v25 = vld [vmem:[%s2948_s1 + $0x1e8] sm:$0xff]  ;;  %v2324_v37 = vld [vmem:[%s2948_s1 + $0x50] sm:$0xff]  ;;  %v781_v42 = vunpack.c.l.b16 %v728_v36  ;;  %v2322_v50 = vld [vmem:[%s2948_s1 + $0x40] sm:$0xff] }
  0x20   : > { %489 = vmatpush.bf16.msra.mxu0 %v2340_v27  ;;  %v2334_v27 = vld [vmem:[%s2948_s1 + $0xa0] sm:$0xff]  ;;  %v2332_v39 = vld [vmem:[%s2948_s1 + $0x90] sm:$0xff]  ;;  %v2363_v47 = vld [vmem:[%s2948_s1 + $0x188] sm:$0xff] }
  0x21   : > { %503 = vmatpush.bf16.msra.mxu1 %v2348_v28  ;;  %v2366_v28 = vld [vmem:[%s2948_s1 + $0x1a0] sm:$0xff]  ;;  %v2364_v40 = vld [vmem:[%s2948_s1 + $0x190] sm:$0xff]  ;;  %v2701_v48 = vpack.c.b16 %v2556_v24, %v781_v42  ;;  %v2371_v49 = vld [vmem:[%s2948_s1 + $0x1c8] sm:$0xff] }
  0x22   : > { %517 = vmatpush.bf16.msra.mxu2 %v2356_v29  ;;  %v2374_v29 = vld [vmem:[%s2948_s1 + $0x1e0] sm:$0xff]  ;;  %v2372_v43 = vld [vmem:[%s2948_s1 + $0x1d0] sm:$0xff]  ;;  %v2385_v53 = vld [vmem:[%s2948_s1 + $0x238] sm:$0xff] }
  0x23   : > { %691 = vmatpush.bf16.msra.mxu3 %v2316_v32  ;;  %v2333_v32 = vld [vmem:[%s2948_s1 + $0x98] sm:$0xff]  ;;  %v2362_v52 = vld [vmem:[%s2948_s1 + $0x180] sm:$0xff]  ;;  %v1772_v58 = vld [vmem:[%s2539_s24 + $0xc] sm:$0xf0] }
  0x24   : > { %490 = vmatpush.bf16.msra.mxu0 %v2339_v44  ;;  %v2323_v44 = vld [vmem:[%s2948_s1 + $0x48] sm:$0xff]  ;;  %v2393_v56 = vld [vmem:[%s2948_s1 + $0x278] sm:$0xff]  ;;  %v2311_v57 = vld [vmem:[%s2539_s24 + $0x4] sm:$0xf] }
  0x25   : > { %504 = vmatpush.bf16.msra.mxu1 %v2347_v45  ;;  %v782_v45 = vunpack.c.h.b16 %v728_v36  ;;  %v1778_v59 = vld [vmem:[%s2539_s24 + $0x8] sm:$0xf]  ;;  %v2401_v63 = vld [vmem:[%s2948_s1 + $0x2b8] sm:$0xff]  ;;  %v2370_v0 = vld [vmem:[%s2948_s1 + $0x1c0] sm:$0xff] }
  0x26   : > { %518 = vmatpush.bf16.msra.mxu2 %v2355_v46  ;;  %v2331_v46 = vld [vmem:[%s2948_s1 + $0x88] sm:$0xff]  ;;  %v2400_v38 = vld [vmem:[%s2948_s1 + $0x2b0] sm:$0xff]  ;;  %v988_v13 = vld [vmem:[%s2539_s24 + $0x18] sm:$0x33] }
  0x27   : > { %692 = vmatpush.bf16.msra.mxu3 %v2315_v51  ;;  %v2330_v51 = vld [vmem:[%s2948_s1 + $0x80] sm:$0xff]  ;;  %v2719_v54 = vpack.c.b16 %v2567_v30, %v782_v45  ;;  %v2408_v8 = vld [vmem:[%s2948_s1 + $0x2f0] sm:$0xff]  ;;  %v2399_v12 = vld [vmem:[%s2948_s1 + $0x2a8] sm:$0xff]  ;;  %v1049_v45 = vshrl.u32 %v2701_v48, 16 }
  0x28   : > { %491 = vmatpush.bf16.msra.mxu0 %v2338_v60  ;;  %v2313_v60 = vld [vmem:[%s2539_s24 + $0x10] sm:$0xf0] }
  0x29   : > { %505 = vmatpush.bf16.msra.mxu1 %v2346_v61  ;;  %v788_v61 = vrot.slane %v2701_v48, 1  ;;  %v791_v3 = vrot.slane %v2719_v54, 1  ;;  %v1779_v4 = vor.u32 %v2313_v60, %v1778_v59  ;;  %v2380_v36 = vld [vmem:[%s2948_s1 + $0x210] sm:$0xff] }
  0x2a   : > { %519 = vmatpush.bf16.msra.mxu2 %v2354_v1  ;;  %v1775_v1 = vor.u32 %v2311_v57, %v1772_v58 }
  0x2b   : > { %693 = vmatpush.bf16.msra.mxu3 %v2314_v9  ;;  %492 = vmatmul.bf16.vlgmr.msra.gmra.mxu0 %v312_v11  ;;  %v790_v7 = vsel %vm787_vm1, %v788_v61, %v789_v62  ;;  %v793_v9 = vsel %vm787_vm1, %v791_v3, %v792_v34  ;;  %v2391_v11 = vld [vmem:[%s2948_s1 + $0x268] sm:$0xff]  ;;  %v1051_v62 = vrot.slane %v1049_v45, 1  ;;  %v2412_v45 = vld [vmem:[%s2948_s1 + $0x310] sm:$0xff] }
  0x2c   : > { %700 = vmatpush.bf16.msrb.mxu0 %v2329_v2  ;;  %506 = vmatmul.bf16.vlgmr.msra.gmra.mxu1 %v324_v15  ;;  %v2409_v2 = vld [vmem:[%s2948_s1 + $0x2f8] sm:$0xff]  ;;  %v2382_v15 = vld [vmem:[%s2948_s1 + $0x220] sm:$0xff]  ;;  %v2395_v61 = vld [vmem:[%s2948_s1 + $0x288] sm:$0xff] }
  0x2d   : > { %714 = vmatpush.bf16.msrb.mxu1 %v2337_v5  ;;  %520 = vmatmul.bf16.vlgmr.msra.gmra.mxu2 %v336_v18  ;;  %v2384_v5 = vld [vmem:[%s2948_s1 + $0x230] sm:$0xff]  ;;  %v1042_v18 = vunpack.c.h.b16 %v988_v13 }
  0x2e   : > { %944 = vmatpush.bf16.msrb.mxu2 %v2369_v6  ;;  %694 = vmatmul.bf16.vlgmr.msra.gmra.mxu3 %v1771_v19  ;;  %v2392_v6 = vld [vmem:[%s2948_s1 + $0x270] sm:$0xff]  ;;  %v989_v19 = vld [vmem:[%s2539_s24 + $0x20] sm:$0x3] }
  0x2f   : > { %958 = vmatpush.bf16.msrb.mxu3 %v2377_v10  ;;  %v2383_v10 = vld [vmem:[%s2948_s1 + $0x228] sm:$0xff] }
  0x30   : > { %701 = vmatpush.bf16.msrb.mxu0 %v2328_v14  ;;  %v2407_v14 = vld [vmem:[%s2948_s1 + $0x2e8] sm:$0xff] }
  0x31   : > { %715 = vmatpush.bf16.msrb.mxu1 %v2336_v16  ;;  %v2390_v16 = vld [vmem:[%s2948_s1 + $0x260] sm:$0xff] }
  0x32   : > { %945 = vmatpush.bf16.msrb.mxu2 %v2368_v17  ;;  %v729_v17 = vld [vmem:[%s2539_s24 + $0x8] sm:$0xe] }
  0x33   : > { %959 = vmatpush.bf16.msrb.mxu3 %v2376_v20  ;;  %v2398_v20 = vld [vmem:[%s2948_s1 + $0x2a0] sm:$0xff] }
  0x34   : > { %702 = vmatpush.bf16.msrb.mxu0 %v2327_v21  ;;  %v1041_v21 = vunpack.c.l.b16 %v988_v13 }
  0x35   : > { %716 = vmatpush.bf16.msrb.mxu1 %v2335_v22  ;;  %v2406_v22 = vld [vmem:[%s2948_s1 + $0x2e0] sm:$0xff] }
  0x36   : > { %946 = vmatpush.bf16.msrb.mxu2 %v2367_v23  ;;  %v783_v23 = vunpack.c.l.b16 %v729_v17 }
  0x37   : > { %960 = vmatpush.bf16.msrb.mxu3 %v2375_v25  ;;  %v1043_v25 = vunpack.c.l.b16 %v989_v19 }
  0x38   : > { %703 = vmatpush.bf16.msrb.mxu0 %v2326_v26  ;;  %v2381_v26 = vld [vmem:[%s2948_s1 + $0x218] sm:$0xff] }
  0x39   : > { %717 = vmatpush.bf16.msrb.mxu1 %v2334_v27  ;;  %v2389_v27 = vld [vmem:[%s2948_s1 + $0x258] sm:$0xff] }
  0x3a   : > { %947 = vmatpush.bf16.msrb.mxu2 %v2366_v28  ;;  %v2788_v28 = vpack.c.b16 %v1042_v18, %v1042_v18 }
  0x3b   : > { %961 = vmatpush.bf16.msrb.mxu3 %v2374_v29  ;;  %v2397_v29 = vld [vmem:[%s2948_s1 + $0x298] sm:$0xff] }
  0x3c   : > { %704 = vmatpush.bf16.msrb.mxu0 %v2325_v31  ;;  %v2793_v31 = vpack.c.b16 %v1041_v21, %v1041_v21  ;;  %v1074_v42 = vshrl.u32 %v2788_v28, 16  ;;  %v2416_v21 = vld [vmem:[%s2948_s1 + $0x330] sm:$0xff] }
  0x3d   : > { %718 = vmatpush.bf16.msrb.mxu1 %v2333_v32  ;;  %v2405_v32 = vld [vmem:[%s2948_s1 + $0x2d8] sm:$0xff] }
  0x3e   : > { %948 = vmatpush.bf16.msrb.mxu2 %v2365_v33  ;;  %v2799_v33 = vpack.c.b16 %v2581_v41, %v783_v23  ;;  %v1076_v59 = vrot.slane %v1074_v42, 1  ;;  %v2424_v23 = vld [vmem:[%s2948_s1 + $0x370] sm:$0xff]  ;;  %v1290_v42 = vld [vmem:[%s2539_s24] sm:$0xcc] }
  0x3f   : > { %962 = vmatpush.bf16.msrb.mxu3 %v2373_v35  ;;  %v2801_v35 = vpack.c.b16 %v1043_v25, %v1043_v25 }
  0x40   : > { %705 = vmatpush.bf16.msrb.mxu0 %v2324_v37  ;;  %v2388_v37 = vld [vmem:[%s2948_s1 + $0x250] sm:$0xff] }
  0x41   : > { %719 = vmatpush.bf16.msrb.mxu1 %v2332_v39  ;;  %v1066_v39 = vshrl.u32 %v2719_v54, 16 }
  0x42   : > { %949 = vmatpush.bf16.msrb.mxu2 %v2364_v40  ;;  %v1069_v40 = vshll.u32 %v2719_v54, 16  ;;  %v1094_v54 = vshll.u32 %v2801_v35, 16 }
  0x43   : > { %963 = vmatpush.bf16.msrb.mxu3 %v2372_v43  ;;  %v1077_v43 = vshll.u32 %v2788_v28, 16  ;;  %v1068_v57 = vrot.slane %v1066_v39, 1  ;;  %v2413_v39 = vld [vmem:[%s2948_s1 + $0x318] sm:$0xff] }
  0x44   : > { %706 = vmatpush.bf16.msrb.mxu0 %v2323_v44  ;;  %v2396_v44 = vld [vmem:[%s2948_s1 + $0x290] sm:$0xff]  ;;  %v1071_v58 = vrot.slane %v1069_v40, 2  ;;  %v2421_v40 = vld [vmem:[%s2948_s1 + $0x358] sm:$0xff] }
  0x45   : > { %720 = vmatpush.bf16.msrb.mxu1 %v2331_v46  ;;  %v1052_v46 = vshll.u32 %v2701_v48, 16  ;;  %v2379_v48 = vld [vmem:[%s2948_s1 + $0x208] sm:$0xff]  ;;  %v1079_v60 = vrot.slane %v1077_v43, 2  ;;  %v2429_v43 = vld [vmem:[%s2948_s1 + $0x398] sm:$0xff] }
  0x46   : > { %950 = vmatpush.bf16.msrb.mxu2 %v2363_v47  ;;  %v1057_v47 = vshrl.u32 %v2793_v31, 16 }
  0x47   : > { %964 = vmatpush.bf16.msrb.mxu3 %v2371_v49  ;;  %v1060_v49 = vshll.u32 %v2793_v31, 16 }
  0x48   : > { %707 = vmatpush.bf16.msrb.mxu0 %v2322_v50  ;;  %v2404_v50 = vld [vmem:[%s2948_s1 + $0x2d0] sm:$0xff] }
  0x49   : > { %721 = vmatpush.bf16.msrb.mxu1 %v2330_v51  ;;  %v1083_v51 = vshrl.u32 %v2799_v33, 16 }
  0x4a   : > { %951 = vmatpush.bf16.msrb.mxu2 %v2362_v52  ;;  %v1086_v52 = vshll.u32 %v2799_v33, 16 }
  0x4b   : > { %965 = vmatpush.bf16.msrb.mxu3 %v2370_v0  ;;  %708 = vmatmul.bf16.vlgmr.msrb.gmra.mxu0 %v1775_v1  ;;  %v1059_v0 = vrot.slane %v1057_v47, 1  ;;  %v1062_v1 = vrot.slane %v1060_v49, 2  ;;  %v1085_v3 = vrot.slane %v1083_v51, 1  ;;  %v2420_v47 = vld [vmem:[%s2948_s1 + $0x350] sm:$0xff]  ;;  %v1344_v49 = vunpack.c.h.b16 %v1290_v42 }
  0x4c   : > { %972 = vmatpush.bf16.msra.mxu0 %v2385_v53  ;;  %722 = vmatmul.bf16.vlgmr.msrb.gmra.mxu1 %v1779_v4  ;;  %v1091_v53 = vshrl.u32 %v2801_v35, 16  ;;  %v1088_v34 = vrot.slane %v1086_v52, 2  ;;  %v2411_v52 = vld [vmem:[%s2948_s1 + $0x308] sm:$0xff] }
  0x4d   : > { %1246 = vmatpush.bf16.msra.mxu1 %v2393_v56  ;;  %952 = vmatmul.bf16.vlgmr.msrb.gmra.mxu2 %v790_v7  ;;  %v2387_v56 = vld [vmem:[%s2948_s1 + $0x248] sm:$0xff]  ;;  %v2386_v7 = vld [vmem:[%s2948_s1 + $0x240] sm:$0xff] }
  0x4e   : > { %1260 = vmatpush.bf16.msra.mxu2 %v2401_v63  ;;  %966 = vmatmul.bf16.vlgmr.msrb.gmra.mxu3 %v793_v9  ;;  %v1054_v63 = vrot.slane %v1052_v46, 2  ;;  %v1093_v4 = vrot.slane %v1091_v53, 1  ;;  %v2394_v9 = vld [vmem:[%s2948_s1 + $0x280] sm:$0xff]  ;;  %v1089_v17 = vor.u32 %v1088_v34, %v1085_v3  ;;  %v1343_v46 = vunpack.c.l.b16 %v1290_v42 }
  0x4f   : > { %1274 = vmatpush.bf16.msra.mxu3 %v2409_v2  ;;  %v2403_v2 = vld [vmem:[%s2948_s1 + $0x2c8] sm:$0xff] }
  0x50   : > { %973 = vmatpush.bf16.msra.mxu0 %v2384_v5  ;;  %v1096_v5 = vrot.slane %v1094_v54, 2  ;;  %v1055_v13 = vor.u32 %v1054_v63, %v1051_v62  ;;  %v1346_v53 = vpack.c.b16 %v2556_v24, %v1343_v46  ;;  %v2419_v54 = vld [vmem:[%s2948_s1 + $0x348] sm:$0xff]  ;;  %v1357_v63 = vrot.slane %v2801_v35, 2 }
  0x51   : > { %1247 = vmatpush.bf16.msra.mxu1 %v2392_v6  ;;  %v2378_v6 = vld [vmem:[%s2948_s1 + $0x200] sm:$0xff] }
  0x52   : > { %1261 = vmatpush.bf16.msra.mxu2 %v2400_v38  ;;  %v794_v38 = vrot.slane %v2799_v33, 1  ;;  %v1097_v18 = vor.u32 %v1096_v5, %v1093_v4  ;;  %v2414_v33 = vld [vmem:[%s2948_s1 + $0x320] sm:$0xff]  ;;  %v1350_v24 = vrot.slane %v1346_v53, 2 }
  0x53   : > { %1275 = vmatpush.bf16.msra.mxu3 %v2408_v8  ;;  %v795_v8 = vrot.slane %v2598_v55, 1  ;;  %v2433_v55 = vld [vmem:[%s2948_s1 + $0x3b8] sm:$0xff] }
  0x54   : > { %974 = vmatpush.bf16.msra.mxu0 %v2383_v10  ;;  %v2417_v10 = vld [vmem:[%s2948_s1 + $0x338] sm:$0xff]  ;;  %v1098_v25 = vsel %vm1047_vm2, %v1089_v17, %v1097_v18 }
  0x55   : > { %1248 = vmatpush.bf16.msra.mxu1 %v2391_v11  ;;  %v1072_v11 = vor.u32 %v1071_v58, %v1068_v57  ;;  %v796_v19 = vsel %vm787_vm1, %v794_v38, %v795_v8  ;;  %v2410_v58 = vld [vmem:[%s2948_s1 + $0x300] sm:$0xff] }
  0x56   : > { %1262 = vmatpush.bf16.msra.mxu2 %v2399_v12  ;;  %v1080_v12 = vor.u32 %v1079_v60, %v1076_v59  ;;  %v1351_v59 = vrot.slane %v2793_v31, 2 }
  0x57   : > { %1276 = vmatpush.bf16.msra.mxu3 %v2407_v14  ;;  %v1063_v14 = vor.u32 %v1062_v1, %v1059_v0 }
  0x58   : > { %975 = vmatpush.bf16.msra.mxu0 %v2382_v15  ;;  %v2425_v15 = vld [vmem:[%s2948_s1 + $0x378] sm:$0xff]  ;;  %v1352_v0 = vsel %vm1349_vm3, %v1350_v24, %v1351_v59  ;;  %v2448_v24 = vld [vmem:[%s2949_s2] ss:$0 sm:$0xff] }
  0x59   : > { %1249 = vmatpush.bf16.msra.mxu1 %v2390_v16  ;;  %v2402_v16 = vld [vmem:[%s2948_s1 + $0x2c0] sm:$0xff] }
  0x5a   : > { %1263 = vmatpush.bf16.msra.mxu2 %v2398_v20  ;;  %v1081_v20 = vsel %vm1047_vm2, %v1072_v11, %v1080_v12 }
  0x5b   : > { %1277 = vmatpush.bf16.msra.mxu3 %v2406_v22  ;;  %v1064_v22 = vsel %vm1047_vm2, %v1055_v13, %v1063_v14 }
  0x5c   : > { %976 = vmatpush.bf16.msra.mxu0 %v2381_v26  ;;  %v2432_v26 = vld [vmem:[%s2948_s1 + $0x3b0] sm:$0xff] }
  0x5d   : > { %1250 = vmatpush.bf16.msra.mxu1 %v2389_v27  ;;  %v2415_v27 = vld [vmem:[%s2948_s1 + $0x328] sm:$0xff] }
  0x5e   : > { %1264 = vmatpush.bf16.msra.mxu2 %v2397_v29  ;;  %v2423_v29 = vld [vmem:[%s2948_s1 + $0x368] sm:$0xff] }
  0x5f   : > { %1278 = vmatpush.bf16.msra.mxu3 %v2405_v32  ;;  %v2431_v32 = vld [vmem:[%s2948_s1 + $0x3a8] sm:$0xff] }
  0x60   : > { %977 = vmatpush.bf16.msra.mxu0 %v2380_v36  ;;  %v2422_v36 = vld [vmem:[%s2948_s1 + $0x360] sm:$0xff] }
  0x61   : > { %1251 = vmatpush.bf16.msra.mxu1 %v2388_v37  ;;  %v2430_v37 = vld [vmem:[%s2948_s1 + $0x3a0] sm:$0xff] }
  0x62   : > { %1265 = vmatpush.bf16.msra.mxu2 %v2396_v44  ;;  %v1291_v44 = vld [vmem:[%s2539_s24 + $0x8] sm:$0xc] }
  0x63   : > { %1279 = vmatpush.bf16.msra.mxu3 %v2404_v50  ;;  %v2428_v50 = vld [vmem:[%s2948_s1 + $0x390] sm:$0xff]  ;;  %v1345_v51 = vunpack.c.l.b16 %v1291_v44 }
  0x64   : > { %978 = vmatpush.bf16.msra.mxu0 %v2379_v48  ;;  %v1347_v48 = vpack.c.b16 %v2567_v30, %v1344_v49  ;;  %v2418_v30 = vld [vmem:[%s2948_s1 + $0x340] sm:$0xff] }
  0x65   : > { %1252 = vmatpush.bf16.msra.mxu1 %v2387_v56  ;;  %v2427_v56 = vld [vmem:[%s2948_s1 + $0x388] sm:$0xff]  ;;  %v1348_v57 = vpack.c.b16 %v2581_v41, %v1345_v51  ;;  %v2426_v41 = vld [vmem:[%s2948_s1 + $0x380] sm:$0xff] }
  0x66   : > { %1266 = vmatpush.bf16.msra.mxu2 %v2395_v61  ;;  %v1353_v60 = vrot.slane %v1347_v48, 2  ;;  %v1354_v61 = vrot.slane %v2788_v28, 2 }
  0x67   : > { %1280 = vmatpush.bf16.msra.mxu3 %v2403_v2  ;;  %v1356_v62 = vrot.slane %v1348_v57, 2 }
  0x68   : > { %979 = vmatpush.bf16.msra.mxu0 %v2378_v6  ;;  %v1355_v31 = vsel %vm1349_vm3, %v1353_v60, %v1354_v61 }
  0x69   : > { %1253 = vmatpush.bf16.msra.mxu1 %v2386_v7  ;;  %v1358_v1 = vsel %vm1349_vm3, %v1356_v62, %v1357_v63 }
  0x6a   : > { %1267 = vmatpush.bf16.msra.mxu2 %v2394_v9 }
  0x6b   : > { %1281 = vmatpush.bf16.msra.mxu3 %v2402_v16  ;;  %980 = vmatmul.bf16.vlgmr.msra.gmra.mxu0 %v796_v19 }
  0x6c   : > { %1506 = vmatpush.bf16.msrb.mxu0 %v2417_v10  ;;  %1254 = vmatmul.bf16.vlgmr.msra.gmra.mxu1 %v1064_v22 }
  0x6d   : > { %1520 = vmatpush.bf16.msrb.mxu1 %v2425_v15  ;;  %1268 = vmatmul.bf16.vlgmr.msra.gmra.mxu2 %v1081_v20 }
  0x6e   : > { %1534 = vmatpush.bf16.msrb.mxu2 %v2433_v55  ;;  %1282 = vmatmul.bf16.vlgmr.msra.gmra.mxu3 %v1098_v25 }
  0x70   : > { %1507 = vmatpush.bf16.msrb.mxu0 %v2416_v21 }
  0x71   : > { %1521 = vmatpush.bf16.msrb.mxu1 %v2424_v23 }
  0x72   : > { %1535 = vmatpush.bf16.msrb.mxu2 %v2432_v26 }
  0x74   : > { %1508 = vmatpush.bf16.msrb.mxu0 %v2415_v27 }
  0x75   : > { %1522 = vmatpush.bf16.msrb.mxu1 %v2423_v29 }
  0x76   : > { %1536 = vmatpush.bf16.msrb.mxu2 %v2431_v32 }
  0x78   : > { %1509 = vmatpush.bf16.msrb.mxu0 %v2414_v33 }
  0x79   : > { %1523 = vmatpush.bf16.msrb.mxu1 %v2422_v36 }
  0x7a   : > { %1537 = vmatpush.bf16.msrb.mxu2 %v2430_v37 }
  0x7c   : > { %1510 = vmatpush.bf16.msrb.mxu0 %v2413_v39 }
  0x7d   : > { %1524 = vmatpush.bf16.msrb.mxu1 %v2421_v40 }
  0x7e   : > { %1538 = vmatpush.bf16.msrb.mxu2 %v2429_v43 }
  0x80   : > { %1511 = vmatpush.bf16.msrb.mxu0 %v2412_v45 }
  0x81   : > { %1525 = vmatpush.bf16.msrb.mxu1 %v2420_v47 }
  0x82   : > { %1539 = vmatpush.bf16.msrb.mxu2 %v2428_v50 }
  0x84   : > { %1512 = vmatpush.bf16.msrb.mxu0 %v2411_v52 }
  0x85   : > { %1526 = vmatpush.bf16.msrb.mxu1 %v2419_v54 }
  0x86   : > { %1540 = vmatpush.bf16.msrb.mxu2 %v2427_v56 }
  0x88   : > { %1513 = vmatpush.bf16.msrb.mxu0 %v2410_v58 }
  0x89   : > { %1527 = vmatpush.bf16.msrb.mxu1 %v2418_v30 }
  0x8a   : > { %1541 = vmatpush.bf16.msrb.mxu2 %v2426_v41 }
  0x8b   : > { %1514 = vmatmul.bf16.vlgmr.msrb.gmra.mxu0 %v1352_v0 }
  0x8c   : > { %1528 = vmatmul.bf16.vlgmr.msrb.gmra.mxu1 %v1355_v31 }
  0x8d   : > { %1542 = vmatmul.bf16.vlgmr.msrb.gmra.mxu2 %v1358_v1 }
  0xa8   : > { %v493_v2 = vpop.f32.mrf.mxu0 }
  0xa9   : > { %v507_v3 = vpop.f32.mrf.mxu1 }
  0xaa   : > { %v508_v16 = vadd.f32 %v507_v3, %v493_v2 }
  0xb0   : > { %v521_v28 = vpop.f32.mrf.mxu2  ;;  %v495_v34 = vpop.f32.mrf.mxu0 }
  0xb1   : > { %v509_v4 = vpop.f32.mrf.mxu1  ;;  %v695_v5 = vpop.f32.mrf.mxu3  ;;  %v522_v19 = vadd.f32 %v521_v28, %v508_v16 }
  0xb2   : > { %v510_v20 = vadd.f32 %v509_v4, %v495_v34 }
  0xb3   : > { %v696_v21 = vadd.f32 %v695_v5, %v522_v19 }
  0xb8   : > { %v523_v6 = vpop.f32.mrf.mxu2 }
  0xb9   : > { %v697_v35 = vpop.f32.mrf.mxu3  ;;  %v524_v25 = vadd.f32 %v523_v6, %v510_v20 }
  0xbb   : > { %v698_v33 = vadd.f32 %v697_v35, %v524_v25 }
  0xc8   : > { %v709_v7 = vpop.f32.mrf.mxu0 }
  0xc9   : > { %v723_v38 = vpop.f32.mrf.mxu1  ;;  %v710_v32 = vadd.f32 %v709_v7, %v696_v21 }
  0xcb   : > { %v724_v40 = vadd.f32 %v723_v38, %v710_v32 }
  0xd0   : > { %v953_v8 = vpop.f32.mrf.mxu2  ;;  %v711_v9 = vpop.f32.mrf.mxu0 }
  0xd1   : > { %v725_v10 = vpop.f32.mrf.mxu1  ;;  %v967_v11 = vpop.f32.mrf.mxu3  ;;  %v712_v43 = vadd.f32 %v711_v9, %v698_v33 }
  0xd2   : > { %v968_v29 = vadd.f32 %v967_v11, %v953_v8 }
  0xd3   : > { %v726_v54 = vadd.f32 %v725_v10, %v712_v43 }
  0xd8   : > { %v955_v12 = vpop.f32.mrf.mxu2 }
  0xd9   : > { %v969_v15 = vpop.f32.mrf.mxu3 }
  0xda   : > { %v970_v44 = vadd.f32 %v969_v15, %v955_v12 }
  0xe8   : > { %v981_v13 = vpop.f32.mrf.mxu0 }
  0xe9   : > { %v1255_v14 = vpop.f32.mrf.mxu1  ;;  %v982_v37 = vadd.f32 %v981_v13, %v968_v29 }
  0xeb   : > { %v986_v49 = vadd.f32 %v982_v37, %v724_v40 }
  0xf0   : > { %v1269_v55 = vpop.f32.mrf.mxu2  ;;  %v983_v17 = vpop.f32.mrf.mxu0 }
  0xf1   : > { %v1257_v18 = vpop.f32.mrf.mxu1  ;;  %v1283_v22 = vpop.f32.mrf.mxu3  ;;  %v1270_v36 = vadd.f32 %v1269_v55, %v1255_v14  ;;  %v984_v50 = vadd.f32 %v983_v17, %v970_v44 }
  0xf3   : > { %v1284_v45 = vadd.f32 %v1283_v22, %v1270_v36  ;;  %v987_v57 = vadd.f32 %v984_v50, %v726_v54 }
  0xf5   : > { %v1288_v48 = vadd.f32 %v1284_v45, %v986_v49 }
  0xf8   : > { %v1271_v23 = vpop.f32.mrf.mxu2 }
  0xf9   : > { %v1272_v46 = vadd.f32 %v1271_v23, %v1257_v18  ;;  %v1285_v47 = vpop.f32.mrf.mxu3 }
  0xfb   : > { %v1286_v56 = vadd.f32 %v1285_v47, %v1272_v46 }
  0xfd   : > { %v1289_v60 = vadd.f32 %v1286_v56, %v987_v57 }
 0x108   : > { %v1515_v26 = vpop.f32.mrf.mxu0 }
 0x109   : > { %v1529_v27 = vpop.f32.mrf.mxu1 }
 0x10a   : > { %v1530_v39 = vadd.f32 %v1529_v27, %v1515_v26 }
 0x110   : > { %v1543_v42 = vpop.f32.mrf.mxu2  ;;  %v1517_v52 = vpop.f32.mrf.mxu0 }
 0x111   : > { %v1544_v51 = vadd.f32 %v1543_v42, %v1530_v39  ;;  %v1531_v53 = vpop.f32.mrf.mxu1 }
 0x112   : > { %v1532_v59 = vadd.f32 %v1531_v53, %v1517_v52 }
 0x113   : > { %v1548_v58 = vadd.f32 %v1544_v51, %v1288_v48 }
 0x115   : > { %v1553_v41 = vadd.f32 %v2448_v24, %v1548_v58 }
 0x117   : > { %v1555_v0 = vmax.f32 %v1553_v41, 0.0 }
 0x118   : > { %v1545_v30 = vpop.f32.mrf.mxu2 }
 0x119   : > { %v1546_v61 = vadd.f32 %v1545_v30, %v1532_v59 }
 0x11b   : > { %v1549_v62 = vadd.f32 %v1546_v61, %v1289_v60 }
 0x11d   : > { %v1554_v63 = vadd.f32 %v2448_v24, %v1549_v62 }
 0x11f   : > { %v1556_v31 = vmax.f32 %v1554_v63, 0.0 }
 0x121   : > { %v2437_v1 = vpack.c.bf16 %v1556_v31, %v1555_v0 }
 0x123   : > { %2438 = vst [vmem:[%s170_s20] sm:$0xff] %v2437_v1  }
 0x124 PF: > { %s13_s12 = sadd.s32 1, %s2455_s12  }
 0x125   : > { %p10_p4 = scmp.ge.s32.totalorder %s13_s12, 4  }
 0x127   :  { %12 = sbr.rel (!%p10_p4) target bundleno = 1 (0x1), region = 66 }

// kernel: maya_forward.9
= control target key start
LH: loop header
LB: loop body
LE: loop exit
PB: predicated region body
PF: predicated region fallthrough
CT: control target
= control target key end

     0   :  { %s2715_s12 = smov 0   ;;  %s3280_s0 = inlined_call_operand.vmem [shape: bf16[2,40,384], index: 0, kind: input, shape index: {}]   ;;  %s3281_s1 = inlined_call_operand.vmem [shape: bf16[5,384,128], index: 1, kind: input, shape index: {}]   ;;  %s3282_s2 = inlined_call_operand.vmem [shape: f32[1,128], index: 2, kind: input, shape index: {}]   ;;  %s3283_s3 = inlined_call_operand.vmem [shape: bf16[2,32,128], index: 3, kind: output, shape index: {}]  }
   0x1 LB: > { %s1802_s13 = sadd.s32 4294967295, %s2693_s12   ;;  %p1806_p0 = scmp.ge.s32.totalorder %s2693_s12, 1  ;;  %s2693_s12 = sphi %s2715_s12, %s13_s12  }
   0x2   : > { %p137_p1 = scmp.lt.s32.totalorder %s2693_s12, 3 }
   0x4   : > { %p138_p2 = pnand %p1806_p0, %p137_p1 }
   0x5   : > { %p161_p3 = scmp.lt.s32.totalorder (!%p138_p2), %s1802_s13, 1 }
   0x6   : > { %141 = sbr.rel (%p138_p2) target bundleno = 313 (0x139), region = 32 }
   0xb   : > { %v2561_v0 = vld [vmem:[%s3281_s1 + $0xf8] sm:$0xff]  ;;  %v2560_v4 = vld [vmem:[%s3281_s1 + $0xf0] sm:$0xff]  ;;  %s3285_s13 = smov (!%p161_p3, %s1802_s13), 1  ;;  %v2559_v8 = vld [vmem:[%s3281_s1 + $0xe8] sm:$0xff]  ;;  %vm321_vm0 = vsmask.f32 7424 }
   0xc   : > { %v2569_v1 = vld [vmem:[%s3281_s1 + $0x138] sm:$0xff]  ;;  %532 = vmatpush.bf16.msra.mxu0 %v2561_v0  ;;  %v2568_v5 = vld [vmem:[%s3281_s1 + $0x130] sm:$0xff]  ;;  %s2669_s30 = smul.u32 60, %s3285_s13  ;;  %v2567_v9 = vld [vmem:[%s3281_s1 + $0x128] sm:$0xff]  ;;  %vm881_vm1 = vcmask 1046528   ;;  %vm1501_vm3 = vcmask 1045504  }
   0xd   : > { %v2577_v2 = vld [vmem:[%s3281_s1 + $0x178] sm:$0xff]  ;;  %551 = vmatpush.bf16.msra.mxu1 %v2569_v1  ;;  %v2576_v6 = vld [vmem:[%s3281_s1 + $0x170] sm:$0xff]  ;;  %v2575_v10 = vld [vmem:[%s3281_s1 + $0x168] sm:$0xff]  ;;  %vm1167_vm2 = vsmask.f32 6400  ;;  %s2520_s18 = sshll.u32 %s3285_s13, 4 }
   0xe   : > { %v2534_v3 = vld [vmem:[%s3281_s1 + $0x38] sm:$0xff]  ;;  %570 = vmatpush.bf16.msra.mxu2 %v2577_v2  ;;  %v2533_v7 = vld [vmem:[%s3281_s1 + $0x30] sm:$0xff]  ;;  %v2532_v11 = vld [vmem:[%s3281_s1 + $0x28] sm:$0xff]  ;;  %s2765_s16 = scalar_lea.vmem %s3280_s0, %s2669_s30  ;;  %s170_s21 = scalar_lea.vmem %s3283_s3, %s2520_s18 }
   0xf   : > { %765 = vmatpush.bf16.msra.mxu3 %v2534_v3  ;;  %v2558_v12 = vld [vmem:[%s3281_s1 + $0xe0] sm:$0xff]  ;;  %v230_v17 = vld [vmem:[%s2765_s16 + $0xc] sm:$0xff]  ;;  %v2557_v20 = vld [vmem:[%s3281_s1 + $0xd8] sm:$0xff] }
  0x10   : > { %533 = vmatpush.bf16.msra.mxu0 %v2560_v4  ;;  %v2566_v13 = vld [vmem:[%s3281_s1 + $0x120] sm:$0xff]  ;;  %v2784_v21 = vunpack.c.l.b16 %v230_v17  ;;  %v2786_v22 = vunpack.c.h.b16 %v230_v17  ;;  %v229_v23 = vld [vmem:[%s2765_s16 + $0x8] sm:$0xf]  ;;  %v2565_v24 = vld [vmem:[%s3281_s1 + $0x118] sm:$0xff] }
  0x11   : > { %552 = vmatpush.bf16.msra.mxu1 %v2568_v5  ;;  %v228_v14 = vld [vmem:[%s2765_s16] sm:$0xff]  ;;  %v1860_v25 = vld [vmem:[%s2765_s16 + $0x18] sm:$0xf]  ;;  %v231_v26 = vld [vmem:[%s2765_s16 + $0x14] sm:$0xf]  ;;  %v299_v32 = vunpack.c.l.b16 %v229_v23 }
  0x12   : > { %571 = vmatpush.bf16.msra.mxu2 %v2576_v6  ;;  %v2574_v15 = vld [vmem:[%s3281_s1 + $0x160] sm:$0xff]  ;;  %v297_v18 = vunpack.c.l.b16 %v228_v14  ;;  %v298_v19 = vunpack.c.h.b16 %v228_v14  ;;  %v2551_v29 = vld [vmem:[%s2765_s16 + $0x1c] sm:$0xf]  ;;  %v1862_v30 = vld [vmem:[%s2765_s16 + $0x24] sm:$0xf0]  ;;  %v2799_v33 = vunpack.c.l.b16 %v231_v26 }
  0x13   : > { %766 = vmatpush.bf16.msra.mxu3 %v2533_v7  ;;  %v2531_v16 = vld [vmem:[%s3281_s1 + $0x20] sm:$0xff]  ;;  %v2573_v34 = vld [vmem:[%s3281_s1 + $0x158] sm:$0xff]  ;;  %v2553_v37 = vld [vmem:[%s2765_s16 + $0x28] sm:$0xf0]  ;;  %v2811_v39 = vor.u32 %v2551_v29, %v1862_v30 }
  0x14   : > { %534 = vmatpush.bf16.msra.mxu0 %v2559_v8  ;;  %v2552_v27 = vld [vmem:[%s2765_s16 + $0x20] sm:$0xf0]  ;;  %v312_v28 = vpack.c.b16 %v2784_v21, %v297_v18  ;;  %v313_v31 = vpack.c.b16 %v2786_v22, %v298_v19  ;;  %v2530_v35 = vld [vmem:[%s3281_s1 + $0x18] sm:$0xff]  ;;  %v1868_v36 = vld [vmem:[%s2765_s16 + $0x20] sm:$0xf]  ;;  %v314_v44 = vpack.c.b16 %v2799_v33, %v299_v32 }
  0x15   : > { %553 = vmatpush.bf16.msra.mxu1 %v2567_v9  ;;  %v2809_v38 = vor.u32 %v2552_v27, %v1860_v25  ;;  %v2556_v40 = vld [vmem:[%s3281_s1 + $0xd0] sm:$0xff]  ;;  %v2826_v47 = vor.u32 %v2553_v37, %v1868_v36  ;;  %v342_v50 = vshll.u32 %v2811_v39, 16  ;;  %v2555_v51 = vld [vmem:[%s3281_s1 + $0xc8] sm:$0xff]  ;;  %v2554_v62 = vld [vmem:[%s3281_s1 + $0xc0] sm:$0xff]  ;;  %v366_v37 = vshrl.u32 %v2811_v39, 16 }
  0x16   : > { %572 = vmatpush.bf16.msra.mxu2 %v2575_v10  ;;  %v2564_v41 = vld [vmem:[%s3281_s1 + $0x110] sm:$0xff]  ;;  %v325_v42 = vshll.u32 %v312_v28, 16  ;;  %v337_v43 = vshll.u32 %v313_v31, 16  ;;  %v349_v48 = vshll.u32 %v314_v44, 16  ;;  %v2563_v52 = vld [vmem:[%s3281_s1 + $0x108] sm:$0xff]  ;;  %v323_v53 = vshrl.u32 %v312_v28, 16 }
  0x17   : > { %767 = vmatpush.bf16.msra.mxu3 %v2532_v11  ;;  %v2572_v45 = vld [vmem:[%s3281_s1 + $0x150] sm:$0xff]  ;;  %v330_v49 = vshll.u32 %v2809_v38, 16  ;;  %v335_v55 = vshrl.u32 %v313_v31, 16  ;;  %v2571_v57 = vld [vmem:[%s3281_s1 + $0x148] sm:$0xff]  ;;  %v347_v59 = vshrl.u32 %v314_v44, 16  ;;  %v354_v61 = vshll.u32 %v2826_v47, 16 }
  0x18   : > { %535 = vmatpush.bf16.msra.mxu0 %v2558_v12  ;;  %v2529_v46 = vld [vmem:[%s3281_s1 + $0x10] sm:$0xff]  ;;  %v327_v54 = vrot.slane %v325_v42, 1  ;;  %v339_v56 = vrot.slane %v337_v43, 1  ;;  %v2528_v58 = vld [vmem:[%s3281_s1 + $0x8] sm:$0xff]  ;;  %v351_v60 = vrot.slane %v349_v48, 1  ;;  %v2562_v63 = vld [vmem:[%s3281_s1 + $0x100] sm:$0xff] }
  0x19   : > { %554 = vmatpush.bf16.msra.mxu1 %v2566_v13  ;;  %v2570_v0 = vld [vmem:[%s3281_s1 + $0x140] sm:$0xff]  ;;  %v332_v2 = vrot.slane %v330_v49, 1  ;;  %v344_v4 = vrot.slane %v342_v50, 1  ;;  %v2522_v6 = vld [vmem:[%s2765_s16 + $0x8] sm:$0xf0]  ;;  %v356_v9 = vrot.slane %v354_v61, 1 }
  0x1a   : > { %573 = vmatpush.bf16.msra.mxu2 %v2574_v15  ;;  %v328_v1 = vor.u32 %v327_v54, %v323_v53  ;;  %v340_v3 = vor.u32 %v339_v56, %v335_v55  ;;  %v1968_v5 = vld [vmem:[%s2765_s16] sm:$0xf]  ;;  %v352_v8 = vor.u32 %v351_v60, %v347_v59  ;;  %v236_v10 = vld [vmem:[%s2765_s16 + $0x30] sm:$0x11]  ;;  %v2585_v11 = vld [vmem:[%s3281_s1 + $0x1b8] sm:$0xff]  ;;  %v374_v43 = vshrl.u32 %v2826_v47, 16 }
  0x1b   : > { %768 = vmatpush.bf16.msra.mxu3 %v2531_v16  ;;  %v2527_v7 = vld [vmem:[%s3281_s1] sm:$0xff]  ;;  %v2542_v12 = vld [vmem:[%s3281_s1 + $0x78] sm:$0xff]  ;;  %v1969_v14 = vor.u32 %v2522_v6, %v1968_v5  ;;  %v309_v17 = vunpack.c.l.b16 %v236_v10  ;;  %v310_v18 = vunpack.c.h.b16 %v236_v10  ;;  %v2584_v25 = vld [vmem:[%s3281_s1 + $0x1b0] sm:$0xff]  ;;  %v368_v53 = vor.u32 %v366_v37, %v344_v4 }
  0x1c   : > { %536 = vmatpush.bf16.msra.mxu0 %v2557_v20  ;;  %v237_v13 = vld [vmem:[%s2765_s16 + $0x38] sm:$0x1]  ;;  %v333_v15 = vsel %vm321_vm0, %v328_v1, %v332_v2  ;;  %v345_v16 = vsel %vm321_vm0, %v340_v3, %v344_v4  ;;  %v357_v19 = vsel %vm321_vm0, %v352_v8, %v356_v9  ;;  %v2541_v26 = vld [vmem:[%s3281_s1 + $0x70] sm:$0xff]  ;;  %v2583_v32 = vld [vmem:[%s3281_s1 + $0x1a8] sm:$0xff]  ;;  %v376_v56 = vor.u32 %v374_v43, %v356_v9 }
  0x1d   : > { %555 = vmatpush.bf16.msra.mxu1 %v2565_v24  ;;  %v2550_v20 = vld [vmem:[%s3281_s1 + $0xb8] sm:$0xff]  ;;  %v311_v24 = vunpack.c.l.b16 %v237_v13  ;;  %v2886_v27 = vpack.c.b16 %v309_v17, %v309_v17  ;;  %v2888_v28 = vpack.c.b16 %v310_v18, %v310_v18  ;;  %v2549_v29 = vld [vmem:[%s3281_s1 + $0xb0] sm:$0xff]  ;;  %v2591_v42 = vld [vmem:[%s3281_s1 + $0x1e8] sm:$0xff] }
  0x1e   : > { %574 = vmatpush.bf16.msra.mxu2 %v2573_v34  ;;  %v2593_v23 = vld [vmem:[%s3281_s1 + $0x1f8] sm:$0xff]  ;;  %v2592_v30 = vld [vmem:[%s3281_s1 + $0x1f0] sm:$0xff]  ;;  %v2540_v34 = vld [vmem:[%s3281_s1 + $0x68] sm:$0xff] }
  0x1f   : > { %769 = vmatpush.bf16.msra.mxu3 %v2530_v35  ;;  %v2896_v31 = vpack.c.b16 %v311_v24, %v311_v24  ;;  %v358_v35 = vshrl.u32 %v2809_v38, 16  ;;  %v362_v36 = vshll.u32 %v2886_v27, 16  ;;  %v2547_v48 = vld [vmem:[%s3281_s1 + $0xa0] sm:$0xff]  ;;  %v2581_v60 = vld [vmem:[%s3281_s1 + $0x198] sm:$0xff]  ;;  %v2580_v5 = vld [vmem:[%s3281_s1 + $0x190] sm:$0xff] }
  0x20   : > { %537 = vmatpush.bf16.msra.mxu0 %v2556_v40  ;;  %v370_v40 = vshll.u32 %v2888_v28, 16  ;;  %v2590_v55 = vld [vmem:[%s3281_s1 + $0x1e0] sm:$0xff]  ;;  %v2546_v3 = vld [vmem:[%s3281_s1 + $0x98] sm:$0xff]  ;;  %v2537_v6 = vld [vmem:[%s3281_s1 + $0x50] sm:$0xff] }
  0x21   : > { %556 = vmatpush.bf16.msra.mxu1 %v2564_v41  ;;  %v2548_v41 = vld [vmem:[%s3281_s1 + $0xa8] sm:$0xff]  ;;  %v378_v44 = vshll.u32 %v2896_v31, 16  ;;  %v2525_v59 = vld [vmem:[%s2765_s16 + $0x20] sm:$0xf0]  ;;  %v2589_v4 = vld [vmem:[%s3281_s1 + $0x1d8] sm:$0xff] }
  0x22   : > { %575 = vmatpush.bf16.msra.mxu2 %v2572_v45  ;;  %v2582_v45 = vld [vmem:[%s3281_s1 + $0x1a0] sm:$0xff]  ;;  %v372_v54 = vrot.slane %v370_v40, 1  ;;  %v2545_v8 = vld [vmem:[%s3281_s1 + $0x90] sm:$0xff]  ;;  %v2601_v24 = vld [vmem:[%s3281_s1 + $0x238] sm:$0xff] }
  0x23   : > { %770 = vmatpush.bf16.msra.mxu3 %v2529_v46  ;;  %v2539_v46 = vld [vmem:[%s3281_s1 + $0x60] sm:$0xff]  ;;  %v2588_v9 = vld [vmem:[%s3281_s1 + $0x1d0] sm:$0xff] }
  0x24   : > { %538 = vmatpush.bf16.msra.mxu0 %v2555_v51  ;;  %v360_v51 = vor.u32 %v358_v35, %v332_v2  ;;  %v2578_v17 = vld [vmem:[%s3281_s1 + $0x180] sm:$0xff] }
  0x25   : > { %557 = vmatpush.bf16.msra.mxu1 %v2563_v52  ;;  %v364_v52 = vrot.slane %v362_v36, 1  ;;  %v2535_v18 = vld [vmem:[%s3281_s1 + $0x40] sm:$0xff]  ;;  %v883_v36 = vrot.slane %v2809_v38, 1 }
  0x26   : > { %576 = vmatpush.bf16.msra.mxu2 %v2571_v57  ;;  %v380_v57 = vrot.slane %v378_v44, 1  ;;  %v2625_v44 = vld [vmem:[%s3281_s1 + $0x2f8] sm:$0xff] }
  0x27   : > { %771 = vmatpush.bf16.msra.mxu3 %v2528_v58  ;;  %v1980_v58 = vld [vmem:[%s2765_s16 + $0x18] sm:$0xf] }
  0x28   : > { %539 = vmatpush.bf16.msra.mxu0 %v2554_v62  ;;  %v2538_v62 = vld [vmem:[%s3281_s1 + $0x58] sm:$0xff]  ;;  %v1981_v1 = vor.u32 %v2525_v59, %v1980_v58  ;;  %v381_v2 = vsel %vm321_vm0, %v376_v56, %v380_v57  ;;  %v2615_v56 = vld [vmem:[%s3281_s1 + $0x2a8] sm:$0xff] }
  0x29   : > { %558 = vmatpush.bf16.msra.mxu1 %v2562_v63  ;;  %v365_v63 = vsel %vm321_vm0, %v360_v51, %v364_v52  ;;  %v2600_v52 = vld [vmem:[%s3281_s1 + $0x230] sm:$0xff]  ;;  %v2599_v57 = vld [vmem:[%s3281_s1 + $0x228] sm:$0xff] }
  0x2a   : > { %577 = vmatpush.bf16.msra.mxu2 %v2570_v0  ;;  %v373_v0 = vsel %vm321_vm0, %v368_v53, %v372_v54  ;;  %v2608_v54 = vld [vmem:[%s3281_s1 + $0x270] sm:$0xff]  ;;  %v2607_v58 = vld [vmem:[%s3281_s1 + $0x268] sm:$0xff] }
  0x2b   : > { %772 = vmatpush.bf16.msra.mxu3 %v2527_v7  ;;  %540 = vmatmul.bf16.vlgmr.msra.gmra.mxu0 %v333_v15  ;;  %v822_v7 = vld [vmem:[%s2765_s16] sm:$0xee]  ;;  %v2587_v15 = vld [vmem:[%s3281_s1 + $0x1c8] sm:$0xff] }
  0x2c   : > { %784 = vmatpush.bf16.msrb.mxu0 %v2542_v12  ;;  %559 = vmatmul.bf16.vlgmr.msra.gmra.mxu1 %v345_v16  ;;  %v875_v10 = vunpack.c.l.b16 %v822_v7  ;;  %v2536_v12 = vld [vmem:[%s3281_s1 + $0x48] sm:$0xff]  ;;  %v876_v13 = vunpack.c.h.b16 %v822_v7  ;;  %v891_v7 = vrot.slane %v2886_v27, 1  ;;  %v2612_v27 = vld [vmem:[%s3281_s1 + $0x290] sm:$0xff] }
  0x2d   : > { %578 = vmatmul.bf16.vlgmr.msra.gmra.mxu2 %v357_v19  ;;  %803 = vmatpush.bf16.msrb.mxu1 %v2550_v20  ;;  %v2543_v20 = vld [vmem:[%s3281_s1 + $0x80] sm:$0xff]  ;;  %v2623_v59 = vld [vmem:[%s3281_s1 + $0x2e8] sm:$0xff] }
  0x2e   : > { %1047 = vmatpush.bf16.msrb.mxu2 %v2585_v11  ;;  %773 = vmatmul.bf16.vlgmr.msra.gmra.mxu3 %v1969_v14  ;;  %v2579_v11 = vld [vmem:[%s3281_s1 + $0x188] sm:$0xff]  ;;  %v2977_v16 = vpack.c.b16 %v2784_v21, %v875_v10  ;;  %v2986_v19 = vpack.c.b16 %v2786_v22, %v876_v13  ;;  %v2605_v10 = vld [vmem:[%s3281_s1 + $0x258] sm:$0xff] }
  0x2f   : > { %1066 = vmatpush.bf16.msrb.mxu3 %v2593_v23  ;;  %v2544_v14 = vld [vmem:[%s3281_s1 + $0x88] sm:$0xff]  ;;  %v2617_v23 = vld [vmem:[%s3281_s1 + $0x2b8] sm:$0xff] }
  0x30   : > { %785 = vmatpush.bf16.msrb.mxu0 %v2541_v26  ;;  %v2521_v26 = vld [vmem:[%s2765_s16 + $0x4] sm:$0xf]  ;;  %v885_v40 = vrot.slane %v2986_v19, 1 }
  0x31   : > { %804 = vmatpush.bf16.msrb.mxu1 %v2549_v29  ;;  %v1970_v29 = vld [vmem:[%s2765_s16 + $0xc] sm:$0xf0] }
  0x32   : > { %1048 = vmatpush.bf16.msrb.mxu2 %v2584_v25  ;;  %v2586_v25 = vld [vmem:[%s3281_s1 + $0x1c0] sm:$0xff] }
  0x33   : > { %1067 = vmatpush.bf16.msrb.mxu3 %v2592_v30  ;;  %v1976_v30 = vld [vmem:[%s2765_s16 + $0x8] sm:$0xf] }
  0x34   : > { %786 = vmatpush.bf16.msrb.mxu0 %v2540_v34  ;;  %v882_v34 = vrot.slane %v2977_v16, 1 }
  0x35   : > { %805 = vmatpush.bf16.msrb.mxu1 %v2548_v41  ;;  %v886_v41 = vrot.slane %v2811_v39, 1 }
  0x36   : > { %1049 = vmatpush.bf16.msrb.mxu2 %v2583_v32  ;;  %v2523_v32 = vld [vmem:[%s2765_s16 + $0x10] sm:$0xf0]  ;;  %v884_v51 = vsel %vm881_vm1, %v882_v34, %v883_v36  ;;  %v2603_v34 = vld [vmem:[%s3281_s1 + $0x248] sm:$0xff] }
  0x37   : > { %1068 = vmatpush.bf16.msrb.mxu3 %v2591_v42  ;;  %v2609_v42 = vld [vmem:[%s3281_s1 + $0x278] sm:$0xff]  ;;  %v887_v53 = vsel %vm881_vm1, %v885_v40, %v886_v41 }
  0x38   : > { %787 = vmatpush.bf16.msrb.mxu0 %v2539_v46  ;;  %v2616_v46 = vld [vmem:[%s3281_s1 + $0x2b0] sm:$0xff] }
  0x39   : > { %806 = vmatpush.bf16.msrb.mxu1 %v2547_v48  ;;  %v1977_v48 = vor.u32 %v2523_v32, %v1976_v30  ;;  %v1181_v30 = vshrl.u32 %v2986_v19, 16  ;;  %v1184_v32 = vshll.u32 %v2986_v19, 16  ;;  %v1189_v19 = vrot.slane %v342_v50, 2 }
  0x3a   : > { %1050 = vmatpush.bf16.msrb.mxu2 %v2582_v45  ;;  %v1973_v45 = vor.u32 %v2521_v26, %v1970_v29  ;;  %v1172_v26 = vshll.u32 %v2977_v16, 16  ;;  %v2595_v29 = vld [vmem:[%s3281_s1 + $0x208] sm:$0xff]  ;;  %v1188_v50 = vrot.slane %v366_v37, 1  ;;  %v2618_v37 = vld [vmem:[%s3281_s1 + $0x2c0] sm:$0xff] }
  0x3b   : > { %1069 = vmatpush.bf16.msrb.mxu3 %v2590_v55  ;;  %545 = vmatmul.bf16.gmra.mxu0 %v365_v63  ;;  %v2624_v55 = vld [vmem:[%s3281_s1 + $0x2f0] sm:$0xff]  ;;  %v2606_v63 = vld [vmem:[%s3281_s1 + $0x260] sm:$0xff] }
  0x3c   : > { %788 = vmatpush.bf16.msrb.mxu0 %v2538_v62  ;;  %564 = vmatmul.bf16.gmra.mxu1 %v373_v0  ;;  %v2598_v62 = vld [vmem:[%s3281_s1 + $0x220] sm:$0xff] }
  0x3d   : > { %583 = vmatmul.bf16.gmra.mxu2 %v381_v2  ;;  %807 = vmatpush.bf16.msrb.mxu1 %v2546_v3  ;;  %v2622_v0 = vld [vmem:[%s3281_s1 + $0x2e0] sm:$0xff]  ;;  %v823_v2 = vld [vmem:[%s2765_s16 + $0x8] sm:$0xe]  ;;  %v2524_v3 = vld [vmem:[%s2765_s16 + $0x1c] sm:$0xf] }
  0x3e   : > { %1051 = vmatpush.bf16.msrb.mxu2 %v2581_v60  ;;  %778 = vmatmul.bf16.gmra.mxu3 %v1981_v1  ;;  %v2614_v60 = vld [vmem:[%s3281_s1 + $0x2a0] sm:$0xff]  ;;  %v2613_v1 = vld [vmem:[%s3281_s1 + $0x298] sm:$0xff] }
  0x3f   : > { %1070 = vmatpush.bf16.msrb.mxu3 %v2589_v4  ;;  %v1982_v4 = vld [vmem:[%s2765_s16 + $0x24] sm:$0xf0] }
  0x40   : > { %789 = vmatpush.bf16.msrb.mxu0 %v2537_v6  ;;  %v2526_v6 = vld [vmem:[%s2765_s16 + $0x28] sm:$0xf0]  ;;  %v1985_v13 = vor.u32 %v2524_v3, %v1982_v4 }
  0x41   : > { %808 = vmatpush.bf16.msrb.mxu1 %v2545_v8  ;;  %v2597_v8 = vld [vmem:[%s3281_s1 + $0x218] sm:$0xff] }
  0x42   : > { %1052 = vmatpush.bf16.msrb.mxu2 %v2580_v5  ;;  %v1988_v5 = vld [vmem:[%s2765_s16 + $0x20] sm:$0xf] }
  0x43   : > { %1071 = vmatpush.bf16.msrb.mxu3 %v2588_v9  ;;  %v893_v9 = vrot.slane %v2888_v28, 1  ;;  %v892_v28 = vsel %vm881_vm1, %v883_v36, %v891_v7 }
  0x44   : > { %790 = vmatpush.bf16.msrb.mxu0 %v2536_v12  ;;  %v877_v12 = vunpack.c.l.b16 %v823_v2  ;;  %v3152_v2 = vor.u32 %v1189_v19, %v1188_v50  ;;  %v2645_v19 = vld [vmem:[%s3281_s1 + $0x398] sm:$0xff] }
  0x45   : > { %809 = vmatpush.bf16.msrb.mxu1 %v2544_v14  ;;  %v1989_v14 = vor.u32 %v2526_v6, %v1988_v5  ;;  %v2629_v50 = vld [vmem:[%s3281_s1 + $0x318] sm:$0xff] }
  0x46   : > { %1053 = vmatpush.bf16.msrb.mxu2 %v2579_v11  ;;  %v2621_v11 = vld [vmem:[%s3281_s1 + $0x2d8] sm:$0xff] }
  0x47   : > { %1072 = vmatpush.bf16.msrb.mxu3 %v2587_v15  ;;  %v2596_v15 = vld [vmem:[%s3281_s1 + $0x210] sm:$0xff] }
  0x48   : > { %791 = vmatpush.bf16.msrb.mxu0 %v2535_v18  ;;  %v2604_v18 = vld [vmem:[%s3281_s1 + $0x250] sm:$0xff] }
  0x49   : > { %810 = vmatpush.bf16.msrb.mxu1 %v2543_v20  ;;  %v2620_v20 = vld [vmem:[%s3281_s1 + $0x2d0] sm:$0xff] }
  0x4a   : > { %1054 = vmatpush.bf16.msrb.mxu2 %v2578_v17  ;;  %v894_v17 = vsel %vm881_vm1, %v886_v41, %v893_v9  ;;  %v1177_v41 = vrot.slane %v330_v49, 2  ;;  %v2649_v49 = vld [vmem:[%s3281_s1 + $0x3b8] sm:$0xff] }
  0x4b   : > { %1073 = vmatpush.bf16.msrb.mxu3 %v2586_v25  ;;  %792 = vmatmul.bf16.vlgmr.msrb.gmra.mxu0 %v1973_v45  ;;  %v1169_v25 = vshrl.u32 %v2977_v16, 16  ;;  %v2619_v16 = vld [vmem:[%s3281_s1 + $0x2c8] sm:$0xff]  ;;  %v1176_v45 = vrot.slane %v358_v35, 1  ;;  %v1183_v35 = vrot.slane %v1181_v30, 1 }
  0x4c   : > { %1085 = vmatpush.bf16.msra.mxu0 %v2601_v24  ;;  %811 = vmatmul.bf16.vlgmr.msrb.gmra.mxu1 %v1977_v48  ;;  %v2611_v24 = vld [vmem:[%s3281_s1 + $0x288] sm:$0xff]  ;;  %v1174_v48 = vrot.slane %v1172_v26, 2  ;;  %v2646_v26 = vld [vmem:[%s3281_s1 + $0x3a0] sm:$0xff] }
  0x4d   : > { %1381 = vmatpush.bf16.msra.mxu1 %v2609_v42  ;;  %1055 = vmatmul.bf16.vlgmr.msrb.gmra.mxu2 %v884_v51  ;;  %v2610_v42 = vld [vmem:[%s3281_s1 + $0x280] sm:$0xff]  ;;  %v1200_v51 = vrot.slane %v374_v43, 1  ;;  %v1108_v43 = vld [vmem:[%s2765_s16 + $0x30] sm:$0x33] }
  0x4e   : > { %1400 = vmatpush.bf16.msra.mxu2 %v2617_v23  ;;  %1074 = vmatmul.bf16.vlgmr.msrb.gmra.mxu3 %v887_v53  ;;  %v3090_v23 = vpack.c.b16 %v2799_v33, %v877_v12  ;;  %v2602_v53 = vld [vmem:[%s3281_s1 + $0x240] sm:$0xff]  ;;  %v1161_v3 = vunpack.c.l.b16 %v1108_v43  ;;  %v1162_v4 = vunpack.c.h.b16 %v1108_v43  ;;  %v2632_v12 = vld [vmem:[%s3281_s1 + $0x330] sm:$0xff]  ;;  %v2643_v43 = vld [vmem:[%s3281_s1 + $0x388] sm:$0xff] }
  0x4f   : > { %1419 = vmatpush.bf16.msra.mxu3 %v2625_v44  ;;  %v1201_v44 = vrot.slane %v354_v61, 2  ;;  %v2594_v61 = vld [vmem:[%s3281_s1 + $0x200] sm:$0xff] }
  0x50   : > { %1086 = vmatpush.bf16.msra.mxu0 %v2600_v52  ;;  %v1193_v36 = vshrl.u32 %v3090_v23, 16  ;;  %v1196_v40 = vshll.u32 %v3090_v23, 16  ;;  %v1186_v52 = vrot.slane %v1184_v32, 2  ;;  %v2638_v32 = vld [vmem:[%s3281_s1 + $0x360] sm:$0xff] }
  0x51   : > { %1382 = vmatpush.bf16.msra.mxu1 %v2608_v54  ;;  %v3154_v6 = vor.u32 %v1201_v44, %v1200_v51 }
  0x52   : > { %1401 = vmatpush.bf16.msra.mxu2 %v2616_v46  ;;  %v1171_v46 = vrot.slane %v1169_v25, 1  ;;  %v1195_v54 = vrot.slane %v1193_v36, 1 }
  0x53   : > { %1420 = vmatpush.bf16.msra.mxu3 %v2624_v55  ;;  %v1198_v55 = vrot.slane %v1196_v40, 2 }
  0x54   : > { %1087 = vmatpush.bf16.msra.mxu0 %v2599_v57  ;;  %v2641_v57 = vld [vmem:[%s3281_s1 + $0x378] sm:$0xff] }
  0x55   : > { %1383 = vmatpush.bf16.msra.mxu1 %v2607_v58  ;;  %v1109_v58 = vld [vmem:[%s2765_s16 + $0x38] sm:$0x3]  ;;  %v1199_v5 = vor.u32 %v1198_v55, %v1195_v54  ;;  %v1442_v54 = vld [vmem:[%s2765_s16] sm:$0xcc] }
  0x56   : > { %1402 = vmatpush.bf16.msra.mxu2 %v2615_v56  ;;  %v2633_v56 = vld [vmem:[%s3281_s1 + $0x338] sm:$0xff]  ;;  %v1163_v7 = vunpack.c.l.b16 %v1109_v58  ;;  %v1495_v58 = vunpack.c.l.b16 %v1442_v54 }
  0x57   : > { %1421 = vmatpush.bf16.msra.mxu3 %v2623_v59  ;;  %v888_v59 = vrot.slane %v3090_v23, 1 }
  0x58   : > { %1088 = vmatpush.bf16.msra.mxu0 %v2598_v62  ;;  %v1175_v62 = vor.u32 %v1174_v48, %v1171_v46  ;;  %v895_v46 = vrot.slane %v2896_v31, 1  ;;  %v2636_v31 = vld [vmem:[%s3281_s1 + $0x350] sm:$0xff] }
  0x59   : > { %1384 = vmatpush.bf16.msra.mxu1 %v2606_v63  ;;  %v3147_v63 = vor.u32 %v1177_v41, %v1176_v45  ;;  %v2637_v45 = vld [vmem:[%s3281_s1 + $0x358] sm:$0xff] }
  0x5a   : > { %1403 = vmatpush.bf16.msra.mxu2 %v2614_v60  ;;  %v889_v60 = vrot.slane %v2826_v47, 1 }
  0x5b   : > { %1422 = vmatpush.bf16.msra.mxu3 %v2622_v0  ;;  %797 = vmatmul.bf16.gmra.mxu0 %v1985_v13  ;;  %v2648_v0 = vld [vmem:[%s3281_s1 + $0x3b0] sm:$0xff]  ;;  %v3169_v13 = vpack.c.b16 %v1161_v3, %v1161_v3 }
  0x5c   : > { %1089 = vmatpush.bf16.msra.mxu0 %v2597_v8  ;;  %816 = vmatmul.bf16.gmra.mxu1 %v1989_v14  ;;  %v2640_v8 = vld [vmem:[%s3281_s1 + $0x370] sm:$0xff]  ;;  %v890_v9 = vsel %vm881_vm1, %v888_v59, %v889_v60  ;;  %v1203_v14 = vsel %vm1167_vm2, %v1199_v5, %v3154_v6  ;;  %v2627_v59 = vld [vmem:[%s3281_s1 + $0x308] sm:$0xff] }
  0x5d   : > { %1385 = vmatpush.bf16.msra.mxu1 %v2605_v10  ;;  %1060 = vmatmul.bf16.gmra.mxu2 %v892_v28  ;;  %v1179_v10 = vsel %vm1167_vm2, %v1175_v62, %v3147_v63  ;;  %v2647_v28 = vld [vmem:[%s3281_s1 + $0x3a8] sm:$0xff]  ;;  %v1208_v23 = vshll.u32 %v3169_v13, 16 }
  0x5e   : > { %1404 = vmatpush.bf16.msra.mxu2 %v2613_v1  ;;  %1079 = vmatmul.bf16.gmra.mxu3 %v894_v17  ;;  %v1187_v1 = vor.u32 %v1186_v52, %v1183_v35  ;;  %v2639_v17 = vld [vmem:[%s3281_s1 + $0x368] sm:$0xff]  ;;  %v896_v35 = vsel %vm881_vm1, %v889_v60, %v895_v46  ;;  %v1496_v60 = vunpack.c.h.b16 %v1442_v54 }
  0x5f   : > { %1423 = vmatpush.bf16.msra.mxu3 %v2621_v11  ;;  %v1210_v36 = vrot.slane %v1208_v23, 2 }
  0x60   : > { %1090 = vmatpush.bf16.msra.mxu0 %v2596_v15  ;;  %v1191_v11 = vsel %vm1167_vm2, %v1187_v1, %v3152_v2  ;;  %v3178_v15 = vpack.c.b16 %v1163_v7, %v1163_v7  ;;  %v1498_v1 = vpack.c.b16 %v2784_v21, %v1495_v58  ;;  %v1499_v3 = vpack.c.b16 %v2786_v22, %v1496_v60 }
  0x61   : > { %1386 = vmatpush.bf16.msra.mxu1 %v2604_v18  ;;  %v2631_v18 = vld [vmem:[%s3281_s1 + $0x328] sm:$0xff]  ;;  %v1506_v21 = vrot.slane %v2811_v39, 2 }
  0x62   : > { %1405 = vmatpush.bf16.msra.mxu2 %v2612_v27  ;;  %v3171_v27 = vpack.c.b16 %v1162_v4, %v1162_v4  ;;  %v1226_v30 = vshll.u32 %v3178_v15, 16  ;;  %v1502_v5 = vrot.slane %v1498_v1, 2  ;;  %v1505_v7 = vrot.slane %v1499_v3, 2 }
  0x63   : > { %1424 = vmatpush.bf16.msra.mxu3 %v2620_v20  ;;  %v1205_v20 = vshrl.u32 %v3169_v13, 16  ;;  %v1515_v39 = vrot.slane %v3178_v15, 2 }
  0x64   : > { %1091 = vmatpush.bf16.msra.mxu0 %v2595_v29  ;;  %v1217_v25 = vshll.u32 %v3171_v27, 16  ;;  %v1223_v29 = vshrl.u32 %v3178_v15, 16  ;;  %v1228_v44 = vrot.slane %v1226_v30, 2 }
  0x65   : > { %1387 = vmatpush.bf16.msra.mxu1 %v2603_v34  ;;  %v2630_v34 = vld [vmem:[%s3281_s1 + $0x320] sm:$0xff] }
  0x66   : > { %1406 = vmatpush.bf16.msra.mxu2 %v2611_v24  ;;  %v1214_v24 = vshrl.u32 %v3171_v27, 16  ;;  %v1219_v41 = vrot.slane %v1217_v25, 2 }
  0x67   : > { %1425 = vmatpush.bf16.msra.mxu3 %v2619_v16  ;;  %v1207_v16 = vrot.slane %v1205_v20, 1 }
  0x68   : > { %1092 = vmatpush.bf16.msra.mxu0 %v2594_v61  ;;  %v1216_v40 = vrot.slane %v1214_v24, 1  ;;  %v2644_v61 = vld [vmem:[%s3281_s1 + $0x390] sm:$0xff] }
  0x69   : > { %1388 = vmatpush.bf16.msra.mxu1 %v2602_v53  ;;  %v1211_v48 = vor.u32 %v1210_v36, %v1207_v16 }
  0x6a   : > { %1407 = vmatpush.bf16.msra.mxu2 %v2610_v42  ;;  %v1225_v42 = vrot.slane %v1223_v29, 1 }
  0x6b   : > { %1426 = vmatpush.bf16.msra.mxu3 %v2618_v37  ;;  %1093 = vmatmul.bf16.vlgmr.msra.gmra.mxu0 %v890_v9  ;;  %v1212_v52 = vsel %vm1167_vm2, %v3147_v63, %v1211_v48  ;;  %v2628_v37 = vld [vmem:[%s3281_s1 + $0x310] sm:$0xff]  ;;  %v2642_v63 = vld [vmem:[%s3281_s1 + $0x380] sm:$0xff]  ;;  %v1509_v9 = vrot.slane %v2826_v47, 2 }
  0x6c   : > { %1667 = vmatpush.bf16.msrb.mxu0 %v2633_v56  ;;  %1389 = vmatmul.bf16.vlgmr.msra.gmra.mxu1 %v1179_v10  ;;  %v1229_v51 = vor.u32 %v1228_v44, %v1225_v42  ;;  %v1511_v10 = vrot.slane %v3169_v13, 2 }
  0x6d   : > { %1686 = vmatpush.bf16.msrb.mxu1 %v2641_v57  ;;  %1408 = vmatmul.bf16.vlgmr.msra.gmra.mxu2 %v1191_v11  ;;  %v2635_v57 = vld [vmem:[%s3281_s1 + $0x348] sm:$0xff]  ;;  %v1516_v13 = vsel %vm1501_vm3, %v1509_v9, %v1515_v39 }
  0x6e   : > { %1705 = vmatpush.bf16.msrb.mxu2 %v2649_v49  ;;  %1427 = vmatmul.bf16.vlgmr.msra.gmra.mxu3 %v1203_v14  ;;  %v1220_v49 = vor.u32 %v1219_v41, %v1216_v40  ;;  %v1230_v55 = vsel %vm1167_vm2, %v3154_v6, %v1229_v51  ;;  %v1503_v6 = vrot.slane %v2809_v38, 2  ;;  %v1513_v38 = vrot.slane %v3171_v27, 2 }
  0x6f   : > { %2661 = vmatpush.bf16.msrb.mxu3 %v2633_v56  ;;  %v1443_v56 = vld [vmem:[%s2765_s16 + $0x8] sm:$0xc] }
  0x70   : > { %1668 = vmatpush.bf16.msrb.mxu0 %v2632_v12  ;;  %v1221_v53 = vsel %vm1167_vm2, %v3152_v2, %v1220_v49  ;;  %v1497_v62 = vunpack.c.l.b16 %v1443_v56  ;;  %v2626_v2 = vld [vmem:[%s3281_s1 + $0x300] sm:$0xff]  ;;  %v1504_v22 = vsel %vm1501_vm3, %v1502_v5, %v1503_v6  ;;  %v1514_v47 = vsel %vm1501_vm3, %v1506_v21, %v1513_v38 }
  0x71   : > { %1687 = vmatpush.bf16.msrb.mxu1 %v2640_v8 }
  0x72   : > { %1706 = vmatpush.bf16.msrb.mxu2 %v2648_v0  ;;  %v2634_v0 = vld [vmem:[%s3281_s1 + $0x340] sm:$0xff]  ;;  %v1500_v4 = vpack.c.b16 %v2799_v33, %v1497_v62  ;;  %v1507_v33 = vsel %vm1501_vm3, %v1505_v7, %v1506_v21 }
  0x73   : > { %2662 = vmatpush.bf16.msrb.mxu3 %v2632_v12  ;;  %v1512_v12 = vsel %vm1501_vm3, %v1503_v6, %v1511_v10 }
  0x74   : > { %1669 = vmatpush.bf16.msrb.mxu0 %v2631_v18  ;;  %v1508_v8 = vrot.slane %v1500_v4, 2 }
  0x75   : > { %1688 = vmatpush.bf16.msrb.mxu1 %v2639_v17 }
  0x76   : > { %1707 = vmatpush.bf16.msrb.mxu2 %v2647_v28  ;;  %v1510_v11 = vsel %vm1501_vm3, %v1508_v8, %v1509_v9 }
  0x77   : > { %2663 = vmatpush.bf16.msrb.mxu3 %v2631_v18 }
  0x78   : > { %1670 = vmatpush.bf16.msrb.mxu0 %v2630_v34 }
  0x79   : > { %1689 = vmatpush.bf16.msrb.mxu1 %v2638_v32 }
  0x7a   : > { %1708 = vmatpush.bf16.msrb.mxu2 %v2646_v26 }
  0x7b   : > { %2664 = vmatpush.bf16.msrb.mxu3 %v2630_v34  ;;  %1098 = vmatmul.bf16.gmra.mxu0 %v896_v35 }
  0x7c   : > { %1671 = vmatpush.bf16.msrb.mxu0 %v2629_v50  ;;  %1394 = vmatmul.bf16.gmra.mxu1 %v1212_v52 }
  0x7d   : > { %1690 = vmatpush.bf16.msrb.mxu1 %v2637_v45  ;;  %1413 = vmatmul.bf16.gmra.mxu2 %v1221_v53 }
  0x7e   : > { %1709 = vmatpush.bf16.msrb.mxu2 %v2645_v19  ;;  %1432 = vmatmul.bf16.gmra.mxu3 %v1230_v55 }
  0x7f   : > { %2665 = vmatpush.bf16.msrb.mxu3 %v2629_v50 }
  0x80   : > { %1672 = vmatpush.bf16.msrb.mxu0 %v2628_v37 }
  0x81   : > { %1691 = vmatpush.bf16.msrb.mxu1 %v2636_v31 }
  0x82   : > { %1710 = vmatpush.bf16.msrb.mxu2 %v2644_v61 }
  0x83   : > { %2666 = vmatpush.bf16.msrb.mxu3 %v2628_v37 }
  0x84   : > { %1673 = vmatpush.bf16.msrb.mxu0 %v2627_v59 }
  0x85   : > { %1692 = vmatpush.bf16.msrb.mxu1 %v2635_v57 }
  0x86   : > { %1711 = vmatpush.bf16.msrb.mxu2 %v2643_v43 }
  0x87   : > { %2667 = vmatpush.bf16.msrb.mxu3 %v2627_v59 }
  0x88   : > { %1674 = vmatpush.bf16.msrb.mxu0 %v2626_v2 }
  0x89   : > { %1693 = vmatpush.bf16.msrb.mxu1 %v2634_v0 }
  0x8a   : > { %1712 = vmatpush.bf16.msrb.mxu2 %v2642_v63 }
  0x8b   : > { %2668 = vmatpush.bf16.msrb.mxu3 %v2626_v2  ;;  %1675 = vmatmul.bf16.vlgmr.msrb.gmra.mxu0 %v1504_v22 }
  0x8c   : > { %1694 = vmatmul.bf16.vlgmr.msrb.gmra.mxu1 %v1507_v33 }
  0x8d   : > { %1713 = vmatmul.bf16.vlgmr.msrb.gmra.mxu2 %v1510_v11 }
  0x8e   : > { %1680 = vmatmul.bf16.vlgmr.msrb.gmra.mxu3 %v1512_v12 }
  0x9c   : > { %1699 = vmatmul.bf16.gmra.mxu1 %v1514_v47 }
  0x9d   : > { %1718 = vmatmul.bf16.gmra.mxu2 %v1516_v13 }
  0xa8   : > { %v541_v14 = vpop.f32.mrf.mxu0 }
  0xa9   : > { %v560_v28 = vpop.f32.mrf.mxu1 }
  0xaa   : > { %v561_v17 = vadd.f32 %v560_v28, %v541_v14 }
  0xb0   : > { %v579_v18 = vpop.f32.mrf.mxu2  ;;  %v543_v24 = vpop.f32.mrf.mxu0 }
  0xb1   : > { %v774_v20 = vpop.f32.mrf.mxu3  ;;  %v580_v23 = vadd.f32 %v579_v18, %v561_v17  ;;  %v562_v25 = vpop.f32.mrf.mxu1 }
  0xb2   : > { %v563_v26 = vadd.f32 %v562_v25, %v543_v24 }
  0xb3   : > { %v775_v29 = vadd.f32 %v774_v20, %v580_v23 }
  0xb8   : > { %v581_v30 = vpop.f32.mrf.mxu2  ;;  %v546_v15 = vpop.f32.mrf.mxu0 }
  0xb9   : > { %v776_v27 = vpop.f32.mrf.mxu3  ;;  %v582_v32 = vadd.f32 %v581_v30, %v563_v26  ;;  %v565_v34 = vpop.f32.mrf.mxu1 }
  0xba   : > { %v566_v16 = vadd.f32 %v565_v34, %v546_v15 }
  0xbb   : > { %v777_v36 = vadd.f32 %v776_v27, %v582_v32 }
  0xc0   : > { %v584_v40 = vpop.f32.mrf.mxu2  ;;  %v548_v42 = vpop.f32.mrf.mxu0 }
  0xc1   : > { %v779_v41 = vpop.f32.mrf.mxu3  ;;  %v585_v19 = vadd.f32 %v584_v40, %v566_v16  ;;  %v567_v44 = vpop.f32.mrf.mxu1 }
  0xc2   : > { %v568_v45 = vadd.f32 %v567_v44, %v548_v42 }
  0xc3   : > { %v780_v46 = vadd.f32 %v779_v41, %v585_v19 }
  0xc8   : > { %v586_v48 = vpop.f32.mrf.mxu2  ;;  %v793_v51 = vpop.f32.mrf.mxu0 }
  0xc9   : > { %v781_v49 = vpop.f32.mrf.mxu3  ;;  %v587_v50 = vadd.f32 %v586_v48, %v568_v45  ;;  %v794_v61 = vadd.f32 %v793_v51, %v775_v29  ;;  %v812_v31 = vpop.f32.mrf.mxu1  ;;  %v2678_v48 = vld [vmem:[%s3282_s2] ss:$0 sm:$0xff] }
  0xcb   : > { %v3264_v35 = vadd.f32 %v781_v49, %v587_v50  ;;  %v813_v52 = vadd.f32 %v812_v31, %v794_v61 }
  0xd0   : > { %v1056_v53 = vpop.f32.mrf.mxu2  ;;  %v795_v54 = vpop.f32.mrf.mxu0 }
  0xd1   : > { %v1075_v37 = vpop.f32.mrf.mxu3  ;;  %v814_v55 = vpop.f32.mrf.mxu1  ;;  %v796_v27 = vadd.f32 %v795_v54, %v777_v36 }
  0xd2   : > { %v1076_v2 = vadd.f32 %v1075_v37, %v1056_v53 }
  0xd3   : > { %v815_v44 = vadd.f32 %v814_v55, %v796_v27 }
  0xd8   : > { %v1058_v43 = vpop.f32.mrf.mxu2  ;;  %v798_v57 = vpop.f32.mrf.mxu0 }
  0xd9   : > { %v1077_v56 = vpop.f32.mrf.mxu3  ;;  %v799_v58 = vadd.f32 %v798_v57, %v780_v46  ;;  %v817_v59 = vpop.f32.mrf.mxu1 }
  0xda   : > { %v1078_v32 = vadd.f32 %v1077_v56, %v1058_v43 }
  0xdb   : > { %v818_v60 = vadd.f32 %v817_v59, %v799_v58 }
  0xe0   : > { %v1061_v62 = vpop.f32.mrf.mxu2  ;;  %v800_v63 = vpop.f32.mrf.mxu0 }
  0xe1   : > { %v3266_v0 = vpop.f32.mrf.mxu1  ;;  %v1080_v1 = vpop.f32.mrf.mxu3  ;;  %v801_v58 = vadd.f32 %v800_v63, %v3264_v35 }
  0xe2   : > { %v1081_v33 = vadd.f32 %v1080_v1, %v1061_v62 }
  0xe8   : > { %v1063_v3 = vpop.f32.mrf.mxu2  ;;  %v1094_v4 = vpop.f32.mrf.mxu0 }
  0xe9   : > { %v1095_v5 = vadd.f32 %v1094_v4, %v1076_v2  ;;  %v1390_v6 = vpop.f32.mrf.mxu1  ;;  %v1082_v21 = vpop.f32.mrf.mxu3 }
  0xea   : > { %v1083_v59 = vadd.f32 %v1082_v21, %v1063_v3 }
  0xeb   : > { %v1104_v7 = vadd.f32 %v1095_v5, %v813_v52 }
  0xf0   : > { %v1409_v8 = vpop.f32.mrf.mxu2  ;;  %v1096_v9 = vpop.f32.mrf.mxu0 }
  0xf1   : > { %v1392_v10 = vpop.f32.mrf.mxu1  ;;  %v1428_v22 = vpop.f32.mrf.mxu3  ;;  %v1410_v25 = vadd.f32 %v1409_v8, %v1390_v6  ;;  %v1097_v40 = vadd.f32 %v1096_v9, %v1078_v32 }
  0xf3   : > { %v1429_v29 = vadd.f32 %v1428_v22, %v1410_v25  ;;  %v1105_v49 = vadd.f32 %v1097_v40, %v815_v44 }
  0xf5   : > { %v1438_v41 = vadd.f32 %v1429_v29, %v1104_v7  ;;  %v820_v7 = vadd.f32 %v3266_v0, %v801_v58 }
  0xf8   : > { %v1411_v11 = vpop.f32.mrf.mxu2  ;;  %v1099_v12 = vpop.f32.mrf.mxu0 }
  0xf9   : > { %v1100_v38 = vadd.f32 %v1099_v12, %v1081_v33  ;;  %v1395_v39 = vpop.f32.mrf.mxu1  ;;  %v1430_v13 = vpop.f32.mrf.mxu3  ;;  %v1412_v15 = vadd.f32 %v1411_v11, %v1392_v10 }
  0xfb   : > { %v1106_v47 = vadd.f32 %v1100_v38, %v818_v60  ;;  %v1431_v45 = vadd.f32 %v1430_v13, %v1412_v15 }
  0xfd   : > { %v1439_v61 = vadd.f32 %v1431_v45, %v1105_v49 }
 0x100   : > { %v1414_v14 = vpop.f32.mrf.mxu2  ;;  %v1101_v28 = vpop.f32.mrf.mxu0 }
 0x101   : > { %v1397_v17 = vpop.f32.mrf.mxu1  ;;  %v1433_v20 = vpop.f32.mrf.mxu3  ;;  %v1415_v37 = vadd.f32 %v1414_v14, %v1395_v39  ;;  %v1102_v1 = vadd.f32 %v1101_v28, %v1083_v59 }
 0x103   : > { %v1434_v56 = vadd.f32 %v1433_v20, %v1415_v37  ;;  %v1107_v35 = vadd.f32 %v1102_v1, %v820_v7 }
 0x105   : > { %v1440_v4 = vadd.f32 %v1434_v56, %v1106_v47 }
 0x108   : > { %v1416_v18 = vpop.f32.mrf.mxu2  ;;  %v1676_v23 = vpop.f32.mrf.mxu0 }
 0x109   : > { %v1695_v24 = vpop.f32.mrf.mxu1  ;;  %v1435_v19 = vpop.f32.mrf.mxu3  ;;  %v1417_v60 = vadd.f32 %v1416_v18, %v1397_v17 }
 0x10a   : > { %v1696_v26 = vadd.f32 %v1695_v24, %v1676_v23 }
 0x10b   : > { %v1436_v8 = vadd.f32 %v1435_v19, %v1417_v60 }
 0x10d   : > { %v1441_v21 = vadd.f32 %v1436_v8, %v1107_v35 }
 0x110   : > { %v1714_v30 = vpop.f32.mrf.mxu2  ;;  %v1678_v42 = vpop.f32.mrf.mxu0 }
 0x111   : > { %v1715_v34 = vadd.f32 %v1714_v30, %v1696_v26  ;;  %v1697_v16 = vpop.f32.mrf.mxu1  ;;  %v1681_v54 = vpop.f32.mrf.mxu3 }
 0x112   : > { %v1698_v50 = vadd.f32 %v1697_v16, %v1678_v42 }
 0x113   : > { %v1724_v46 = vadd.f32 %v1715_v34, %v1438_v41 }
 0x115   : > { %v1731_v31 = vadd.f32 %v2678_v48, %v1724_v46 }
 0x117   : > { %2679 = vtanh.f32 %v1731_v31 }
 0x118   : > { %v1716_v51 = vpop.f32.mrf.mxu2 }
 0x119   : > { %v1717_v36 = vadd.f32 %v1716_v51, %v1698_v50  ;;  %v1700_v52 = vpop.f32.mrf.mxu1  ;;  %v1683_v10 = vpop.f32.mrf.mxu3 }
 0x11a   : > { %v1701_v55 = vadd.f32 %v1700_v52, %v1681_v54 }
 0x11b   : > { %v1725_v53 = vadd.f32 %v1717_v36, %v1439_v61 }
 0x11d   : > { %v1732_v43 = vadd.f32 %v2678_v48, %v1725_v53  ;;  %v2680_v2 = vpop.eup %2679 }
 0x11f   : > { %2681 = vtanh.f32 %v1732_v43 }
 0x120   : > { %v1719_v57 = vpop.f32.mrf.mxu2 }
 0x121   : > { %v1720_v62 = vadd.f32 %v1719_v57, %v1701_v55  ;;  %v1702_v5 = vpop.f32.mrf.mxu1 }
 0x122   : > { %v1703_v63 = vadd.f32 %v1702_v5, %v1683_v10 }
 0x123   : > { %v1726_v22 = vadd.f32 %v1720_v62, %v1440_v4 }
 0x125   : > { %v2682_v6 = vpop.eup %2681  ;;  %v1733_v11 = vadd.f32 %v2678_v48, %v1726_v22 }
 0x126   : > { %v2653_v9 = vpack.c.bf16 %v2682_v6, %v2680_v2 }
 0x127   : > { %2683 = vtanh.f32 %v1733_v11 }
 0x128   : > { %2654 = vst [vmem:[%s170_s21] sm:$0xff] %v2653_v9   ;;  %v1721_v3 = vpop.f32.mrf.mxu2 }
 0x129   : > { %v1722_v33 = vadd.f32 %v1721_v3, %v1703_v63 }
 0x12b   : > { %v1727_v12 = vadd.f32 %v1722_v33, %v1441_v21 }
 0x12d   : > { %v1734_v38 = vadd.f32 %v2678_v48, %v1727_v12  ;;  %v2684_v0 = vpop.eup %2683 }
 0x12f   : > { %2685 = vtanh.f32 %v1734_v38 }
 0x135   : > { %v2686_v39 = vpop.eup %2685 }
 0x136   : > { %v2658_v47 = vpack.c.bf16 %v2686_v39, %v2684_v0 }
 0x138   : > { %2660 = vst [vmem:[%s170_s21 + $0x8] sm:$0xff] %v2658_v47  }
 0x139 PF: > { %s13_s12 = sadd.s32 1, %s2693_s12  }
 0x13a   : > { %p10_p4 = scmp.ge.s32.totalorder %s13_s12, 4  }
 0x13c   :  { %12 = sbr.rel (!%p10_p4) target bundleno = 1 (0x1), region = 66 }

</bundles_post_ra>
